<compile_context>
chip_gen: v6e
topology: v6e:2x2x1
jax: 0.10.0
libtpu: 0.0.40
codegen_flags: <defaults>
</compile_context>

<pallas_src>
import functools

import numpy as np
import jax
import jax.numpy as jnp
from jax import lax
from jax.experimental import pallas as pl
from jax.experimental.pallas import tpu as pltpu


# ----------------------------------------------------------------------------
# Pallas kernel: full 2-layer bidirectional LSTM recurrence + final linear head.
# Everything (flattened embedded sequence, packed weights, intermediates) in VMEM.
# ----------------------------------------------------------------------------
def _textrnn_kernel(
    x0_ref,            # (T*B, E)   time-major flattened embeddings (row = t*B + b)
    w_in0_ref,         # (E,  8H)   [fwd 4H | bwd 4H], gate order [i, f, o, g]
    b_in0_ref,         # (1,  8H)   combined (b_ih + b_hh) biases, same packing
    w_hh0f_ref,        # (H,  4H)
    w_hh0b_ref,        # (H,  4H)
    w_in1_ref,         # (2H, 8H)
    b_in1_ref,         # (1,  8H)
    w_hh1f_ref,        # (H,  4H)
    w_hh1b_ref,        # (H,  4H)
    w_lin_ref,         # (2H, C)
    b_lin_ref,         # (1,  C)
    out_ref,           # (B,  C)
    seq1_ref,          # scratch (T*B, 2H): layer-0 outputs (fwd | bwd)
    gin_ref,           # scratch (T*B, 8H): pre-projected input gates (reused per layer)
    *, T, B, H,
):
    f32 = jnp.float32

    def lstm_step(gates, c):
        # gates: (B, 4H) packed [i, f, o, g] -> 1 sigmoid + 1 tanh EUP launch.
        sig = jax.nn.sigmoid(gates[:, 0:3 * H])
        g = jnp.tanh(gates[:, 3 * H:4 * H])
        i = sig[:, 0:H]
        f = sig[:, H:2 * H]
        o = sig[:, 2 * H:3 * H]
        c_new = f * c + i * g
        h_new = o * jnp.tanh(c_new)
        return h_new, c_new

    zeros_h = jnp.zeros((B, H), f32)

    # ---------------- layer 0 ----------------
    # One batched input projection for BOTH directions, bias folded in.
    gin_ref[...] = (
        jnp.dot(x0_ref[...], w_in0_ref[...], preferred_element_type=f32)
        + b_in0_ref[...]
    )                                                    # (T*B, 8H)

    w_hh0f = w_hh0f_ref[...]
    w_hh0b = w_hh0b_ref[...]

    hf, cf = zeros_h, zeros_h
    hb, cb = zeros_h, zeros_h
    # Fully unrolled; forward chain processes t, backward chain processes T-1-t.
    for t in range(T):
        tb = T - 1 - t
        gf = gin_ref[t * B:(t + 1) * B, 0:4 * H] + jnp.dot(
            hf, w_hh0f, preferred_element_type=f32)
        gb = gin_ref[tb * B:(tb + 1) * B, 4 * H:8 * H] + jnp.dot(
            hb, w_hh0b, preferred_element_type=f32)
        hf, cf = lstm_step(gf, cf)
        hb, cb = lstm_step(gb, cb)
        seq1_ref[t * B:(t + 1) * B, 0:H] = hf
        seq1_ref[tb * B:(tb + 1) * B, H:2 * H] = hb

    # ---------------- layer 1 ----------------
    gin_ref[...] = (
        jnp.dot(seq1_ref[...], w_in1_ref[...], preferred_element_type=f32)
        + b_in1_ref[...]
    )                                                    # (T*B, 8H)

    w_hh1f = w_hh1f_ref[...]
    w_hh1b = w_hh1b_ref[...]

    hf, cf = zeros_h, zeros_h
    hb, cb = zeros_h, zeros_h
    for t in range(T):
        tb = T - 1 - t
        gf = gin_ref[t * B:(t + 1) * B, 0:4 * H] + jnp.dot(
            hf, w_hh1f, preferred_element_type=f32)
        gb = gin_ref[tb * B:(tb + 1) * B, 4 * H:8 * H] + jnp.dot(
            hb, w_hh1b, preferred_element_type=f32)
        hf, cf = lstm_step(gf, cf)
        hb, cb = lstm_step(gb, cb)

    # ---- torch.cat((h[-2], h[-1]), dim=1) -> Linear ----
    hcat = jnp.concatenate([hf, hb], axis=1)             # (B, 2H)
    out_ref[...] = (
        jnp.dot(hcat, w_lin_ref[...], preferred_element_type=f32) + b_lin_ref[...]
    )


# ----------------------------------------------------------------------------
# Wrapper: embedding lookup (glue), weight repacking, pallas_call
# ----------------------------------------------------------------------------
def _repack_ifgo_to_ifog(w, H):
    # PyTorch LSTM packs gates as [i, f, g, o] along the 4H axis; reorder to
    # [i, f, o, g] so the kernel does one sigmoid over [:3H] and one tanh over [3H:].
    return jnp.concatenate(
        [w[..., 0:2 * H], w[..., 3 * H:4 * H], w[..., 2 * H:3 * H]], axis=-1)


def textrnn_forward(tokens, p):
    B, T = tokens.shape
    H = p["w_hh0f"].shape[0]
    E = p["emb"].shape[1]
    C = p["w_lin"].shape[1]

    # Glue (XLA): embedding gather + time-major flatten (row index = t*B + b).
    emb = jnp.take(p["emb"], tokens, axis=0)                   # (B, T, E)
    x0 = jnp.transpose(emb, (1, 0, 2)).reshape(T * B, E)       # (T*B, E)

    rp = lambda w: _repack_ifgo_to_ifog(w, H)
    # One-time weight packing (would be done once at parameter-load time).
    w_in0 = jnp.concatenate([rp(p["w_ih0f"]), rp(p["w_ih0b"])], axis=1)  # (E, 8H)
    b_in0 = jnp.concatenate([rp(p["b0f"]), rp(p["b0b"])], axis=1)        # (1, 8H)
    w_in1 = jnp.concatenate([rp(p["w_ih1f"]), rp(p["w_ih1b"])], axis=1)  # (2H, 8H)
    b_in1 = jnp.concatenate([rp(p["b1f"]), rp(p["b1b"])], axis=1)        # (1, 8H)

    kernel_inputs = (
        x0,
        w_in0, b_in0, rp(p["w_hh0f"]), rp(p["w_hh0b"]),
        w_in1, b_in1, rp(p["w_hh1f"]), rp(p["w_hh1b"]),
        p["w_lin"], p["b_lin"],
    )

    vmem_spec = pl.BlockSpec(memory_space=pltpu.MemorySpace.VMEM)
    out = pl.pallas_call(
        functools.partial(_textrnn_kernel, T=T, B=B, H=H),
        out_shape=jax.ShapeDtypeStruct((B, C), jnp.float32),
        in_specs=[vmem_spec] * len(kernel_inputs),
        out_specs=vmem_spec,
        scratch_shapes=[
            pltpu.VMEM((T * B, 2 * H), jnp.float32),   # layer-0 output sequence
            pltpu.VMEM((T * B, 8 * H), jnp.float32),   # pre-projected input gates
        ],
    )(*kernel_inputs)
    return out


# ----------------------------------------------------------------------------
# Pure-JAX reference (same math, lax.scan, PyTorch gate order) for checking
# ----------------------------------------------------------------------------
def _lstm_dir_ref(x_seq, w_ih, w_hh, b, reverse):
    B = x_seq.shape[1]
    H = w_hh.shape[0]
    xs = x_seq[::-1] if reverse else x_seq

    def step(carry, x_t):
        h, c = carry
        gates = x_t @ w_ih + h @ w_hh + b
        i = jax.nn.sigmoid(gates[:, 0 * H:1 * H])
        f = jax.nn.sigmoid(gates[:, 1 * H:2 * H])
        g = jnp.tanh(gates[:, 2 * H:3 * H])
        o = jax.nn.sigmoid(gates[:, 3 * H:4 * H])
        c = f * c + i * g
        h = o * jnp.tanh(c)
        return (h, c), h

    (h_final, _), hs = lax.scan(step, (jnp.zeros((B, H)), jnp.zeros((B, H))), xs)
    hs = hs[::-1] if reverse else hs
    return hs, h_final


def textrnn_forward_ref(tokens, p):
    emb = jnp.take(p["emb"], tokens, axis=0).transpose(1, 0, 2)   # (T, B, E)
    hs0f, _ = _lstm_dir_ref(emb, p["w_ih0f"], p["w_hh0f"], p["b0f"], False)
    hs0b, _ = _lstm_dir_ref(emb, p["w_ih0b"], p["w_hh0b"], p["b0b"], True)
    seq1 = jnp.concatenate([hs0f, hs0b], axis=-1)                 # (T, B, 2H)
    _, h1f = _lstm_dir_ref(seq1, p["w_ih1f"], p["w_hh1f"], p["b1f"], False)
    _, h1b = _lstm_dir_ref(seq1, p["w_ih1b"], p["w_hh1b"], p["b1b"], True)
    hcat = jnp.concatenate([h1f, h1b], axis=1)
    return hcat @ p["w_lin"] + p["b_lin"]


# ----------------------------------------------------------------------------
# Deterministic parameter initialization (shapes from Model.__init__)
# ----------------------------------------------------------------------------
def make_params(key, vocab_size, embed_size, out_dim, num_classes):
    H, E = out_dim, embed_size
    ks = jax.random.split(key, 16)

    def u(k, shape, scale):
        return jax.random.uniform(k, shape, jnp.float32, -scale, scale)

    emb = u(ks[0], (vocab_size, E), 0.5).at[1].set(0.0)   # padding_idx=1

    s = 1.0 / np.sqrt(H)
    p = {"emb": emb}
    layer_in = {"0": E, "1": 2 * H}
    i = 1
    for layer in ("0", "1"):
        for d in ("f", "b"):
            p[f"w_ih{layer}{d}"] = u(ks[i], (layer_in[layer], 4 * H), s); i += 1
            p[f"w_hh{layer}{d}"] = u(ks[i], (H, 4 * H), s); i += 1
            p[f"b{layer}{d}"] = u(ks[i], (1, 4 * H), s); i += 1
    p["w_lin"] = u(ks[13], (2 * H, num_classes), 1.0 / np.sqrt(2 * H))
    p["b_lin"] = u(ks[14], (1, num_classes), 1.0 / np.sqrt(2 * H))
    return p


if __name__ == "__main__":
    # config: vocab_size=50, embed_size=32, out_dim(hidden)=32, num_classes=4
    B, T = 2, 8
    V, E, H, C = 50, 32, 32, 4

    key = jax.random.PRNGKey(0)
    k_tok, k_par = jax.random.split(key)
    tokens = jax.random.randint(k_tok, (B, T), 0, V, dtype=jnp.int32)
    params = make_params(k_par, V, E, H, C)

    out = jax.block_until_ready(textrnn_forward(tokens, params))
    ref = jax.block_until_ready(textrnn_forward_ref(tokens, params))

    assert out.shape == (B, C), out.shape
    np.testing.assert_allclose(np.asarray(out), np.asarray(ref), rtol=1e-4, atol=1e-5)
    print("KERNEL_OK")
</pallas_src>

<mosaic_0001>
module attributes {stable_mosaic.version = 11 : i64} {
  func.func @_textrnn_kernel(%arg0: memref<16x32xf32, #tpu.memory_space<vmem>>, %arg1: memref<32x256xf32, #tpu.memory_space<vmem>>, %arg2: memref<1x256xf32, #tpu.memory_space<vmem>>, %arg3: memref<32x128xf32, #tpu.memory_space<vmem>>, %arg4: memref<32x128xf32, #tpu.memory_space<vmem>>, %arg5: memref<64x256xf32, #tpu.memory_space<vmem>>, %arg6: memref<1x256xf32, #tpu.memory_space<vmem>>, %arg7: memref<32x128xf32, #tpu.memory_space<vmem>>, %arg8: memref<32x128xf32, #tpu.memory_space<vmem>>, %arg9: memref<64x4xf32, #tpu.memory_space<vmem>>, %arg10: memref<1x4xf32, #tpu.memory_space<vmem>>, %arg11: memref<2x4xf32, #tpu.memory_space<vmem>>, %arg12: memref<16x64xf32, #tpu.memory_space<vmem>>, %arg13: memref<16x256xf32, #tpu.memory_space<vmem>>) attributes {dimension_semantics = [], scalar_prefetch = 0 : i64, scratch_operands = 2 : i64, tpu.core_type = #tpu.core_type<tc>} {
    %cst = arith.constant 0.000000e+00 : f32
    %0 = vector.broadcast %cst : f32 to vector<2x32xf32>
    %c0 = arith.constant 0 : index
    %c0_0 = arith.constant 0 : index
    %1 = vector.load %arg0[%c0, %c0_0] : memref<16x32xf32, #tpu.memory_space<vmem>>, vector<16x32xf32>
    %c0_1 = arith.constant 0 : index
    %c0_2 = arith.constant 0 : index
    %2 = vector.load %arg1[%c0_1, %c0_2] : memref<32x256xf32, #tpu.memory_space<vmem>>, vector<32x256xf32>
    %cst_3 = arith.constant dense<0.000000e+00> : vector<16x256xf32>
    %3 = tpu.matmul %1, %2, %cst_3 {dimension_numbers = #tpu.dot_dimension_numbers<[1], [0], [0], [1], [0, 0, 1, 1], [], []>} : vector<16x32xf32>, vector<32x256xf32>, vector<16x256xf32> -> vector<16x256xf32>
    %c0_4 = arith.constant 0 : index
    %c0_5 = arith.constant 0 : index
    %4 = vector.load %arg2[%c0_4, %c0_5] : memref<1x256xf32, #tpu.memory_space<vmem>>, vector<1x256xf32>
    %5 = vector.broadcast %4 : vector<1x256xf32> to vector<16x256xf32>
    %6 = arith.addf %3, %5 : vector<16x256xf32>
    %c0_6 = arith.constant 0 : index
    %c0_7 = arith.constant 0 : index
    %7 = vector.load %arg13[%c0_6, %c0_7] : memref<16x256xf32, #tpu.memory_space<vmem>>, vector<16x256xf32>
    tpu.vector_store %arg13[%c0_6, %c0_7], %6 {strides = array<i32>} : memref<16x256xf32, #tpu.memory_space<vmem>>, vector<16x256xf32>,
    %c0_8 = arith.constant 0 : index
    %c0_9 = arith.constant 0 : index
    %8 = vector.load %arg3[%c0_8, %c0_9] : memref<32x128xf32, #tpu.memory_space<vmem>>, vector<32x128xf32>
    %c0_10 = arith.constant 0 : index
    %c0_11 = arith.constant 0 : index
    %9 = vector.load %arg4[%c0_10, %c0_11] : memref<32x128xf32, #tpu.memory_space<vmem>>, vector<32x128xf32>
    %c0_12 = arith.constant 0 : index
    %c0_13 = arith.constant 0 : index
    %10 = vector.load %arg13[%c0_12, %c0_13] : memref<16x256xf32, #tpu.memory_space<vmem>>, vector<2x128xf32>
    %cst_14 = arith.constant dense<0.000000e+00> : vector<2x128xf32>
    %11 = tpu.matmul %0, %8, %cst_14 {dimension_numbers = #tpu.dot_dimension_numbers<[1], [0], [0], [1], [0, 0, 1, 1], [], []>} : vector<2x32xf32>, vector<32x128xf32>, vector<2x128xf32> -> vector<2x128xf32>
    %12 = arith.addf %10, %11 : vector<2x128xf32>
    %c14 = arith.constant 14 : index
    %c128 = arith.constant 128 : index
    %13 = vector.load %arg13[%c14, %c128] : memref<16x256xf32, #tpu.memory_space<vmem>>, vector<2x128xf32>
    %cst_15 = arith.constant dense<0.000000e+00> : vector<2x128xf32>
    %14 = tpu.matmul %0, %9, %cst_15 {dimension_numbers = #tpu.dot_dimension_numbers<[1], [0], [0], [1], [0, 0, 1, 1], [], []>} : vector<2x32xf32>, vector<32x128xf32>, vector<2x128xf32> -> vector<2x128xf32>
    %15 = arith.addf %13, %14 : vector<2x128xf32>
    %16 = vector.extract_strided_slice %12 {offsets = [0, 0], sizes = [2, 96], strides = [1, 1]} : vector<2x128xf32> to vector<2x96xf32>
    %17 = arith.negf %16 : vector<2x96xf32>
    %18 = math.exp %17 : vector<2x96xf32>
    %cst_16 = arith.constant 1.000000e+00 : f32
    %19 = vector.broadcast %cst_16 : f32 to vector<2x96xf32>
    %20 = arith.addf %19, %18 : vector<2x96xf32>
    %21 = arith.divf %19, %20 : vector<2x96xf32>
    %22 = vector.extract_strided_slice %12 {offsets = [0, 96], sizes = [2, 32], strides = [1, 1]} : vector<2x128xf32> to vector<2x32xf32>
    %23 = math.tanh %22 : vector<2x32xf32>
    %24 = vector.extract_strided_slice %21 {offsets = [0, 0], sizes = [2, 32], strides = [1, 1]} : vector<2x96xf32> to vector<2x32xf32>
    %25 = vector.extract_strided_slice %21 {offsets = [0, 32], sizes = [2, 32], strides = [1, 1]} : vector<2x96xf32> to vector<2x32xf32>
    %26 = vector.extract_strided_slice %21 {offsets = [0, 64], sizes = [2, 32], strides = [1, 1]} : vector<2x96xf32> to vector<2x32xf32>
    %27 = arith.mulf %25, %0 : vector<2x32xf32>
    %28 = arith.mulf %24, %23 : vector<2x32xf32>
    %29 = arith.addf %27, %28 : vector<2x32xf32>
    %30 = math.tanh %29 : vector<2x32xf32>
    %31 = arith.mulf %26, %30 : vector<2x32xf32>
    %32 = vector.extract_strided_slice %15 {offsets = [0, 0], sizes = [2, 96], strides = [1, 1]} : vector<2x128xf32> to vector<2x96xf32>
    %33 = arith.negf %32 : vector<2x96xf32>
    %34 = math.exp %33 : vector<2x96xf32>
    %cst_17 = arith.constant 1.000000e+00 : f32
    %35 = vector.broadcast %cst_17 : f32 to vector<2x96xf32>
    %36 = arith.addf %35, %34 : vector<2x96xf32>
    %37 = arith.divf %35, %36 : vector<2x96xf32>
    %38 = vector.extract_strided_slice %15 {offsets = [0, 96], sizes = [2, 32], strides = [1, 1]} : vector<2x128xf32> to vector<2x32xf32>
    %39 = math.tanh %38 : vector<2x32xf32>
    %40 = vector.extract_strided_slice %37 {offsets = [0, 0], sizes = [2, 32], strides = [1, 1]} : vector<2x96xf32> to vector<2x32xf32>
    %41 = vector.extract_strided_slice %37 {offsets = [0, 32], sizes = [2, 32], strides = [1, 1]} : vector<2x96xf32> to vector<2x32xf32>
    %42 = vector.extract_strided_slice %37 {offsets = [0, 64], sizes = [2, 32], strides = [1, 1]} : vector<2x96xf32> to vector<2x32xf32>
    %43 = arith.mulf %41, %0 : vector<2x32xf32>
    %44 = arith.mulf %40, %39 : vector<2x32xf32>
    %45 = arith.addf %43, %44 : vector<2x32xf32>
    %46 = math.tanh %45 : vector<2x32xf32>
    %47 = arith.mulf %42, %46 : vector<2x32xf32>
    %c0_18 = arith.constant 0 : index
    %c0_19 = arith.constant 0 : index
    %48 = vector.load %arg12[%c0_18, %c0_19] : memref<16x64xf32, #tpu.memory_space<vmem>>, vector<2x32xf32>
    tpu.vector_store %arg12[%c0_18, %c0_19], %31 {strides = array<i32>} : memref<16x64xf32, #tpu.memory_space<vmem>>, vector<2x32xf32>,
    %c14_20 = arith.constant 14 : index
    %c32 = arith.constant 32 : index
    %49 = vector.load %arg12[%c14_20, %c32] : memref<16x64xf32, #tpu.memory_space<vmem>>, vector<2x32xf32>
    tpu.vector_store %arg12[%c14_20, %c32], %47 {strides = array<i32>} : memref<16x64xf32, #tpu.memory_space<vmem>>, vector<2x32xf32>,
    %c2 = arith.constant 2 : index
    %c0_21 = arith.constant 0 : index
    %50 = vector.load %arg13[%c2, %c0_21] : memref<16x256xf32, #tpu.memory_space<vmem>>, vector<2x128xf32>
    %cst_22 = arith.constant dense<0.000000e+00> : vector<2x128xf32>
    %51 = tpu.matmul %31, %8, %cst_22 {dimension_numbers = #tpu.dot_dimension_numbers<[1], [0], [0], [1], [0, 0, 1, 1], [], []>} : vector<2x32xf32>, vector<32x128xf32>, vector<2x128xf32> -> vector<2x128xf32>
    %52 = arith.addf %50, %51 : vector<2x128xf32>
    %c12 = arith.constant 12 : index
    %c128_23 = arith.constant 128 : index
    %53 = vector.load %arg13[%c12, %c128_23] : memref<16x256xf32, #tpu.memory_space<vmem>>, vector<2x128xf32>
    %cst_24 = arith.constant dense<0.000000e+00> : vector<2x128xf32>
    %54 = tpu.matmul %47, %9, %cst_24 {dimension_numbers = #tpu.dot_dimension_numbers<[1], [0], [0], [1], [0, 0, 1, 1], [], []>} : vector<2x32xf32>, vector<32x128xf32>, vector<2x128xf32> -> vector<2x128xf32>
    %55 = arith.addf %53, %54 : vector<2x128xf32>
    %56 = vector.extract_strided_slice %52 {offsets = [0, 0], sizes = [2, 96], strides = [1, 1]} : vector<2x128xf32> to vector<2x96xf32>
    %57 = arith.negf %56 : vector<2x96xf32>
    %58 = math.exp %57 : vector<2x96xf32>
    %cst_25 = arith.constant 1.000000e+00 : f32
    %59 = vector.broadcast %cst_25 : f32 to vector<2x96xf32>
    %60 = arith.addf %59, %58 : vector<2x96xf32>
    %61 = arith.divf %59, %60 : vector<2x96xf32>
    %62 = vector.extract_strided_slice %52 {offsets = [0, 96], sizes = [2, 32], strides = [1, 1]} : vector<2x128xf32> to vector<2x32xf32>
    %63 = math.tanh %62 : vector<2x32xf32>
    %64 = vector.extract_strided_slice %61 {offsets = [0, 0], sizes = [2, 32], strides = [1, 1]} : vector<2x96xf32> to vector<2x32xf32>
    %65 = vector.extract_strided_slice %61 {offsets = [0, 32], sizes = [2, 32], strides = [1, 1]} : vector<2x96xf32> to vector<2x32xf32>
    %66 = vector.extract_strided_slice %61 {offsets = [0, 64], sizes = [2, 32], strides = [1, 1]} : vector<2x96xf32> to vector<2x32xf32>
    %67 = arith.mulf %65, %29 : vector<2x32xf32>
    %68 = arith.mulf %64, %63 : vector<2x32xf32>
    %69 = arith.addf %67, %68 : vector<2x32xf32>
    %70 = math.tanh %69 : vector<2x32xf32>
    %71 = arith.mulf %66, %70 : vector<2x32xf32>
    %72 = vector.extract_strided_slice %55 {offsets = [0, 0], sizes = [2, 96], strides = [1, 1]} : vector<2x128xf32> to vector<2x96xf32>
    %73 = arith.negf %72 : vector<2x96xf32>
    %74 = math.exp %73 : vector<2x96xf32>
    %cst_26 = arith.constant 1.000000e+00 : f32
    %75 = vector.broadcast %cst_26 : f32 to vector<2x96xf32>
    %76 = arith.addf %75, %74 : vector<2x96xf32>
    %77 = arith.divf %75, %76 : vector<2x96xf32>
    %78 = vector.extract_strided_slice %55 {offsets = [0, 96], sizes = [2, 32], strides = [1, 1]} : vector<2x128xf32> to vector<2x32xf32>
    %79 = math.tanh %78 : vector<2x32xf32>
    %80 = vector.extract_strided_slice %77 {offsets = [0, 0], sizes = [2, 32], strides = [1, 1]} : vector<2x96xf32> to vector<2x32xf32>
    %81 = vector.extract_strided_slice %77 {offsets = [0, 32], sizes = [2, 32], strides = [1, 1]} : vector<2x96xf32> to vector<2x32xf32>
    %82 = vector.extract_strided_slice %77 {offsets = [0, 64], sizes = [2, 32], strides = [1, 1]} : vector<2x96xf32> to vector<2x32xf32>
    %83 = arith.mulf %81, %45 : vector<2x32xf32>
    %84 = arith.mulf %80, %79 : vector<2x32xf32>
    %85 = arith.addf %83, %84 : vector<2x32xf32>
    %86 = math.tanh %85 : vector<2x32xf32>
    %87 = arith.mulf %82, %86 : vector<2x32xf32>
    %c2_27 = arith.constant 2 : index
    %c0_28 = arith.constant 0 : index
    %88 = vector.load %arg12[%c2_27, %c0_28] : memref<16x64xf32, #tpu.memory_space<vmem>>, vector<2x32xf32>
    tpu.vector_store %arg12[%c2_27, %c0_28], %71 {strides = array<i32>} : memref<16x64xf32, #tpu.memory_space<vmem>>, vector<2x32xf32>,
    %c12_29 = arith.constant 12 : index
    %c32_30 = arith.constant 32 : index
    %89 = vector.load %arg12[%c12_29, %c32_30] : memref<16x64xf32, #tpu.memory_space<vmem>>, vector<2x32xf32>
    tpu.vector_store %arg12[%c12_29, %c32_30], %87 {strides = array<i32>} : memref<16x64xf32, #tpu.memory_space<vmem>>, vector<2x32xf32>,
    %c4 = arith.constant 4 : index
    %c0_31 = arith.constant 0 : index
    %90 = vector.load %arg13[%c4, %c0_31] : memref<16x256xf32, #tpu.memory_space<vmem>>, vector<2x128xf32>
    %cst_32 = arith.constant dense<0.000000e+00> : vector<2x128xf32>
    %91 = tpu.matmul %71, %8, %cst_32 {dimension_numbers = #tpu.dot_dimension_numbers<[1], [0], [0], [1], [0, 0, 1, 1], [], []>} : vector<2x32xf32>, vector<32x128xf32>, vector<2x128xf32> -> vector<2x128xf32>
    %92 = arith.addf %90, %91 : vector<2x128xf32>
    %c10 = arith.constant 10 : index
    %c128_33 = arith.constant 128 : index
    %93 = vector.load %arg13[%c10, %c128_33] : memref<16x256xf32, #tpu.memory_space<vmem>>, vector<2x128xf32>
    %cst_34 = arith.constant dense<0.000000e+00> : vector<2x128xf32>
    %94 = tpu.matmul %87, %9, %cst_34 {dimension_numbers = #tpu.dot_dimension_numbers<[1], [0], [0], [1], [0, 0, 1, 1], [], []>} : vector<2x32xf32>, vector<32x128xf32>, vector<2x128xf32> -> vector<2x128xf32>
    %95 = arith.addf %93, %94 : vector<2x128xf32>
    %96 = vector.extract_strided_slice %92 {offsets = [0, 0], sizes = [2, 96], strides = [1, 1]} : vector<2x128xf32> to vector<2x96xf32>
    %97 = arith.negf %96 : vector<2x96xf32>
    %98 = math.exp %97 : vector<2x96xf32>
    %cst_35 = arith.constant 1.000000e+00 : f32
    %99 = vector.broadcast %cst_35 : f32 to vector<2x96xf32>
    %100 = arith.addf %99, %98 : vector<2x96xf32>
    %101 = arith.divf %99, %100 : vector<2x96xf32>
    %102 = vector.extract_strided_slice %92 {offsets = [0, 96], sizes = [2, 32], strides = [1, 1]} : vector<2x128xf32> to vector<2x32xf32>
    %103 = math.tanh %102 : vector<2x32xf32>
    %104 = vector.extract_strided_slice %101 {offsets = [0, 0], sizes = [2, 32], strides = [1, 1]} : vector<2x96xf32> to vector<2x32xf32>
    %105 = vector.extract_strided_slice %101 {offsets = [0, 32], sizes = [2, 32], strides = [1, 1]} : vector<2x96xf32> to vector<2x32xf32>
    %106 = vector.extract_strided_slice %101 {offsets = [0, 64], sizes = [2, 32], strides = [1, 1]} : vector<2x96xf32> to vector<2x32xf32>
    %107 = arith.mulf %105, %69 : vector<2x32xf32>
    %108 = arith.mulf %104, %103 : vector<2x32xf32>
    %109 = arith.addf %107, %108 : vector<2x32xf32>
    %110 = math.tanh %109 : vector<2x32xf32>
    %111 = arith.mulf %106, %110 : vector<2x32xf32>
    %112 = vector.extract_strided_slice %95 {offsets = [0, 0], sizes = [2, 96], strides = [1, 1]} : vector<2x128xf32> to vector<2x96xf32>
    %113 = arith.negf %112 : vector<2x96xf32>
    %114 = math.exp %113 : vector<2x96xf32>
    %cst_36 = arith.constant 1.000000e+00 : f32
    %115 = vector.broadcast %cst_36 : f32 to vector<2x96xf32>
    %116 = arith.addf %115, %114 : vector<2x96xf32>
    %117 = arith.divf %115, %116 : vector<2x96xf32>
    %118 = vector.extract_strided_slice %95 {offsets = [0, 96], sizes = [2, 32], strides = [1, 1]} : vector<2x128xf32> to vector<2x32xf32>
    %119 = math.tanh %118 : vector<2x32xf32>
    %120 = vector.extract_strided_slice %117 {offsets = [0, 0], sizes = [2, 32], strides = [1, 1]} : vector<2x96xf32> to vector<2x32xf32>
    %121 = vector.extract_strided_slice %117 {offsets = [0, 32], sizes = [2, 32], strides = [1, 1]} : vector<2x96xf32> to vector<2x32xf32>
    %122 = vector.extract_strided_slice %117 {offsets = [0, 64], sizes = [2, 32], strides = [1, 1]} : vector<2x96xf32> to vector<2x32xf32>
    %123 = arith.mulf %121, %85 : vector<2x32xf32>
    %124 = arith.mulf %120, %119 : vector<2x32xf32>
    %125 = arith.addf %123, %124 : vector<2x32xf32>
    %126 = math.tanh %125 : vector<2x32xf32>
    %127 = arith.mulf %122, %126 : vector<2x32xf32>
    %c4_37 = arith.constant 4 : index
    %c0_38 = arith.constant 0 : index
    %128 = vector.load %arg12[%c4_37, %c0_38] : memref<16x64xf32, #tpu.memory_space<vmem>>, vector<2x32xf32>
    tpu.vector_store %arg12[%c4_37, %c0_38], %111 {strides = array<i32>} : memref<16x64xf32, #tpu.memory_space<vmem>>, vector<2x32xf32>,
    %c10_39 = arith.constant 10 : index
    %c32_40 = arith.constant 32 : index
    %129 = vector.load %arg12[%c10_39, %c32_40] : memref<16x64xf32, #tpu.memory_space<vmem>>, vector<2x32xf32>
    tpu.vector_store %arg12[%c10_39, %c32_40], %127 {strides = array<i32>} : memref<16x64xf32, #tpu.memory_space<vmem>>, vector<2x32xf32>,
    %c6 = arith.constant 6 : index
    %c0_41 = arith.constant 0 : index
    %130 = vector.load %arg13[%c6, %c0_41] : memref<16x256xf32, #tpu.memory_space<vmem>>, vector<2x128xf32>
    %cst_42 = arith.constant dense<0.000000e+00> : vector<2x128xf32>
    %131 = tpu.matmul %111, %8, %cst_42 {dimension_numbers = #tpu.dot_dimension_numbers<[1], [0], [0], [1], [0, 0, 1, 1], [], []>} : vector<2x32xf32>, vector<32x128xf32>, vector<2x128xf32> -> vector<2x128xf32>
    %132 = arith.addf %130, %131 : vector<2x128xf32>
    %c8 = arith.constant 8 : index
    %c128_43 = arith.constant 128 : index
    %133 = vector.load %arg13[%c8, %c128_43] : memref<16x256xf32, #tpu.memory_space<vmem>>, vector<2x128xf32>
    %cst_44 = arith.constant dense<0.000000e+00> : vector<2x128xf32>
    %134 = tpu.matmul %127, %9, %cst_44 {dimension_numbers = #tpu.dot_dimension_numbers<[1], [0], [0], [1], [0, 0, 1, 1], [], []>} : vector<2x32xf32>, vector<32x128xf32>, vector<2x128xf32> -> vector<2x128xf32>
    %135 = arith.addf %133, %134 : vector<2x128xf32>
    %136 = vector.extract_strided_slice %132 {offsets = [0, 0], sizes = [2, 96], strides = [1, 1]} : vector<2x128xf32> to vector<2x96xf32>
    %137 = arith.negf %136 : vector<2x96xf32>
    %138 = math.exp %137 : vector<2x96xf32>
    %cst_45 = arith.constant 1.000000e+00 : f32
    %139 = vector.broadcast %cst_45 : f32 to vector<2x96xf32>
    %140 = arith.addf %139, %138 : vector<2x96xf32>
    %141 = arith.divf %139, %140 : vector<2x96xf32>
    %142 = vector.extract_strided_slice %132 {offsets = [0, 96], sizes = [2, 32], strides = [1, 1]} : vector<2x128xf32> to vector<2x32xf32>
    %143 = math.tanh %142 : vector<2x32xf32>
    %144 = vector.extract_strided_slice %141 {offsets = [0, 0], sizes = [2, 32], strides = [1, 1]} : vector<2x96xf32> to vector<2x32xf32>
    %145 = vector.extract_strided_slice %141 {offsets = [0, 32], sizes = [2, 32], strides = [1, 1]} : vector<2x96xf32> to vector<2x32xf32>
    %146 = vector.extract_strided_slice %141 {offsets = [0, 64], sizes = [2, 32], strides = [1, 1]} : vector<2x96xf32> to vector<2x32xf32>
    %147 = arith.mulf %145, %109 : vector<2x32xf32>
    %148 = arith.mulf %144, %143 : vector<2x32xf32>
    %149 = arith.addf %147, %148 : vector<2x32xf32>
    %150 = math.tanh %149 : vector<2x32xf32>
    %151 = arith.mulf %146, %150 : vector<2x32xf32>
    %152 = vector.extract_strided_slice %135 {offsets = [0, 0], sizes = [2, 96], strides = [1, 1]} : vector<2x128xf32> to vector<2x96xf32>
    %153 = arith.negf %152 : vector<2x96xf32>
    %154 = math.exp %153 : vector<2x96xf32>
    %cst_46 = arith.constant 1.000000e+00 : f32
    %155 = vector.broadcast %cst_46 : f32 to vector<2x96xf32>
    %156 = arith.addf %155, %154 : vector<2x96xf32>
    %157 = arith.divf %155, %156 : vector<2x96xf32>
    %158 = vector.extract_strided_slice %135 {offsets = [0, 96], sizes = [2, 32], strides = [1, 1]} : vector<2x128xf32> to vector<2x32xf32>
    %159 = math.tanh %158 : vector<2x32xf32>
    %160 = vector.extract_strided_slice %157 {offsets = [0, 0], sizes = [2, 32], strides = [1, 1]} : vector<2x96xf32> to vector<2x32xf32>
    %161 = vector.extract_strided_slice %157 {offsets = [0, 32], sizes = [2, 32], strides = [1, 1]} : vector<2x96xf32> to vector<2x32xf32>
    %162 = vector.extract_strided_slice %157 {offsets = [0, 64], sizes = [2, 32], strides = [1, 1]} : vector<2x96xf32> to vector<2x32xf32>
    %163 = arith.mulf %161, %125 : vector<2x32xf32>
    %164 = arith.mulf %160, %159 : vector<2x32xf32>
    %165 = arith.addf %163, %164 : vector<2x32xf32>
    %166 = math.tanh %165 : vector<2x32xf32>
    %167 = arith.mulf %162, %166 : vector<2x32xf32>
    %c6_47 = arith.constant 6 : index
    %c0_48 = arith.constant 0 : index
    %168 = vector.load %arg12[%c6_47, %c0_48] : memref<16x64xf32, #tpu.memory_space<vmem>>, vector<2x32xf32>
    tpu.vector_store %arg12[%c6_47, %c0_48], %151 {strides = array<i32>} : memref<16x64xf32, #tpu.memory_space<vmem>>, vector<2x32xf32>,
    %c8_49 = arith.constant 8 : index
    %c32_50 = arith.constant 32 : index
    %169 = vector.load %arg12[%c8_49, %c32_50] : memref<16x64xf32, #tpu.memory_space<vmem>>, vector<2x32xf32>
    tpu.vector_store %arg12[%c8_49, %c32_50], %167 {strides = array<i32>} : memref<16x64xf32, #tpu.memory_space<vmem>>, vector<2x32xf32>,
    %c8_51 = arith.constant 8 : index
    %c0_52 = arith.constant 0 : index
    %170 = vector.load %arg13[%c8_51, %c0_52] : memref<16x256xf32, #tpu.memory_space<vmem>>, vector<2x128xf32>
    %cst_53 = arith.constant dense<0.000000e+00> : vector<2x128xf32>
    %171 = tpu.matmul %151, %8, %cst_53 {dimension_numbers = #tpu.dot_dimension_numbers<[1], [0], [0], [1], [0, 0, 1, 1], [], []>} : vector<2x32xf32>, vector<32x128xf32>, vector<2x128xf32> -> vector<2x128xf32>
    %172 = arith.addf %170, %171 : vector<2x128xf32>
    %c6_54 = arith.constant 6 : index
    %c128_55 = arith.constant 128 : index
    %173 = vector.load %arg13[%c6_54, %c128_55] : memref<16x256xf32, #tpu.memory_space<vmem>>, vector<2x128xf32>
    %cst_56 = arith.constant dense<0.000000e+00> : vector<2x128xf32>
    %174 = tpu.matmul %167, %9, %cst_56 {dimension_numbers = #tpu.dot_dimension_numbers<[1], [0], [0], [1], [0, 0, 1, 1], [], []>} : vector<2x32xf32>, vector<32x128xf32>, vector<2x128xf32> -> vector<2x128xf32>
    %175 = arith.addf %173, %174 : vector<2x128xf32>
    %176 = vector.extract_strided_slice %172 {offsets = [0, 0], sizes = [2, 96], strides = [1, 1]} : vector<2x128xf32> to vector<2x96xf32>
    %177 = arith.negf %176 : vector<2x96xf32>
    %178 = math.exp %177 : vector<2x96xf32>
    %cst_57 = arith.constant 1.000000e+00 : f32
    %179 = vector.broadcast %cst_57 : f32 to vector<2x96xf32>
    %180 = arith.addf %179, %178 : vector<2x96xf32>
    %181 = arith.divf %179, %180 : vector<2x96xf32>
    %182 = vector.extract_strided_slice %172 {offsets = [0, 96], sizes = [2, 32], strides = [1, 1]} : vector<2x128xf32> to vector<2x32xf32>
    %183 = math.tanh %182 : vector<2x32xf32>
    %184 = vector.extract_strided_slice %181 {offsets = [0, 0], sizes = [2, 32], strides = [1, 1]} : vector<2x96xf32> to vector<2x32xf32>
    %185 = vector.extract_strided_slice %181 {offsets = [0, 32], sizes = [2, 32], strides = [1, 1]} : vector<2x96xf32> to vector<2x32xf32>
    %186 = vector.extract_strided_slice %181 {offsets = [0, 64], sizes = [2, 32], strides = [1, 1]} : vector<2x96xf32> to vector<2x32xf32>
    %187 = arith.mulf %185, %149 : vector<2x32xf32>
    %188 = arith.mulf %184, %183 : vector<2x32xf32>
    %189 = arith.addf %187, %188 : vector<2x32xf32>
    %190 = math.tanh %189 : vector<2x32xf32>
    %191 = arith.mulf %186, %190 : vector<2x32xf32>
    %192 = vector.extract_strided_slice %175 {offsets = [0, 0], sizes = [2, 96], strides = [1, 1]} : vector<2x128xf32> to vector<2x96xf32>
    %193 = arith.negf %192 : vector<2x96xf32>
    %194 = math.exp %193 : vector<2x96xf32>
    %cst_58 = arith.constant 1.000000e+00 : f32
    %195 = vector.broadcast %cst_58 : f32 to vector<2x96xf32>
    %196 = arith.addf %195, %194 : vector<2x96xf32>
    %197 = arith.divf %195, %196 : vector<2x96xf32>
    %198 = vector.extract_strided_slice %175 {offsets = [0, 96], sizes = [2, 32], strides = [1, 1]} : vector<2x128xf32> to vector<2x32xf32>
    %199 = math.tanh %198 : vector<2x32xf32>
    %200 = vector.extract_strided_slice %197 {offsets = [0, 0], sizes = [2, 32], strides = [1, 1]} : vector<2x96xf32> to vector<2x32xf32>
    %201 = vector.extract_strided_slice %197 {offsets = [0, 32], sizes = [2, 32], strides = [1, 1]} : vector<2x96xf32> to vector<2x32xf32>
    %202 = vector.extract_strided_slice %197 {offsets = [0, 64], sizes = [2, 32], strides = [1, 1]} : vector<2x96xf32> to vector<2x32xf32>
    %203 = arith.mulf %201, %165 : vector<2x32xf32>
    %204 = arith.mulf %200, %199 : vector<2x32xf32>
    %205 = arith.addf %203, %204 : vector<2x32xf32>
    %206 = math.tanh %205 : vector<2x32xf32>
    %207 = arith.mulf %202, %206 : vector<2x32xf32>
    %c8_59 = arith.constant 8 : index
    %c0_60 = arith.constant 0 : index
    %208 = vector.load %arg12[%c8_59, %c0_60] : memref<16x64xf32, #tpu.memory_space<vmem>>, vector<2x32xf32>
    tpu.vector_store %arg12[%c8_59, %c0_60], %191 {strides = array<i32>} : memref<16x64xf32, #tpu.memory_space<vmem>>, vector<2x32xf32>,
    %c6_61 = arith.constant 6 : index
    %c32_62 = arith.constant 32 : index
    %209 = vector.load %arg12[%c6_61, %c32_62] : memref<16x64xf32, #tpu.memory_space<vmem>>, vector<2x32xf32>
    tpu.vector_store %arg12[%c6_61, %c32_62], %207 {strides = array<i32>} : memref<16x64xf32, #tpu.memory_space<vmem>>, vector<2x32xf32>,
    %c10_63 = arith.constant 10 : index
    %c0_64 = arith.constant 0 : index
    %210 = vector.load %arg13[%c10_63, %c0_64] : memref<16x256xf32, #tpu.memory_space<vmem>>, vector<2x128xf32>
    %cst_65 = arith.constant dense<0.000000e+00> : vector<2x128xf32>
    %211 = tpu.matmul %191, %8, %cst_65 {dimension_numbers = #tpu.dot_dimension_numbers<[1], [0], [0], [1], [0, 0, 1, 1], [], []>} : vector<2x32xf32>, vector<32x128xf32>, vector<2x128xf32> -> vector<2x128xf32>
    %212 = arith.addf %210, %211 : vector<2x128xf32>
    %c4_66 = arith.constant 4 : index
    %c128_67 = arith.constant 128 : index
    %213 = vector.load %arg13[%c4_66, %c128_67] : memref<16x256xf32, #tpu.memory_space<vmem>>, vector<2x128xf32>
    %cst_68 = arith.constant dense<0.000000e+00> : vector<2x128xf32>
    %214 = tpu.matmul %207, %9, %cst_68 {dimension_numbers = #tpu.dot_dimension_numbers<[1], [0], [0], [1], [0, 0, 1, 1], [], []>} : vector<2x32xf32>, vector<32x128xf32>, vector<2x128xf32> -> vector<2x128xf32>
    %215 = arith.addf %213, %214 : vector<2x128xf32>
    %216 = vector.extract_strided_slice %212 {offsets = [0, 0], sizes = [2, 96], strides = [1, 1]} : vector<2x128xf32> to vector<2x96xf32>
    %217 = arith.negf %216 : vector<2x96xf32>
    %218 = math.exp %217 : vector<2x96xf32>
    %cst_69 = arith.constant 1.000000e+00 : f32
    %219 = vector.broadcast %cst_69 : f32 to vector<2x96xf32>
    %220 = arith.addf %219, %218 : vector<2x96xf32>
    %221 = arith.divf %219, %220 : vector<2x96xf32>
    %222 = vector.extract_strided_slice %212 {offsets = [0, 96], sizes = [2, 32], strides = [1, 1]} : vector<2x128xf32> to vector<2x32xf32>
    %223 = math.tanh %222 : vector<2x32xf32>
    %224 = vector.extract_strided_slice %221 {offsets = [0, 0], sizes = [2, 32], strides = [1, 1]} : vector<2x96xf32> to vector<2x32xf32>
    %225 = vector.extract_strided_slice %221 {offsets = [0, 32], sizes = [2, 32], strides = [1, 1]} : vector<2x96xf32> to vector<2x32xf32>
    %226 = vector.extract_strided_slice %221 {offsets = [0, 64], sizes = [2, 32], strides = [1, 1]} : vector<2x96xf32> to vector<2x32xf32>
    %227 = arith.mulf %225, %189 : vector<2x32xf32>
    %228 = arith.mulf %224, %223 : vector<2x32xf32>
    %229 = arith.addf %227, %228 : vector<2x32xf32>
    %230 = math.tanh %229 : vector<2x32xf32>
    %231 = arith.mulf %226, %230 : vector<2x32xf32>
    %232 = vector.extract_strided_slice %215 {offsets = [0, 0], sizes = [2, 96], strides = [1, 1]} : vector<2x128xf32> to vector<2x96xf32>
    %233 = arith.negf %232 : vector<2x96xf32>
    %234 = math.exp %233 : vector<2x96xf32>
    %cst_70 = arith.constant 1.000000e+00 : f32
    %235 = vector.broadcast %cst_70 : f32 to vector<2x96xf32>
    %236 = arith.addf %235, %234 : vector<2x96xf32>
    %237 = arith.divf %235, %236 : vector<2x96xf32>
    %238 = vector.extract_strided_slice %215 {offsets = [0, 96], sizes = [2, 32], strides = [1, 1]} : vector<2x128xf32> to vector<2x32xf32>
    %239 = math.tanh %238 : vector<2x32xf32>
    %240 = vector.extract_strided_slice %237 {offsets = [0, 0], sizes = [2, 32], strides = [1, 1]} : vector<2x96xf32> to vector<2x32xf32>
    %241 = vector.extract_strided_slice %237 {offsets = [0, 32], sizes = [2, 32], strides = [1, 1]} : vector<2x96xf32> to vector<2x32xf32>
    %242 = vector.extract_strided_slice %237 {offsets = [0, 64], sizes = [2, 32], strides = [1, 1]} : vector<2x96xf32> to vector<2x32xf32>
    %243 = arith.mulf %241, %205 : vector<2x32xf32>
    %244 = arith.mulf %240, %239 : vector<2x32xf32>
    %245 = arith.addf %243, %244 : vector<2x32xf32>
    %246 = math.tanh %245 : vector<2x32xf32>
    %247 = arith.mulf %242, %246 : vector<2x32xf32>
    %c10_71 = arith.constant 10 : index
    %c0_72 = arith.constant 0 : index
    %248 = vector.load %arg12[%c10_71, %c0_72] : memref<16x64xf32, #tpu.memory_space<vmem>>, vector<2x32xf32>
    tpu.vector_store %arg12[%c10_71, %c0_72], %231 {strides = array<i32>} : memref<16x64xf32, #tpu.memory_space<vmem>>, vector<2x32xf32>,
    %c4_73 = arith.constant 4 : index
    %c32_74 = arith.constant 32 : index
    %249 = vector.load %arg12[%c4_73, %c32_74] : memref<16x64xf32, #tpu.memory_space<vmem>>, vector<2x32xf32>
    tpu.vector_store %arg12[%c4_73, %c32_74], %247 {strides = array<i32>} : memref<16x64xf32, #tpu.memory_space<vmem>>, vector<2x32xf32>,
    %c12_75 = arith.constant 12 : index
    %c0_76 = arith.constant 0 : index
    %250 = vector.load %arg13[%c12_75, %c0_76] : memref<16x256xf32, #tpu.memory_space<vmem>>, vector<2x128xf32>
    %cst_77 = arith.constant dense<0.000000e+00> : vector<2x128xf32>
    %251 = tpu.matmul %231, %8, %cst_77 {dimension_numbers = #tpu.dot_dimension_numbers<[1], [0], [0], [1], [0, 0, 1, 1], [], []>} : vector<2x32xf32>, vector<32x128xf32>, vector<2x128xf32> -> vector<2x128xf32>
    %252 = arith.addf %250, %251 : vector<2x128xf32>
    %c2_78 = arith.constant 2 : index
    %c128_79 = arith.constant 128 : index
    %253 = vector.load %arg13[%c2_78, %c128_79] : memref<16x256xf32, #tpu.memory_space<vmem>>, vector<2x128xf32>
    %cst_80 = arith.constant dense<0.000000e+00> : vector<2x128xf32>
    %254 = tpu.matmul %247, %9, %cst_80 {dimension_numbers = #tpu.dot_dimension_numbers<[1], [0], [0], [1], [0, 0, 1, 1], [], []>} : vector<2x32xf32>, vector<32x128xf32>, vector<2x128xf32> -> vector<2x128xf32>
    %255 = arith.addf %253, %254 : vector<2x128xf32>
    %256 = vector.extract_strided_slice %252 {offsets = [0, 0], sizes = [2, 96], strides = [1, 1]} : vector<2x128xf32> to vector<2x96xf32>
    %257 = arith.negf %256 : vector<2x96xf32>
    %258 = math.exp %257 : vector<2x96xf32>
    %cst_81 = arith.constant 1.000000e+00 : f32
    %259 = vector.broadcast %cst_81 : f32 to vector<2x96xf32>
    %260 = arith.addf %259, %258 : vector<2x96xf32>
    %261 = arith.divf %259, %260 : vector<2x96xf32>
    %262 = vector.extract_strided_slice %252 {offsets = [0, 96], sizes = [2, 32], strides = [1, 1]} : vector<2x128xf32> to vector<2x32xf32>
    %263 = math.tanh %262 : vector<2x32xf32>
    %264 = vector.extract_strided_slice %261 {offsets = [0, 0], sizes = [2, 32], strides = [1, 1]} : vector<2x96xf32> to vector<2x32xf32>
    %265 = vector.extract_strided_slice %261 {offsets = [0, 32], sizes = [2, 32], strides = [1, 1]} : vector<2x96xf32> to vector<2x32xf32>
    %266 = vector.extract_strided_slice %261 {offsets = [0, 64], sizes = [2, 32], strides = [1, 1]} : vector<2x96xf32> to vector<2x32xf32>
    %267 = arith.mulf %265, %229 : vector<2x32xf32>
    %268 = arith.mulf %264, %263 : vector<2x32xf32>
    %269 = arith.addf %267, %268 : vector<2x32xf32>
    %270 = math.tanh %269 : vector<2x32xf32>
    %271 = arith.mulf %266, %270 : vector<2x32xf32>
    %272 = vector.extract_strided_slice %255 {offsets = [0, 0], sizes = [2, 96], strides = [1, 1]} : vector<2x128xf32> to vector<2x96xf32>
    %273 = arith.negf %272 : vector<2x96xf32>
    %274 = math.exp %273 : vector<2x96xf32>
    %cst_82 = arith.constant 1.000000e+00 : f32
    %275 = vector.broadcast %cst_82 : f32 to vector<2x96xf32>
    %276 = arith.addf %275, %274 : vector<2x96xf32>
    %277 = arith.divf %275, %276 : vector<2x96xf32>
    %278 = vector.extract_strided_slice %255 {offsets = [0, 96], sizes = [2, 32], strides = [1, 1]} : vector<2x128xf32> to vector<2x32xf32>
    %279 = math.tanh %278 : vector<2x32xf32>
    %280 = vector.extract_strided_slice %277 {offsets = [0, 0], sizes = [2, 32], strides = [1, 1]} : vector<2x96xf32> to vector<2x32xf32>
    %281 = vector.extract_strided_slice %277 {offsets = [0, 32], sizes = [2, 32], strides = [1, 1]} : vector<2x96xf32> to vector<2x32xf32>
    %282 = vector.extract_strided_slice %277 {offsets = [0, 64], sizes = [2, 32], strides = [1, 1]} : vector<2x96xf32> to vector<2x32xf32>
    %283 = arith.mulf %281, %245 : vector<2x32xf32>
    %284 = arith.mulf %280, %279 : vector<2x32xf32>
    %285 = arith.addf %283, %284 : vector<2x32xf32>
    %286 = math.tanh %285 : vector<2x32xf32>
    %287 = arith.mulf %282, %286 : vector<2x32xf32>
    %c12_83 = arith.constant 12 : index
    %c0_84 = arith.constant 0 : index
    %288 = vector.load %arg12[%c12_83, %c0_84] : memref<16x64xf32, #tpu.memory_space<vmem>>, vector<2x32xf32>
    tpu.vector_store %arg12[%c12_83, %c0_84], %271 {strides = array<i32>} : memref<16x64xf32, #tpu.memory_space<vmem>>, vector<2x32xf32>,
    %c2_85 = arith.constant 2 : index
    %c32_86 = arith.constant 32 : index
    %289 = vector.load %arg12[%c2_85, %c32_86] : memref<16x64xf32, #tpu.memory_space<vmem>>, vector<2x32xf32>
    tpu.vector_store %arg12[%c2_85, %c32_86], %287 {strides = array<i32>} : memref<16x64xf32, #tpu.memory_space<vmem>>, vector<2x32xf32>,
    %c14_87 = arith.constant 14 : index
    %c0_88 = arith.constant 0 : index
    %290 = vector.load %arg13[%c14_87, %c0_88] : memref<16x256xf32, #tpu.memory_space<vmem>>, vector<2x128xf32>
    %cst_89 = arith.constant dense<0.000000e+00> : vector<2x128xf32>
    %291 = tpu.matmul %271, %8, %cst_89 {dimension_numbers = #tpu.dot_dimension_numbers<[1], [0], [0], [1], [0, 0, 1, 1], [], []>} : vector<2x32xf32>, vector<32x128xf32>, vector<2x128xf32> -> vector<2x128xf32>
    %292 = arith.addf %290, %291 : vector<2x128xf32>
    %c0_90 = arith.constant 0 : index
    %c128_91 = arith.constant 128 : index
    %293 = vector.load %arg13[%c0_90, %c128_91] : memref<16x256xf32, #tpu.memory_space<vmem>>, vector<2x128xf32>
    %cst_92 = arith.constant dense<0.000000e+00> : vector<2x128xf32>
    %294 = tpu.matmul %287, %9, %cst_92 {dimension_numbers = #tpu.dot_dimension_numbers<[1], [0], [0], [1], [0, 0, 1, 1], [], []>} : vector<2x32xf32>, vector<32x128xf32>, vector<2x128xf32> -> vector<2x128xf32>
    %295 = arith.addf %293, %294 : vector<2x128xf32>
    %296 = vector.extract_strided_slice %292 {offsets = [0, 0], sizes = [2, 96], strides = [1, 1]} : vector<2x128xf32> to vector<2x96xf32>
    %297 = arith.negf %296 : vector<2x96xf32>
    %298 = math.exp %297 : vector<2x96xf32>
    %cst_93 = arith.constant 1.000000e+00 : f32
    %299 = vector.broadcast %cst_93 : f32 to vector<2x96xf32>
    %300 = arith.addf %299, %298 : vector<2x96xf32>
    %301 = arith.divf %299, %300 : vector<2x96xf32>
    %302 = vector.extract_strided_slice %292 {offsets = [0, 96], sizes = [2, 32], strides = [1, 1]} : vector<2x128xf32> to vector<2x32xf32>
    %303 = math.tanh %302 : vector<2x32xf32>
    %304 = vector.extract_strided_slice %301 {offsets = [0, 0], sizes = [2, 32], strides = [1, 1]} : vector<2x96xf32> to vector<2x32xf32>
    %305 = vector.extract_strided_slice %301 {offsets = [0, 32], sizes = [2, 32], strides = [1, 1]} : vector<2x96xf32> to vector<2x32xf32>
    %306 = vector.extract_strided_slice %301 {offsets = [0, 64], sizes = [2, 32], strides = [1, 1]} : vector<2x96xf32> to vector<2x32xf32>
    %307 = arith.mulf %305, %269 : vector<2x32xf32>
    %308 = arith.mulf %304, %303 : vector<2x32xf32>
    %309 = arith.addf %307, %308 : vector<2x32xf32>
    %310 = math.tanh %309 : vector<2x32xf32>
    %311 = arith.mulf %306, %310 : vector<2x32xf32>
    %312 = vector.extract_strided_slice %295 {offsets = [0, 0], sizes = [2, 96], strides = [1, 1]} : vector<2x128xf32> to vector<2x96xf32>
    %313 = arith.negf %312 : vector<2x96xf32>
    %314 = math.exp %313 : vector<2x96xf32>
    %cst_94 = arith.constant 1.000000e+00 : f32
    %315 = vector.broadcast %cst_94 : f32 to vector<2x96xf32>
    %316 = arith.addf %315, %314 : vector<2x96xf32>
    %317 = arith.divf %315, %316 : vector<2x96xf32>
    %318 = vector.extract_strided_slice %295 {offsets = [0, 96], sizes = [2, 32], strides = [1, 1]} : vector<2x128xf32> to vector<2x32xf32>
    %319 = math.tanh %318 : vector<2x32xf32>
    %320 = vector.extract_strided_slice %317 {offsets = [0, 0], sizes = [2, 32], strides = [1, 1]} : vector<2x96xf32> to vector<2x32xf32>
    %321 = vector.extract_strided_slice %317 {offsets = [0, 32], sizes = [2, 32], strides = [1, 1]} : vector<2x96xf32> to vector<2x32xf32>
    %322 = vector.extract_strided_slice %317 {offsets = [0, 64], sizes = [2, 32], strides = [1, 1]} : vector<2x96xf32> to vector<2x32xf32>
    %323 = arith.mulf %321, %285 : vector<2x32xf32>
    %324 = arith.mulf %320, %319 : vector<2x32xf32>
    %325 = arith.addf %323, %324 : vector<2x32xf32>
    %326 = math.tanh %325 : vector<2x32xf32>
    %327 = arith.mulf %322, %326 : vector<2x32xf32>
    %c14_95 = arith.constant 14 : index
    %c0_96 = arith.constant 0 : index
    %328 = vector.load %arg12[%c14_95, %c0_96] : memref<16x64xf32, #tpu.memory_space<vmem>>, vector<2x32xf32>
    tpu.vector_store %arg12[%c14_95, %c0_96], %311 {strides = array<i32>} : memref<16x64xf32, #tpu.memory_space<vmem>>, vector<2x32xf32>,
    %c0_97 = arith.constant 0 : index
    %c32_98 = arith.constant 32 : index
    %329 = vector.load %arg12[%c0_97, %c32_98] : memref<16x64xf32, #tpu.memory_space<vmem>>, vector<2x32xf32>
    tpu.vector_store %arg12[%c0_97, %c32_98], %327 {strides = array<i32>} : memref<16x64xf32, #tpu.memory_space<vmem>>, vector<2x32xf32>,
    %c0_99 = arith.constant 0 : index
    %c0_100 = arith.constant 0 : index
    %330 = vector.load %arg12[%c0_99, %c0_100] : memref<16x64xf32, #tpu.memory_space<vmem>>, vector<16x64xf32>
    %c0_101 = arith.constant 0 : index
    %c0_102 = arith.constant 0 : index
    %331 = vector.load %arg5[%c0_101, %c0_102] : memref<64x256xf32, #tpu.memory_space<vmem>>, vector<64x256xf32>
    %cst_103 = arith.constant dense<0.000000e+00> : vector<16x256xf32>
    %332 = tpu.matmul %330, %331, %cst_103 {dimension_numbers = #tpu.dot_dimension_numbers<[1], [0], [0], [1], [0, 0, 1, 1], [], []>} : vector<16x64xf32>, vector<64x256xf32>, vector<16x256xf32> -> vector<16x256xf32>
    %c0_104 = arith.constant 0 : index
    %c0_105 = arith.constant 0 : index
    %333 = vector.load %arg6[%c0_104, %c0_105] : memref<1x256xf32, #tpu.memory_space<vmem>>, vector<1x256xf32>
    %334 = vector.broadcast %333 : vector<1x256xf32> to vector<16x256xf32>
    %335 = arith.addf %332, %334 : vector<16x256xf32>
    %c0_106 = arith.constant 0 : index
    %c0_107 = arith.constant 0 : index
    %336 = vector.load %arg13[%c0_106, %c0_107] : memref<16x256xf32, #tpu.memory_space<vmem>>, vector<16x256xf32>
    tpu.vector_store %arg13[%c0_106, %c0_107], %335 {strides = array<i32>} : memref<16x256xf32, #tpu.memory_space<vmem>>, vector<16x256xf32>,
    %c0_108 = arith.constant 0 : index
    %c0_109 = arith.constant 0 : index
    %337 = vector.load %arg7[%c0_108, %c0_109] : memref<32x128xf32, #tpu.memory_space<vmem>>, vector<32x128xf32>
    %c0_110 = arith.constant 0 : index
    %c0_111 = arith.constant 0 : index
    %338 = vector.load %arg8[%c0_110, %c0_111] : memref<32x128xf32, #tpu.memory_space<vmem>>, vector<32x128xf32>
    %c0_112 = arith.constant 0 : index
    %c0_113 = arith.constant 0 : index
    %339 = vector.load %arg13[%c0_112, %c0_113] : memref<16x256xf32, #tpu.memory_space<vmem>>, vector<2x128xf32>
    %cst_114 = arith.constant dense<0.000000e+00> : vector<2x128xf32>
    %340 = tpu.matmul %0, %337, %cst_114 {dimension_numbers = #tpu.dot_dimension_numbers<[1], [0], [0], [1], [0, 0, 1, 1], [], []>} : vector<2x32xf32>, vector<32x128xf32>, vector<2x128xf32> -> vector<2x128xf32>
    %341 = arith.addf %339, %340 : vector<2x128xf32>
    %c14_115 = arith.constant 14 : index
    %c128_116 = arith.constant 128 : index
    %342 = vector.load %arg13[%c14_115, %c128_116] : memref<16x256xf32, #tpu.memory_space<vmem>>, vector<2x128xf32>
    %cst_117 = arith.constant dense<0.000000e+00> : vector<2x128xf32>
    %343 = tpu.matmul %0, %338, %cst_117 {dimension_numbers = #tpu.dot_dimension_numbers<[1], [0], [0], [1], [0, 0, 1, 1], [], []>} : vector<2x32xf32>, vector<32x128xf32>, vector<2x128xf32> -> vector<2x128xf32>
    %344 = arith.addf %342, %343 : vector<2x128xf32>
    %345 = vector.extract_strided_slice %341 {offsets = [0, 0], sizes = [2, 96], strides = [1, 1]} : vector<2x128xf32> to vector<2x96xf32>
    %346 = arith.negf %345 : vector<2x96xf32>
    %347 = math.exp %346 : vector<2x96xf32>
    %cst_118 = arith.constant 1.000000e+00 : f32
    %348 = vector.broadcast %cst_118 : f32 to vector<2x96xf32>
    %349 = arith.addf %348, %347 : vector<2x96xf32>
    %350 = arith.divf %348, %349 : vector<2x96xf32>
    %351 = vector.extract_strided_slice %341 {offsets = [0, 96], sizes = [2, 32], strides = [1, 1]} : vector<2x128xf32> to vector<2x32xf32>
    %352 = math.tanh %351 : vector<2x32xf32>
    %353 = vector.extract_strided_slice %350 {offsets = [0, 0], sizes = [2, 32], strides = [1, 1]} : vector<2x96xf32> to vector<2x32xf32>
    %354 = vector.extract_strided_slice %350 {offsets = [0, 32], sizes = [2, 32], strides = [1, 1]} : vector<2x96xf32> to vector<2x32xf32>
    %355 = vector.extract_strided_slice %350 {offsets = [0, 64], sizes = [2, 32], strides = [1, 1]} : vector<2x96xf32> to vector<2x32xf32>
    %356 = arith.mulf %354, %0 : vector<2x32xf32>
    %357 = arith.mulf %353, %352 : vector<2x32xf32>
    %358 = arith.addf %356, %357 : vector<2x32xf32>
    %359 = math.tanh %358 : vector<2x32xf32>
    %360 = arith.mulf %355, %359 : vector<2x32xf32>
    %361 = vector.extract_strided_slice %344 {offsets = [0, 0], sizes = [2, 96], strides = [1, 1]} : vector<2x128xf32> to vector<2x96xf32>
    %362 = arith.negf %361 : vector<2x96xf32>
    %363 = math.exp %362 : vector<2x96xf32>
    %cst_119 = arith.constant 1.000000e+00 : f32
    %364 = vector.broadcast %cst_119 : f32 to vector<2x96xf32>
    %365 = arith.addf %364, %363 : vector<2x96xf32>
    %366 = arith.divf %364, %365 : vector<2x96xf32>
    %367 = vector.extract_strided_slice %344 {offsets = [0, 96], sizes = [2, 32], strides = [1, 1]} : vector<2x128xf32> to vector<2x32xf32>
    %368 = math.tanh %367 : vector<2x32xf32>
    %369 = vector.extract_strided_slice %366 {offsets = [0, 0], sizes = [2, 32], strides = [1, 1]} : vector<2x96xf32> to vector<2x32xf32>
    %370 = vector.extract_strided_slice %366 {offsets = [0, 32], sizes = [2, 32], strides = [1, 1]} : vector<2x96xf32> to vector<2x32xf32>
    %371 = vector.extract_strided_slice %366 {offsets = [0, 64], sizes = [2, 32], strides = [1, 1]} : vector<2x96xf32> to vector<2x32xf32>
    %372 = arith.mulf %370, %0 : vector<2x32xf32>
    %373 = arith.mulf %369, %368 : vector<2x32xf32>
    %374 = arith.addf %372, %373 : vector<2x32xf32>
    %375 = math.tanh %374 : vector<2x32xf32>
    %376 = arith.mulf %371, %375 : vector<2x32xf32>
    %c2_120 = arith.constant 2 : index
    %c0_121 = arith.constant 0 : index
    %377 = vector.load %arg13[%c2_120, %c0_121] : memref<16x256xf32, #tpu.memory_space<vmem>>, vector<2x128xf32>
    %cst_122 = arith.constant dense<0.000000e+00> : vector<2x128xf32>
    %378 = tpu.matmul %360, %337, %cst_122 {dimension_numbers = #tpu.dot_dimension_numbers<[1], [0], [0], [1], [0, 0, 1, 1], [], []>} : vector<2x32xf32>, vector<32x128xf32>, vector<2x128xf32> -> vector<2x128xf32>
    %379 = arith.addf %377, %378 : vector<2x128xf32>
    %c12_123 = arith.constant 12 : index
    %c128_124 = arith.constant 128 : index
    %380 = vector.load %arg13[%c12_123, %c128_124] : memref<16x256xf32, #tpu.memory_space<vmem>>, vector<2x128xf32>
    %cst_125 = arith.constant dense<0.000000e+00> : vector<2x128xf32>
    %381 = tpu.matmul %376, %338, %cst_125 {dimension_numbers = #tpu.dot_dimension_numbers<[1], [0], [0], [1], [0, 0, 1, 1], [], []>} : vector<2x32xf32>, vector<32x128xf32>, vector<2x128xf32> -> vector<2x128xf32>
    %382 = arith.addf %380, %381 : vector<2x128xf32>
    %383 = vector.extract_strided_slice %379 {offsets = [0, 0], sizes = [2, 96], strides = [1, 1]} : vector<2x128xf32> to vector<2x96xf32>
    %384 = arith.negf %383 : vector<2x96xf32>
    %385 = math.exp %384 : vector<2x96xf32>
    %cst_126 = arith.constant 1.000000e+00 : f32
    %386 = vector.broadcast %cst_126 : f32 to vector<2x96xf32>
    %387 = arith.addf %386, %385 : vector<2x96xf32>
    %388 = arith.divf %386, %387 : vector<2x96xf32>
    %389 = vector.extract_strided_slice %379 {offsets = [0, 96], sizes = [2, 32], strides = [1, 1]} : vector<2x128xf32> to vector<2x32xf32>
    %390 = math.tanh %389 : vector<2x32xf32>
    %391 = vector.extract_strided_slice %388 {offsets = [0, 0], sizes = [2, 32], strides = [1, 1]} : vector<2x96xf32> to vector<2x32xf32>
    %392 = vector.extract_strided_slice %388 {offsets = [0, 32], sizes = [2, 32], strides = [1, 1]} : vector<2x96xf32> to vector<2x32xf32>
    %393 = vector.extract_strided_slice %388 {offsets = [0, 64], sizes = [2, 32], strides = [1, 1]} : vector<2x96xf32> to vector<2x32xf32>
    %394 = arith.mulf %392, %358 : vector<2x32xf32>
    %395 = arith.mulf %391, %390 : vector<2x32xf32>
    %396 = arith.addf %394, %395 : vector<2x32xf32>
    %397 = math.tanh %396 : vector<2x32xf32>
    %398 = arith.mulf %393, %397 : vector<2x32xf32>
    %399 = vector.extract_strided_slice %382 {offsets = [0, 0], sizes = [2, 96], strides = [1, 1]} : vector<2x128xf32> to vector<2x96xf32>
    %400 = arith.negf %399 : vector<2x96xf32>
    %401 = math.exp %400 : vector<2x96xf32>
    %cst_127 = arith.constant 1.000000e+00 : f32
    %402 = vector.broadcast %cst_127 : f32 to vector<2x96xf32>
    %403 = arith.addf %402, %401 : vector<2x96xf32>
    %404 = arith.divf %402, %403 : vector<2x96xf32>
    %405 = vector.extract_strided_slice %382 {offsets = [0, 96], sizes = [2, 32], strides = [1, 1]} : vector<2x128xf32> to vector<2x32xf32>
    %406 = math.tanh %405 : vector<2x32xf32>
    %407 = vector.extract_strided_slice %404 {offsets = [0, 0], sizes = [2, 32], strides = [1, 1]} : vector<2x96xf32> to vector<2x32xf32>
    %408 = vector.extract_strided_slice %404 {offsets = [0, 32], sizes = [2, 32], strides = [1, 1]} : vector<2x96xf32> to vector<2x32xf32>
    %409 = vector.extract_strided_slice %404 {offsets = [0, 64], sizes = [2, 32], strides = [1, 1]} : vector<2x96xf32> to vector<2x32xf32>
    %410 = arith.mulf %408, %374 : vector<2x32xf32>
    %411 = arith.mulf %407, %406 : vector<2x32xf32>
    %412 = arith.addf %410, %411 : vector<2x32xf32>
    %413 = math.tanh %412 : vector<2x32xf32>
    %414 = arith.mulf %409, %413 : vector<2x32xf32>
    %c4_128 = arith.constant 4 : index
    %c0_129 = arith.constant 0 : index
    %415 = vector.load %arg13[%c4_128, %c0_129] : memref<16x256xf32, #tpu.memory_space<vmem>>, vector<2x128xf32>
    %cst_130 = arith.constant dense<0.000000e+00> : vector<2x128xf32>
    %416 = tpu.matmul %398, %337, %cst_130 {dimension_numbers = #tpu.dot_dimension_numbers<[1], [0], [0], [1], [0, 0, 1, 1], [], []>} : vector<2x32xf32>, vector<32x128xf32>, vector<2x128xf32> -> vector<2x128xf32>
    %417 = arith.addf %415, %416 : vector<2x128xf32>
    %c10_131 = arith.constant 10 : index
    %c128_132 = arith.constant 128 : index
    %418 = vector.load %arg13[%c10_131, %c128_132] : memref<16x256xf32, #tpu.memory_space<vmem>>, vector<2x128xf32>
    %cst_133 = arith.constant dense<0.000000e+00> : vector<2x128xf32>
    %419 = tpu.matmul %414, %338, %cst_133 {dimension_numbers = #tpu.dot_dimension_numbers<[1], [0], [0], [1], [0, 0, 1, 1], [], []>} : vector<2x32xf32>, vector<32x128xf32>, vector<2x128xf32> -> vector<2x128xf32>
    %420 = arith.addf %418, %419 : vector<2x128xf32>
    %421 = vector.extract_strided_slice %417 {offsets = [0, 0], sizes = [2, 96], strides = [1, 1]} : vector<2x128xf32> to vector<2x96xf32>
    %422 = arith.negf %421 : vector<2x96xf32>
    %423 = math.exp %422 : vector<2x96xf32>
    %cst_134 = arith.constant 1.000000e+00 : f32
    %424 = vector.broadcast %cst_134 : f32 to vector<2x96xf32>
    %425 = arith.addf %424, %423 : vector<2x96xf32>
    %426 = arith.divf %424, %425 : vector<2x96xf32>
    %427 = vector.extract_strided_slice %417 {offsets = [0, 96], sizes = [2, 32], strides = [1, 1]} : vector<2x128xf32> to vector<2x32xf32>
    %428 = math.tanh %427 : vector<2x32xf32>
    %429 = vector.extract_strided_slice %426 {offsets = [0, 0], sizes = [2, 32], strides = [1, 1]} : vector<2x96xf32> to vector<2x32xf32>
    %430 = vector.extract_strided_slice %426 {offsets = [0, 32], sizes = [2, 32], strides = [1, 1]} : vector<2x96xf32> to vector<2x32xf32>
    %431 = vector.extract_strided_slice %426 {offsets = [0, 64], sizes = [2, 32], strides = [1, 1]} : vector<2x96xf32> to vector<2x32xf32>
    %432 = arith.mulf %430, %396 : vector<2x32xf32>
    %433 = arith.mulf %429, %428 : vector<2x32xf32>
    %434 = arith.addf %432, %433 : vector<2x32xf32>
    %435 = math.tanh %434 : vector<2x32xf32>
    %436 = arith.mulf %431, %435 : vector<2x32xf32>
    %437 = vector.extract_strided_slice %420 {offsets = [0, 0], sizes = [2, 96], strides = [1, 1]} : vector<2x128xf32> to vector<2x96xf32>
    %438 = arith.negf %437 : vector<2x96xf32>
    %439 = math.exp %438 : vector<2x96xf32>
    %cst_135 = arith.constant 1.000000e+00 : f32
    %440 = vector.broadcast %cst_135 : f32 to vector<2x96xf32>
    %441 = arith.addf %440, %439 : vector<2x96xf32>
    %442 = arith.divf %440, %441 : vector<2x96xf32>
    %443 = vector.extract_strided_slice %420 {offsets = [0, 96], sizes = [2, 32], strides = [1, 1]} : vector<2x128xf32> to vector<2x32xf32>
    %444 = math.tanh %443 : vector<2x32xf32>
    %445 = vector.extract_strided_slice %442 {offsets = [0, 0], sizes = [2, 32], strides = [1, 1]} : vector<2x96xf32> to vector<2x32xf32>
    %446 = vector.extract_strided_slice %442 {offsets = [0, 32], sizes = [2, 32], strides = [1, 1]} : vector<2x96xf32> to vector<2x32xf32>
    %447 = vector.extract_strided_slice %442 {offsets = [0, 64], sizes = [2, 32], strides = [1, 1]} : vector<2x96xf32> to vector<2x32xf32>
    %448 = arith.mulf %446, %412 : vector<2x32xf32>
    %449 = arith.mulf %445, %444 : vector<2x32xf32>
    %450 = arith.addf %448, %449 : vector<2x32xf32>
    %451 = math.tanh %450 : vector<2x32xf32>
    %452 = arith.mulf %447, %451 : vector<2x32xf32>
    %c6_136 = arith.constant 6 : index
    %c0_137 = arith.constant 0 : index
    %453 = vector.load %arg13[%c6_136, %c0_137] : memref<16x256xf32, #tpu.memory_space<vmem>>, vector<2x128xf32>
    %cst_138 = arith.constant dense<0.000000e+00> : vector<2x128xf32>
    %454 = tpu.matmul %436, %337, %cst_138 {dimension_numbers = #tpu.dot_dimension_numbers<[1], [0], [0], [1], [0, 0, 1, 1], [], []>} : vector<2x32xf32>, vector<32x128xf32>, vector<2x128xf32> -> vector<2x128xf32>
    %455 = arith.addf %453, %454 : vector<2x128xf32>
    %c8_139 = arith.constant 8 : index
    %c128_140 = arith.constant 128 : index
    %456 = vector.load %arg13[%c8_139, %c128_140] : memref<16x256xf32, #tpu.memory_space<vmem>>, vector<2x128xf32>
    %cst_141 = arith.constant dense<0.000000e+00> : vector<2x128xf32>
    %457 = tpu.matmul %452, %338, %cst_141 {dimension_numbers = #tpu.dot_dimension_numbers<[1], [0], [0], [1], [0, 0, 1, 1], [], []>} : vector<2x32xf32>, vector<32x128xf32>, vector<2x128xf32> -> vector<2x128xf32>
    %458 = arith.addf %456, %457 : vector<2x128xf32>
    %459 = vector.extract_strided_slice %455 {offsets = [0, 0], sizes = [2, 96], strides = [1, 1]} : vector<2x128xf32> to vector<2x96xf32>
    %460 = arith.negf %459 : vector<2x96xf32>
    %461 = math.exp %460 : vector<2x96xf32>
    %cst_142 = arith.constant 1.000000e+00 : f32
    %462 = vector.broadcast %cst_142 : f32 to vector<2x96xf32>
    %463 = arith.addf %462, %461 : vector<2x96xf32>
    %464 = arith.divf %462, %463 : vector<2x96xf32>
    %465 = vector.extract_strided_slice %455 {offsets = [0, 96], sizes = [2, 32], strides = [1, 1]} : vector<2x128xf32> to vector<2x32xf32>
    %466 = math.tanh %465 : vector<2x32xf32>
    %467 = vector.extract_strided_slice %464 {offsets = [0, 0], sizes = [2, 32], strides = [1, 1]} : vector<2x96xf32> to vector<2x32xf32>
    %468 = vector.extract_strided_slice %464 {offsets = [0, 32], sizes = [2, 32], strides = [1, 1]} : vector<2x96xf32> to vector<2x32xf32>
    %469 = vector.extract_strided_slice %464 {offsets = [0, 64], sizes = [2, 32], strides = [1, 1]} : vector<2x96xf32> to vector<2x32xf32>
    %470 = arith.mulf %468, %434 : vector<2x32xf32>
    %471 = arith.mulf %467, %466 : vector<2x32xf32>
    %472 = arith.addf %470, %471 : vector<2x32xf32>
    %473 = math.tanh %472 : vector<2x32xf32>
    %474 = arith.mulf %469, %473 : vector<2x32xf32>
    %475 = vector.extract_strided_slice %458 {offsets = [0, 0], sizes = [2, 96], strides = [1, 1]} : vector<2x128xf32> to vector<2x96xf32>
    %476 = arith.negf %475 : vector<2x96xf32>
    %477 = math.exp %476 : vector<2x96xf32>
    %cst_143 = arith.constant 1.000000e+00 : f32
    %478 = vector.broadcast %cst_143 : f32 to vector<2x96xf32>
    %479 = arith.addf %478, %477 : vector<2x96xf32>
    %480 = arith.divf %478, %479 : vector<2x96xf32>
    %481 = vector.extract_strided_slice %458 {offsets = [0, 96], sizes = [2, 32], strides = [1, 1]} : vector<2x128xf32> to vector<2x32xf32>
    %482 = math.tanh %481 : vector<2x32xf32>
    %483 = vector.extract_strided_slice %480 {offsets = [0, 0], sizes = [2, 32], strides = [1, 1]} : vector<2x96xf32> to vector<2x32xf32>
    %484 = vector.extract_strided_slice %480 {offsets = [0, 32], sizes = [2, 32], strides = [1, 1]} : vector<2x96xf32> to vector<2x32xf32>
    %485 = vector.extract_strided_slice %480 {offsets = [0, 64], sizes = [2, 32], strides = [1, 1]} : vector<2x96xf32> to vector<2x32xf32>
    %486 = arith.mulf %484, %450 : vector<2x32xf32>
    %487 = arith.mulf %483, %482 : vector<2x32xf32>
    %488 = arith.addf %486, %487 : vector<2x32xf32>
    %489 = math.tanh %488 : vector<2x32xf32>
    %490 = arith.mulf %485, %489 : vector<2x32xf32>
    %c8_144 = arith.constant 8 : index
    %c0_145 = arith.constant 0 : index
    %491 = vector.load %arg13[%c8_144, %c0_145] : memref<16x256xf32, #tpu.memory_space<vmem>>, vector<2x128xf32>
    %cst_146 = arith.constant dense<0.000000e+00> : vector<2x128xf32>
    %492 = tpu.matmul %474, %337, %cst_146 {dimension_numbers = #tpu.dot_dimension_numbers<[1], [0], [0], [1], [0, 0, 1, 1], [], []>} : vector<2x32xf32>, vector<32x128xf32>, vector<2x128xf32> -> vector<2x128xf32>
    %493 = arith.addf %491, %492 : vector<2x128xf32>
    %c6_147 = arith.constant 6 : index
    %c128_148 = arith.constant 128 : index
    %494 = vector.load %arg13[%c6_147, %c128_148] : memref<16x256xf32, #tpu.memory_space<vmem>>, vector<2x128xf32>
    %cst_149 = arith.constant dense<0.000000e+00> : vector<2x128xf32>
    %495 = tpu.matmul %490, %338, %cst_149 {dimension_numbers = #tpu.dot_dimension_numbers<[1], [0], [0], [1], [0, 0, 1, 1], [], []>} : vector<2x32xf32>, vector<32x128xf32>, vector<2x128xf32> -> vector<2x128xf32>
    %496 = arith.addf %494, %495 : vector<2x128xf32>
    %497 = vector.extract_strided_slice %493 {offsets = [0, 0], sizes = [2, 96], strides = [1, 1]} : vector<2x128xf32> to vector<2x96xf32>
    %498 = arith.negf %497 : vector<2x96xf32>
    %499 = math.exp %498 : vector<2x96xf32>
    %cst_150 = arith.constant 1.000000e+00 : f32
    %500 = vector.broadcast %cst_150 : f32 to vector<2x96xf32>
    %501 = arith.addf %500, %499 : vector<2x96xf32>
    %502 = arith.divf %500, %501 : vector<2x96xf32>
    %503 = vector.extract_strided_slice %493 {offsets = [0, 96], sizes = [2, 32], strides = [1, 1]} : vector<2x128xf32> to vector<2x32xf32>
    %504 = math.tanh %503 : vector<2x32xf32>
    %505 = vector.extract_strided_slice %502 {offsets = [0, 0], sizes = [2, 32], strides = [1, 1]} : vector<2x96xf32> to vector<2x32xf32>
    %506 = vector.extract_strided_slice %502 {offsets = [0, 32], sizes = [2, 32], strides = [1, 1]} : vector<2x96xf32> to vector<2x32xf32>
    %507 = vector.extract_strided_slice %502 {offsets = [0, 64], sizes = [2, 32], strides = [1, 1]} : vector<2x96xf32> to vector<2x32xf32>
    %508 = arith.mulf %506, %472 : vector<2x32xf32>
    %509 = arith.mulf %505, %504 : vector<2x32xf32>
    %510 = arith.addf %508, %509 : vector<2x32xf32>
    %511 = math.tanh %510 : vector<2x32xf32>
    %512 = arith.mulf %507, %511 : vector<2x32xf32>
    %513 = vector.extract_strided_slice %496 {offsets = [0, 0], sizes = [2, 96], strides = [1, 1]} : vector<2x128xf32> to vector<2x96xf32>
    %514 = arith.negf %513 : vector<2x96xf32>
    %515 = math.exp %514 : vector<2x96xf32>
    %cst_151 = arith.constant 1.000000e+00 : f32
    %516 = vector.broadcast %cst_151 : f32 to vector<2x96xf32>
    %517 = arith.addf %516, %515 : vector<2x96xf32>
    %518 = arith.divf %516, %517 : vector<2x96xf32>
    %519 = vector.extract_strided_slice %496 {offsets = [0, 96], sizes = [2, 32], strides = [1, 1]} : vector<2x128xf32> to vector<2x32xf32>
    %520 = math.tanh %519 : vector<2x32xf32>
    %521 = vector.extract_strided_slice %518 {offsets = [0, 0], sizes = [2, 32], strides = [1, 1]} : vector<2x96xf32> to vector<2x32xf32>
    %522 = vector.extract_strided_slice %518 {offsets = [0, 32], sizes = [2, 32], strides = [1, 1]} : vector<2x96xf32> to vector<2x32xf32>
    %523 = vector.extract_strided_slice %518 {offsets = [0, 64], sizes = [2, 32], strides = [1, 1]} : vector<2x96xf32> to vector<2x32xf32>
    %524 = arith.mulf %522, %488 : vector<2x32xf32>
    %525 = arith.mulf %521, %520 : vector<2x32xf32>
    %526 = arith.addf %524, %525 : vector<2x32xf32>
    %527 = math.tanh %526 : vector<2x32xf32>
    %528 = arith.mulf %523, %527 : vector<2x32xf32>
    %c10_152 = arith.constant 10 : index
    %c0_153 = arith.constant 0 : index
    %529 = vector.load %arg13[%c10_152, %c0_153] : memref<16x256xf32, #tpu.memory_space<vmem>>, vector<2x128xf32>
    %cst_154 = arith.constant dense<0.000000e+00> : vector<2x128xf32>
    %530 = tpu.matmul %512, %337, %cst_154 {dimension_numbers = #tpu.dot_dimension_numbers<[1], [0], [0], [1], [0, 0, 1, 1], [], []>} : vector<2x32xf32>, vector<32x128xf32>, vector<2x128xf32> -> vector<2x128xf32>
    %531 = arith.addf %529, %530 : vector<2x128xf32>
    %c4_155 = arith.constant 4 : index
    %c128_156 = arith.constant 128 : index
    %532 = vector.load %arg13[%c4_155, %c128_156] : memref<16x256xf32, #tpu.memory_space<vmem>>, vector<2x128xf32>
    %cst_157 = arith.constant dense<0.000000e+00> : vector<2x128xf32>
    %533 = tpu.matmul %528, %338, %cst_157 {dimension_numbers = #tpu.dot_dimension_numbers<[1], [0], [0], [1], [0, 0, 1, 1], [], []>} : vector<2x32xf32>, vector<32x128xf32>, vector<2x128xf32> -> vector<2x128xf32>
    %534 = arith.addf %532, %533 : vector<2x128xf32>
    %535 = vector.extract_strided_slice %531 {offsets = [0, 0], sizes = [2, 96], strides = [1, 1]} : vector<2x128xf32> to vector<2x96xf32>
    %536 = arith.negf %535 : vector<2x96xf32>
    %537 = math.exp %536 : vector<2x96xf32>
    %cst_158 = arith.constant 1.000000e+00 : f32
    %538 = vector.broadcast %cst_158 : f32 to vector<2x96xf32>
    %539 = arith.addf %538, %537 : vector<2x96xf32>
    %540 = arith.divf %538, %539 : vector<2x96xf32>
    %541 = vector.extract_strided_slice %531 {offsets = [0, 96], sizes = [2, 32], strides = [1, 1]} : vector<2x128xf32> to vector<2x32xf32>
    %542 = math.tanh %541 : vector<2x32xf32>
    %543 = vector.extract_strided_slice %540 {offsets = [0, 0], sizes = [2, 32], strides = [1, 1]} : vector<2x96xf32> to vector<2x32xf32>
    %544 = vector.extract_strided_slice %540 {offsets = [0, 32], sizes = [2, 32], strides = [1, 1]} : vector<2x96xf32> to vector<2x32xf32>
    %545 = vector.extract_strided_slice %540 {offsets = [0, 64], sizes = [2, 32], strides = [1, 1]} : vector<2x96xf32> to vector<2x32xf32>
    %546 = arith.mulf %544, %510 : vector<2x32xf32>
    %547 = arith.mulf %543, %542 : vector<2x32xf32>
    %548 = arith.addf %546, %547 : vector<2x32xf32>
    %549 = math.tanh %548 : vector<2x32xf32>
    %550 = arith.mulf %545, %549 : vector<2x32xf32>
    %551 = vector.extract_strided_slice %534 {offsets = [0, 0], sizes = [2, 96], strides = [1, 1]} : vector<2x128xf32> to vector<2x96xf32>
    %552 = arith.negf %551 : vector<2x96xf32>
    %553 = math.exp %552 : vector<2x96xf32>
    %cst_159 = arith.constant 1.000000e+00 : f32
    %554 = vector.broadcast %cst_159 : f32 to vector<2x96xf32>
    %555 = arith.addf %554, %553 : vector<2x96xf32>
    %556 = arith.divf %554, %555 : vector<2x96xf32>
    %557 = vector.extract_strided_slice %534 {offsets = [0, 96], sizes = [2, 32], strides = [1, 1]} : vector<2x128xf32> to vector<2x32xf32>
    %558 = math.tanh %557 : vector<2x32xf32>
    %559 = vector.extract_strided_slice %556 {offsets = [0, 0], sizes = [2, 32], strides = [1, 1]} : vector<2x96xf32> to vector<2x32xf32>
    %560 = vector.extract_strided_slice %556 {offsets = [0, 32], sizes = [2, 32], strides = [1, 1]} : vector<2x96xf32> to vector<2x32xf32>
    %561 = vector.extract_strided_slice %556 {offsets = [0, 64], sizes = [2, 32], strides = [1, 1]} : vector<2x96xf32> to vector<2x32xf32>
    %562 = arith.mulf %560, %526 : vector<2x32xf32>
    %563 = arith.mulf %559, %558 : vector<2x32xf32>
    %564 = arith.addf %562, %563 : vector<2x32xf32>
    %565 = math.tanh %564 : vector<2x32xf32>
    %566 = arith.mulf %561, %565 : vector<2x32xf32>
    %c12_160 = arith.constant 12 : index
    %c0_161 = arith.constant 0 : index
    %567 = vector.load %arg13[%c12_160, %c0_161] : memref<16x256xf32, #tpu.memory_space<vmem>>, vector<2x128xf32>
    %cst_162 = arith.constant dense<0.000000e+00> : vector<2x128xf32>
    %568 = tpu.matmul %550, %337, %cst_162 {dimension_numbers = #tpu.dot_dimension_numbers<[1], [0], [0], [1], [0, 0, 1, 1], [], []>} : vector<2x32xf32>, vector<32x128xf32>, vector<2x128xf32> -> vector<2x128xf32>
    %569 = arith.addf %567, %568 : vector<2x128xf32>
    %c2_163 = arith.constant 2 : index
    %c128_164 = arith.constant 128 : index
    %570 = vector.load %arg13[%c2_163, %c128_164] : memref<16x256xf32, #tpu.memory_space<vmem>>, vector<2x128xf32>
    %cst_165 = arith.constant dense<0.000000e+00> : vector<2x128xf32>
    %571 = tpu.matmul %566, %338, %cst_165 {dimension_numbers = #tpu.dot_dimension_numbers<[1], [0], [0], [1], [0, 0, 1, 1], [], []>} : vector<2x32xf32>, vector<32x128xf32>, vector<2x128xf32> -> vector<2x128xf32>
    %572 = arith.addf %570, %571 : vector<2x128xf32>
    %573 = vector.extract_strided_slice %569 {offsets = [0, 0], sizes = [2, 96], strides = [1, 1]} : vector<2x128xf32> to vector<2x96xf32>
    %574 = arith.negf %573 : vector<2x96xf32>
    %575 = math.exp %574 : vector<2x96xf32>
    %cst_166 = arith.constant 1.000000e+00 : f32
    %576 = vector.broadcast %cst_166 : f32 to vector<2x96xf32>
    %577 = arith.addf %576, %575 : vector<2x96xf32>
    %578 = arith.divf %576, %577 : vector<2x96xf32>
    %579 = vector.extract_strided_slice %569 {offsets = [0, 96], sizes = [2, 32], strides = [1, 1]} : vector<2x128xf32> to vector<2x32xf32>
    %580 = math.tanh %579 : vector<2x32xf32>
    %581 = vector.extract_strided_slice %578 {offsets = [0, 0], sizes = [2, 32], strides = [1, 1]} : vector<2x96xf32> to vector<2x32xf32>
    %582 = vector.extract_strided_slice %578 {offsets = [0, 32], sizes = [2, 32], strides = [1, 1]} : vector<2x96xf32> to vector<2x32xf32>
    %583 = vector.extract_strided_slice %578 {offsets = [0, 64], sizes = [2, 32], strides = [1, 1]} : vector<2x96xf32> to vector<2x32xf32>
    %584 = arith.mulf %582, %548 : vector<2x32xf32>
    %585 = arith.mulf %581, %580 : vector<2x32xf32>
    %586 = arith.addf %584, %585 : vector<2x32xf32>
    %587 = math.tanh %586 : vector<2x32xf32>
    %588 = arith.mulf %583, %587 : vector<2x32xf32>
    %589 = vector.extract_strided_slice %572 {offsets = [0, 0], sizes = [2, 96], strides = [1, 1]} : vector<2x128xf32> to vector<2x96xf32>
    %590 = arith.negf %589 : vector<2x96xf32>
    %591 = math.exp %590 : vector<2x96xf32>
    %cst_167 = arith.constant 1.000000e+00 : f32
    %592 = vector.broadcast %cst_167 : f32 to vector<2x96xf32>
    %593 = arith.addf %592, %591 : vector<2x96xf32>
    %594 = arith.divf %592, %593 : vector<2x96xf32>
    %595 = vector.extract_strided_slice %572 {offsets = [0, 96], sizes = [2, 32], strides = [1, 1]} : vector<2x128xf32> to vector<2x32xf32>
    %596 = math.tanh %595 : vector<2x32xf32>
    %597 = vector.extract_strided_slice %594 {offsets = [0, 0], sizes = [2, 32], strides = [1, 1]} : vector<2x96xf32> to vector<2x32xf32>
    %598 = vector.extract_strided_slice %594 {offsets = [0, 32], sizes = [2, 32], strides = [1, 1]} : vector<2x96xf32> to vector<2x32xf32>
    %599 = vector.extract_strided_slice %594 {offsets = [0, 64], sizes = [2, 32], strides = [1, 1]} : vector<2x96xf32> to vector<2x32xf32>
    %600 = arith.mulf %598, %564 : vector<2x32xf32>
    %601 = arith.mulf %597, %596 : vector<2x32xf32>
    %602 = arith.addf %600, %601 : vector<2x32xf32>
    %603 = math.tanh %602 : vector<2x32xf32>
    %604 = arith.mulf %599, %603 : vector<2x32xf32>
    %c14_168 = arith.constant 14 : index
    %c0_169 = arith.constant 0 : index
    %605 = vector.load %arg13[%c14_168, %c0_169] : memref<16x256xf32, #tpu.memory_space<vmem>>, vector<2x128xf32>
    %cst_170 = arith.constant dense<0.000000e+00> : vector<2x128xf32>
    %606 = tpu.matmul %588, %337, %cst_170 {dimension_numbers = #tpu.dot_dimension_numbers<[1], [0], [0], [1], [0, 0, 1, 1], [], []>} : vector<2x32xf32>, vector<32x128xf32>, vector<2x128xf32> -> vector<2x128xf32>
    %607 = arith.addf %605, %606 : vector<2x128xf32>
    %c0_171 = arith.constant 0 : index
    %c128_172 = arith.constant 128 : index
    %608 = vector.load %arg13[%c0_171, %c128_172] : memref<16x256xf32, #tpu.memory_space<vmem>>, vector<2x128xf32>
    %cst_173 = arith.constant dense<0.000000e+00> : vector<2x128xf32>
    %609 = tpu.matmul %604, %338, %cst_173 {dimension_numbers = #tpu.dot_dimension_numbers<[1], [0], [0], [1], [0, 0, 1, 1], [], []>} : vector<2x32xf32>, vector<32x128xf32>, vector<2x128xf32> -> vector<2x128xf32>
    %610 = arith.addf %608, %609 : vector<2x128xf32>
    %611 = vector.extract_strided_slice %607 {offsets = [0, 0], sizes = [2, 96], strides = [1, 1]} : vector<2x128xf32> to vector<2x96xf32>
    %612 = arith.negf %611 : vector<2x96xf32>
    %613 = math.exp %612 : vector<2x96xf32>
    %cst_174 = arith.constant 1.000000e+00 : f32
    %614 = vector.broadcast %cst_174 : f32 to vector<2x96xf32>
    %615 = arith.addf %614, %613 : vector<2x96xf32>
    %616 = arith.divf %614, %615 : vector<2x96xf32>
    %617 = vector.extract_strided_slice %607 {offsets = [0, 96], sizes = [2, 32], strides = [1, 1]} : vector<2x128xf32> to vector<2x32xf32>
    %618 = math.tanh %617 : vector<2x32xf32>
    %619 = vector.extract_strided_slice %616 {offsets = [0, 0], sizes = [2, 32], strides = [1, 1]} : vector<2x96xf32> to vector<2x32xf32>
    %620 = vector.extract_strided_slice %616 {offsets = [0, 32], sizes = [2, 32], strides = [1, 1]} : vector<2x96xf32> to vector<2x32xf32>
    %621 = vector.extract_strided_slice %616 {offsets = [0, 64], sizes = [2, 32], strides = [1, 1]} : vector<2x96xf32> to vector<2x32xf32>
    %622 = arith.mulf %620, %586 : vector<2x32xf32>
    %623 = arith.mulf %619, %618 : vector<2x32xf32>
    %624 = arith.addf %622, %623 : vector<2x32xf32>
    %625 = math.tanh %624 : vector<2x32xf32>
    %626 = arith.mulf %621, %625 : vector<2x32xf32>
    %627 = vector.extract_strided_slice %610 {offsets = [0, 0], sizes = [2, 96], strides = [1, 1]} : vector<2x128xf32> to vector<2x96xf32>
    %628 = arith.negf %627 : vector<2x96xf32>
    %629 = math.exp %628 : vector<2x96xf32>
    %cst_175 = arith.constant 1.000000e+00 : f32
    %630 = vector.broadcast %cst_175 : f32 to vector<2x96xf32>
    %631 = arith.addf %630, %629 : vector<2x96xf32>
    %632 = arith.divf %630, %631 : vector<2x96xf32>
    %633 = vector.extract_strided_slice %610 {offsets = [0, 96], sizes = [2, 32], strides = [1, 1]} : vector<2x128xf32> to vector<2x32xf32>
    %634 = math.tanh %633 : vector<2x32xf32>
    %635 = vector.extract_strided_slice %632 {offsets = [0, 0], sizes = [2, 32], strides = [1, 1]} : vector<2x96xf32> to vector<2x32xf32>
    %636 = vector.extract_strided_slice %632 {offsets = [0, 32], sizes = [2, 32], strides = [1, 1]} : vector<2x96xf32> to vector<2x32xf32>
    %637 = vector.extract_strided_slice %632 {offsets = [0, 64], sizes = [2, 32], strides = [1, 1]} : vector<2x96xf32> to vector<2x32xf32>
    %638 = arith.mulf %636, %602 : vector<2x32xf32>
    %639 = arith.mulf %635, %634 : vector<2x32xf32>
    %640 = arith.addf %638, %639 : vector<2x32xf32>
    %641 = math.tanh %640 : vector<2x32xf32>
    %642 = arith.mulf %637, %641 : vector<2x32xf32>
    %643 = tpu.concatenate %626, %642 in 1 : vector<2x32xf32>, vector<2x32xf32> -> vector<2x64xf32>
    %c0_176 = arith.constant 0 : index
    %c0_177 = arith.constant 0 : index
    %644 = vector.load %arg9[%c0_176, %c0_177] : memref<64x4xf32, #tpu.memory_space<vmem>>, vector<64x4xf32>
    %cst_178 = arith.constant dense<0.000000e+00> : vector<2x4xf32>
    %645 = tpu.matmul %643, %644, %cst_178 {dimension_numbers = #tpu.dot_dimension_numbers<[1], [0], [0], [1], [0, 0, 1, 1], [], []>} : vector<2x64xf32>, vector<64x4xf32>, vector<2x4xf32> -> vector<2x4xf32>
    %c0_179 = arith.constant 0 : index
    %c0_180 = arith.constant 0 : index
    %646 = vector.load %arg10[%c0_179, %c0_180] : memref<1x4xf32, #tpu.memory_space<vmem>>, vector<1x4xf32>
    %647 = vector.broadcast %646 : vector<1x4xf32> to vector<2x4xf32>
    %648 = arith.addf %645, %647 : vector<2x4xf32>
    %c0_181 = arith.constant 0 : index
    %c0_182 = arith.constant 0 : index
    %649 = vector.load %arg11[%c0_181, %c0_182] : memref<2x4xf32, #tpu.memory_space<vmem>>, vector<2x4xf32>
    tpu.vector_store %arg11[%c0_181, %c0_182], %648 {strides = array<i32>} : memref<2x4xf32, #tpu.memory_space<vmem>>, vector<2x4xf32>,
    return
  }
}

</mosaic_0001>

<bundles_post_ra>
// kernel: tpu_custom_call.1
= control target key start
LH: loop header
LB: loop body
LE: loop exit
PB: predicated region body
PF: predicated region fallthrough
CT: control target
= control target key end

     0   :  { %16 = vsyncpa [#allocation5], 0  ;;  %s5872_s0 = inlined_call_operand.hbm [shape: f32[16,32], index: 0, kind: input, shape index: {}]   ;;  %s5873_s1 = inlined_call_operand.vmem [shape: f32[32,256], index: 1, kind: input, shape index: {}]   ;;  %s5874_s2 = inlined_call_operand.vmem [shape: f32[1,256], index: 2, kind: input, shape index: {}]   ;;  %s5875_s3 = inlined_call_operand.hbm [shape: f32[32,128], index: 3, kind: input, shape index: {}]   ;;  %s5876_s4 = inlined_call_operand.hbm [shape: f32[32,128], index: 4, kind: input, shape index: {}]   ;;  %s5877_s5 = inlined_call_operand.hbm [shape: f32[64,256], index: 5, kind: input, shape index: {}]   ;;  %s5878_s6 = inlined_call_operand.vmem [shape: f32[1,256], index: 6, kind: input, shape index: {}]   ;;  %s5879_s7 = inlined_call_operand.hbm [shape: f32[32,128], index: 7, kind: input, shape index: {}]   ;;  %s5880_s8 = inlined_call_operand.hbm [shape: f32[32,128], index: 8, kind: input, shape index: {}]   ;;  %s5881_s9 = inlined_call_operand.vmem [shape: f32[64,4], index: 9, kind: input, shape index: {}]   ;;  %s5882_s10 = inlined_call_operand.vmem [shape: f32[1,4], index: 10, kind: input, shape index: {}]   ;;  %s5883_s11 = inlined_call_operand.hbm [shape: f32[2,4], index: 11, kind: output, shape index: {}]  }
   0x1   :  { %17 = vsyncpa [#allocation8], 0 }
   0x2   :  { %18 = vsyncpa [#allocation11], 0 }
   0x3   :  { %19 = vsyncpa [#allocation14], 0 }
   0x4   :  { %20 = vsyncpa [#allocation6], 0  ;;  %s4987_s17 = smov [#allocation7]   ;;  %s4988_s19 = smov [#allocation10]  }
   0x5   :  { %s42_s18 = sshll.u32 %s4987_s17, 4  ;;  %s66_s20 = sshll.u32 %s4988_s19, 4  ;;  %s43_s18 = int_to_ptr.vmem [resolvable:$true] %s42_s18  ;;  %s67_s20 = int_to_ptr.vmem [resolvable:$true] %s66_s20 }
   0x6   :  { %s4845_s21 = scalar_lea.vmem %s43_s18, 512  ;;  %p4850_p1 = scmp.lt.s32.totalorder %s43_s18, %s43_s18 }
   0x7   :  { %p4846_p0 = scmp.ne.s32.totalorder %s43_s18, %s4845_s21  ;;  %p4851_p2 = scmp.lt.s32.totalorder %s4845_s21, %s4845_s21 }
   0x9   :  { %p4852_p3 = por %p4851_p2, %p4850_p1 }
   0xb   :  { %p4853_p4 = pnand %p4852_p3, %p4846_p0 }
   0xd   :  { %4856 = shalt.err (!%p4853_p4)
}
   0xe   :  { %s4989_s22 = smov 128   ;;  %s4990_s23 = smov 8  }
   0xf   :  { %48 = dma.hbm_to_vmem [thread:$0]  %s5875_s3, 512, %s43_s18, [#allocation8], %s4989_s22, %s4989_s22, %s4990_s23  }
  0x10   :  { %s4865_s26 = scalar_lea.vmem %s67_s20, 2048  ;;  %p4870_p6 = scmp.lt.s32.totalorder %s67_s20, %s67_s20 }
  0x11   :  { %p4866_p5 = scmp.ne.s32.totalorder %s67_s20, %s4865_s26  ;;  %p4871_p7 = scmp.lt.s32.totalorder %s4865_s26, %s4865_s26 }
  0x13   :  { %p4872_p8 = por %p4871_p7, %p4870_p6 }
  0x15   :  { %p4873_p9 = pnand %p4872_p8, %p4866_p5 }
  0x17   :  { %4876 = shalt.err (!%p4873_p9)
}
  0x18   :  { %s4991_s27 = smov 256   ;;  %s4992_s28 = smov 16  }
  0x19   :  { %72 = dma.hbm_to_vmem [thread:$0]  %s5877_s5, 2048, %s67_s20, [#allocation11], %s4991_s27, %s4991_s27, %s4992_s28  }
  0x1a   :  { %s4993_s12 = smov [#allocation4]   ;;  %s4994_s14 = smov [#allocation9]  }
  0x1b   :  { %s26_s13 = sshll.u32 %s4993_s12, 4  ;;  %s54_s15 = sshll.u32 %s4994_s14, 4  ;;  %s27_s13 = int_to_ptr.vmem [resolvable:$true] %s26_s13  ;;  %s55_s15 = int_to_ptr.vmem [resolvable:$true] %s54_s15 }
  0x1c   :  { %s4885_s3 = scalar_lea.vmem %s27_s13, 256  ;;  %p4890_p11 = scmp.lt.s32.totalorder %s27_s13, %s27_s13 }
  0x1d   :  { %p4886_p10 = scmp.ne.s32.totalorder %s27_s13, %s4885_s3  ;;  %p4891_p12 = scmp.lt.s32.totalorder %s4885_s3, %s4885_s3 }
  0x1f   :  { %p4892_p13 = por %p4891_p12, %p4890_p11 }
  0x21   :  { %p4893_p0 = pnand %p4892_p13, %p4886_p10 }
  0x23   :  { %4896 = shalt.err (!%p4893_p0)
}
  0x24   :  { %32 = dma.hbm_to_vmem [thread:$0]  %s5872_s0, 256, %s27_s13, [#allocation5], %s4989_s22, %s4989_s22, %s4990_s23  }
  0x25   :  { %s4905_s5 = scalar_lea.vmem %s55_s15, 512  ;;  %p4910_p2 = scmp.lt.s32.totalorder %s55_s15, %s55_s15 }
  0x26   :  { %p4906_p1 = scmp.ne.s32.totalorder %s55_s15, %s4905_s5  ;;  %p4911_p3 = scmp.lt.s32.totalorder %s4905_s5, %s4905_s5 }
  0x28   :  { %p4912_p4 = por %p4911_p3, %p4910_p2 }
  0x2a   :  { %p4913_p5 = pnand %p4912_p4, %p4906_p1 }
  0x2c   :  { %4916 = shalt.err (!%p4913_p5)
}
  0x2d   :  { %60 = dma.hbm_to_vmem [thread:$0]  %s5876_s4, 512, %s55_s15, [#allocation8], %s4989_s22, %s4989_s22, %s4990_s23  }
  0x2e   :  { %s4995_s20 = smov [#allocation12]   ;;  %s4996_s24 = smov [#allocation13]  }
  0x2f   :  { %s80_s21 = sshll.u32 %s4995_s20, 4  ;;  %s92_s25 = sshll.u32 %s4996_s24, 4  ;;  %s81_s21 = int_to_ptr.vmem [resolvable:$true] %s80_s21  ;;  %s93_s25 = int_to_ptr.vmem [resolvable:$true] %s92_s25 }
  0x30   :  { %s4925_s0 = scalar_lea.vmem %s81_s21, 512  ;;  %p4930_p7 = scmp.lt.s32.totalorder %s81_s21, %s81_s21 }
  0x31   :  { %p4926_p6 = scmp.ne.s32.totalorder %s81_s21, %s4925_s0  ;;  %p4931_p8 = scmp.lt.s32.totalorder %s4925_s0, %s4925_s0 }
  0x33   :  { %p4932_p9 = por %p4931_p8, %p4930_p7 }
  0x35   :  { %p4933_p10 = pnand %p4932_p9, %p4926_p6 }
  0x37   :  { %4936 = shalt.err (!%p4933_p10)
}
  0x38   :  { %86 = dma.hbm_to_vmem [thread:$0]  %s5879_s7, 512, %s81_s21, [#allocation11], %s4989_s22, %s4989_s22, %s4990_s23  }
  0x39   :  { %s4945_s4 = scalar_lea.vmem %s93_s25, 512  ;;  %p4950_p12 = scmp.lt.s32.totalorder %s93_s25, %s93_s25 }
  0x3a   :  { %p4946_p11 = scmp.ne.s32.totalorder %s93_s25, %s4945_s4  ;;  %p4951_p13 = scmp.lt.s32.totalorder %s4945_s4, %s4945_s4 }
  0x3c   :  { %p4952_p0 = por %p4951_p13, %p4950_p12 }
  0x3e   :  { %p4953_p1 = pnand %p4952_p0, %p4946_p11 }
  0x40   :  { %4956 = shalt.err (!%p4953_p1)
}
  0x41   :  { %98 = dma.hbm_to_vmem [thread:$0]  %s5880_s8, 512, %s93_s25, [#allocation14], %s4989_s22, %s4989_s22, %s4990_s23  }
  0x42   :  { %4977 = dma.done.wait [#allocation5], 256  }
  0x43   :  { %4978 = vsyncadd [#allocation5], 4294967040 }
  0x44   :  { %4979 = dma.done.wait [#allocation8], 1024  }
  0x45   :  { %4980 = vsyncadd [#allocation8], 4294966272 }
  0x46   :  { %4981 = dma.done.wait [#allocation11], 2560  }
  0x47   :  { %4982 = vsyncadd [#allocation11], 4294964736 }
  0x48   :  { %4983 = dma.done.wait [#allocation14], 512  }
  0x49   :  { %4984 = vsyncadd [#allocation14], 4294966784  ;;  %v4997_v0 = vmov 0.0   ;;  %vm4998_vm0 = vmmov 0   ;;  %v130_v1 = vld [vmem:[%s5873_s1 + $0x38] sm:$0xff]  ;;  %v129_v2 = vld [vmem:[%s5873_s1 + $0x30] sm:$0xff]  ;;  %v133_v19 = vlaneseq }
  0x4a   :  { %214 = vmatprep.mubr.f32.mxu0 %v4997_v0  ;;  %4182 = vmatprep.subr.mxu1 %v4997_v0  ;;  %v128_v3 = vld [vmem:[%s5873_s1 + $0x28] sm:$0xff]  ;;  %v127_v4 = vld [vmem:[%s5873_s1 + $0x20] sm:$0xff]  ;;  %v126_v5 = vld [vmem:[%s5873_s1 + $0x18] sm:$0xff]  ;;  %vm143_vm1 = vcmask 261120   ;;  %s5000_s24 = smov 64   ;;  %vm441_vm2 = vcmask 254976  }
  0x4b   :  { %4190 = vmatprep.mubr.msk.f32.mxu1 %vm4998_vm0, %v4997_v0  ;;  %174 = vmatprep.subr.mxu0 %v130_v1  ;;  %v125_v6 = vld [vmem:[%s5873_s1 + $0x10] sm:$0xff]  ;;  %v5118_v7 = vld [vmem:[#allocation7 + $0x18] sm:$0xff]  ;;  %v124_v9 = vld [vmem:[%s5873_s1 + $0x8] sm:$0xff]  ;;  %v5184_v20 = vshrl.u32 %v133_v19, 7  ;;  %s5001_s25 = smov 96   ;;  %vm664_vm3 = vcmask 257026  }
  0x4c   :  { %175 = vmatpush1.msra.mxu0 %v129_v2  ;;  %v5120_v8 = vld [vmem:[#allocation7 + $0x10] sm:$0xff]  ;;  %4183 = vmatpush3.msra.mxu1 %v5118_v7  ;;  %v123_v10 = vld [vmem:[%s5873_s1] sm:$0xff]  ;;  %v5130_v11 = vld [vmem:[#allocation7 + $0x8] sm:$0xff]  ;;  %vm1113_vm4 = vcmask 261126   ;;  %vm890_vm5 = vcmask 259076   ;;  %vm670_vm6 = vcmask 521476  }
  0x4d   :  { %176 = vmatprep.subr.mxu0 %v128_v3  ;;  %4184 = vmatprep.subr.mxu1 %v4997_v0  ;;  %v121_v12 = vld [vmem:[#allocation4] sm:$0xff]  ;;  %v5133_v13 = vld [vmem:[#allocation9 + $0x18] sm:$0xff]  ;;  %v5141_v15 = vld [vmem:[#allocation7] sm:$0xff]  ;;  %v135_v21 = vsub.s32 0, %v5184_v20  ;;  %v139_v23 = vsub.s32 1, %v5184_v20  ;;  %vm447_vm7 = vcmask 523526  }
  0x4e   :  { %177 = vmatpush1.msra.mxu0 %v127_v4  ;;  %4185 = vmatpush3.msra.mxu1 %v5120_v8  ;;  %v5139_v14 = vld [vmem:[#allocation9 + $0x10] sm:$0xff]  ;;  %v122_v16 = vld [vmem:[#allocation4 + $0x8] sm:$0xff]  ;;  %v5147_v17 = vld [vmem:[#allocation9 + $0x8] sm:$0xff]  ;;  %vm896_vm8 = vcmask 519426   ;;  %vm1119_vm9 = vcmask 517376   ;;  %vm2037_vm10 = vcmask 523264  }
  0x4f   :  { %178 = vmatprep.subr.mxu0 %v126_v5  ;;  %4186 = vmatprep.subr.mxu1 %v4997_v0  ;;  %v5153_v18 = vld [vmem:[#allocation9] sm:$0xff]  ;;  %s5002_s5 = smov [#allocation15]   ;;  %vm3927_vm11 = vcmask 25600  }
  0x50   :  { %179 = vmatpush1.msra.mxu0 %v125_v6  ;;  %4187 = vmatpush3.msra.mxu1 %v5130_v11  ;;  %v131_v22 = vld [vmem:[%s5874_s2] sm:$0x3]  ;;  %s4999_s2 = smov 32   ;;  %s3935_s18 = sshll.u32 %s5002_s5, 4  ;;  %s3936_s18 = int_to_ptr.vmem [resolvable:$true] %s3935_s18 }
  0x51   :  { %180 = vmatprep.subr.mxu0 %v124_v9  ;;  %4188 = vmatprep.subr.mxu1 %v4997_v0  ;;  %v136_v24 = vrot.slane %v131_v22, %v135_v21  ;;  %v140_v25 = vrot.slane %v131_v22, %v139_v23  ;;  %s4957_s19 = scalar_lea.vmem %s3936_s18, 32  ;;  %p4962_p3 = scmp.lt.s32.totalorder %s3936_s18, %s3936_s18 }
  0x52   :  { %181 = vmatpush1.msra.mxu0 %v123_v10  ;;  %4189 = vmatpush3.msra.mxu1 %v5141_v15  ;;  %p4958_p2 = scmp.ne.s32.totalorder %s3936_s18, %s4957_s19  ;;  %p4963_p4 = scmp.lt.s32.totalorder %s4957_s19, %s4957_s19 }
  0x53   :  { %3947 = vmatmul.mubr.msk.f32.vlgmr.msra.gmra.mxu0 %vm143_vm1, %v121_v12  ;;  %4193 = vmatprep.subr.mxu0 %v4997_v0 }
  0x54   :  { %220 = vmatprep.mubr.f32.mxu0 %v4997_v0  ;;  %4194 = vmatpush3.msra.mxu0 %v5133_v13  ;;  %p4964_p5 = por %p4963_p4, %p4962_p3 }
  0x55   :  { %4195 = vmatprep.subr.mxu0 %v4997_v0  ;;  %4191 = vmatmul.mubr.f32.vlgmr.msra.gmra.mxu1 %v4997_v0 }
  0x56   :  { %4196 = vmatpush3.msra.mxu0 %v5139_v14  ;;  %4204 = vmatprep.subr.mxu1 %v4997_v0  ;;  %p4965_p6 = pnand %p4964_p5, %p4958_p2 }
  0x57   :  { %3948 = vmatmul.mubr.msk.f32.gmra.mxu0 %vm143_vm1, %v122_v16  ;;  %4197 = vmatprep.subr.mxu0 %v4997_v0 }
  0x58   :  { %4198 = vmatpush3.msra.mxu0 %v5147_v17  ;;  %4201 = vmatprep.mubr.msk.f32.mxu0 %vm4998_vm0, %v4997_v0 }
  0x59   :  { %4199 = vmatprep.subr.mxu0 %v4997_v0  ;;  %4205 = vmatpush3.msra.mxu1 %v5118_v7 }
  0x5a   :  { %4200 = vmatpush3.msra.mxu0 %v5153_v18  ;;  %4206 = vmatprep.subr.mxu1 %v4997_v0 }
  0x5b   :  { %4202 = vmatmul.mubr.f32.vlgmr.msra.gmra.mxu0 %v4997_v0  ;;  %4215 = vmatprep.subr.mxu0 %v4997_v0 }
  0x5c   :  { %4216 = vmatpush3.msra.mxu0 %v5133_v13  ;;  %4207 = vmatpush3.msra.mxu1 %v5120_v8 }
  0x5d   :  { %4217 = vmatprep.subr.mxu0 %v4997_v0  ;;  %4208 = vmatprep.subr.mxu1 %v4997_v0 }
  0x5e   :  { %4218 = vmatpush3.msra.mxu0 %v5139_v14  ;;  %4209 = vmatpush3.msra.mxu1 %v5130_v11 }
  0x5f   :  { %4219 = vmatprep.subr.mxu0 %v4997_v0  ;;  %4223 = vmatprep.mubr.msk.f32.mxu0 %vm4998_vm0, %v4997_v0 }
  0x60   :  { %4220 = vmatpush3.msra.mxu0 %v5147_v17  ;;  %4210 = vmatprep.subr.mxu1 %v4997_v0 }
  0x61   :  { %4221 = vmatprep.subr.mxu0 %v4997_v0  ;;  %4211 = vmatpush3.msra.mxu1 %v5141_v15 }
  0x62   :  { %4222 = vmatpush3.msra.mxu0 %v5153_v18  ;;  %4212 = vmatprep.mubr.msk.f32.mxu1 %vm4998_vm0, %v4997_v0 }
  0x63   :  { %4237 = vmatprep.subr.mxu0 %v4997_v0  ;;  %4226 = vmatprep.subr.mxu1 %v4997_v0 }
 0x113   :  { %v216_v26 = vpop.f32.mrf.mxu0 }
 0x114   :  { %v217_v27 = vadd.f32 %v216_v26, %v136_v24 }
 0x115   :  { %v218_v28 = vpop.f32.mrf.mxu0  ;;  %v309_v32 = vpop.f32.mrf.mxu1 }
 0x116   :  { %227 = vst [vmem:[#allocation3 + $0x10] sm:$0xff] %v217_v27  ;;  %v219_v29 = vadd.f32 %v218_v28, %v140_v25 }
 0x117   :  { %v222_v30 = vpop.f32.mrf.mxu0  ;;  %v4192_v35 = vpop.f32.mrf.mxu1 }
 0x118   :  { %228 = vst [vmem:[#allocation3] sm:$0xff] %v219_v29  ;;  %v223_v31 = vadd.f32 %v222_v30, %v136_v24 }
 0x119   :  { %v224_v33 = vpop.f32.mrf.mxu0 }
 0x11a   :  { %229 = vst [vmem:[#allocation3 + $0x18] sm:$0xff] %v223_v31  ;;  %v225_v34 = vadd.f32 %v224_v33, %v140_v25 }
 0x11b   :  { %v381_v36 = vpop.f32.mrf.mxu0 }
 0x11c   :  { %230 = vst [vmem:[#allocation3 + $0x8] sm:$0xff] %v225_v34  ;;  %v386_v38 = vrot.slane %v381_v36, 2 }
 0x11d   :  { %v4203_v37 = vpop.f32.mrf.mxu0  ;;  %v239_v39 = vld [vmem:[#allocation3 + $0x10] sm:$0x3]  ;;  %v449_v27 = vld [vmem:[#allocation3 + $0x10] sm:$0xc] }
 0x11e   :  { %v313_v42 = vadd.f32 %v309_v32, %v239_v39 }
 0x120   :  { %v3949_v46 = vmul.f32 -1.442695, %v313_v42 }
 0x123   :  { %v314_v40 = vld [vmem:[#allocation3 + $0x8] sm:$0xc0]  ;;  %v526_v19 = vld [vmem:[#allocation3 + $0x8] sm:$0x30] }
 0x124   :  { %v388_v41 = vadd.f32 %v386_v38, %v314_v40 }
 0x126   :  { %4569 = vtanh.f32 %v388_v41  ;;  %v3950_v45 = vmul.f32 -1.442695, %v388_v41 }
 0x127   :  { %4571 = vtanh.f32 %v313_v42 }
 0x128   :  { %4573 = vpow2.f32 %v3950_v45 }
 0x129   :  { %4575 = vpow2.f32 %v3949_v46 }
 0x133   :  { %v4570_v43 = vpop.eup %4569 }
 0x134   :  { %422 = vrot.lane.b32.xlu0 %v4570_v43, %s4999_s2  ;;  %v4572_v44 = vpop.eup %4571 }
 0x135   :  { %v4574_v47 = vpop.eup %4573 }
 0x136   :  { %v416_v48 = vadd.f32 1.0, %v4574_v47  ;;  %v4576_v49 = vpop.eup %4575 }
 0x137   :  { %v392_v50 = vadd.f32 1.0, %v4576_v49 }
 0x138   :  { %398 = vrot.lane.b32.xlu0 %v4572_v44, %s4999_s2  ;;  %4577 = vrcp.f32 %v416_v48 }
 0x139   :  { %4579 = vrcp.f32 %v392_v50 }
 0x145   :  { %v4578_v51 = vpop.eup %4577 }
 0x146   :  { %v4580_v54 = vpop.eup %4579  ;;  %v420_v57 = vmul.f32 0.0, %v4578_v51 }
 0x147   :  { %v396_v60 = vmul.f32 0.0, %v4580_v54 }
 0x1a6   :  { %v423_v52 = vpop.permute.xlu0 %422 }
 0x1a7   :  { %v425_v53 = vmul.f32 %v4578_v51, %v423_v52 }
 0x1a9   :  { %427 = vrot.lane.b32.xlu1 %v425_v53, %s4999_s2 }
 0x1aa   :  { %v399_v55 = vpop.permute.xlu0 %398 }
 0x1ab   :  { %v401_v56 = vmul.f32 %v4580_v54, %v399_v55 }
 0x1ad   :  { %403 = vrot.lane.b32.xlu1 %v401_v56, %s4999_s2 }
 0x21b   :  { %v428_v58 = vpop.permute.xlu1 %427 }
 0x21c   :  { %v5199_v59 = vadd.f32 %v428_v58, %v420_v57 }
 0x21e   :  { %4581 = vtanh.f32 %v5199_v59  ;;  %v641_v44 = vrot.slane %v5199_v59, 2 }
 0x21f   :  { %v404_v61 = vpop.permute.xlu1 %403 }
 0x220   :  { %v5202_v62 = vadd.f32 %v404_v61, %v396_v60 }
 0x222   :  { %4583 = vtanh.f32 %v5202_v62  ;;  %v614_v46 = vrot.slane %v5202_v62, 6 }
 0x22b   :  { %v4582_v63 = vpop.eup %4581 }
 0x22c   :  { %433 = vrot.lane.b32.xlu0 %v4582_v63, %s4999_s2 }
 0x22f   :  { %v4584_v1 = vpop.eup %4583 }
 0x230   :  { %409 = vrot.lane.b32.xlu1 %v4584_v1, %s4999_s2  ;;  %v752_v1 = vld [vmem:[#allocation3 + $0x8] sm:$0xc] }
 0x29e   :  { %v434_v2 = vpop.permute.xlu0 %433 }
 0x29f   :  { %v5207_v3 = vmul.f32 %v4578_v51, %v434_v2 }
 0x2a1   :  { %v527_v4 = vrot.slane %v5207_v3, 6 }
 0x2a2   :  { %v410_v5 = vpop.permute.xlu1 %409 }
 0x2a3   :  { %v412_v6 = vmul.f32 %v4580_v54, %v410_v5  ;;  %528 = vrot.lane.b32.xlu0 %v527_v4, %s5000_s24 }
 0x2a5   :  { %438 = vrot.lane.b32.xlu1 %v412_v6, %s5000_s24 }
 0x315   :  { %v529_v9 = vpop.permute.xlu0 %528 }
 0x316   :  { %4224 = vmatmul.mubr.msk.f32.vlgmr.msra.gmra.mxu0 %vm143_vm1, %v529_v9  ;;  %v672_v9 = vld [vmem:[#allocation3 + $0x10] sm:$0x30] }
 0x317   :  { %v439_v10 = vpop.permute.xlu1 %438  ;;  %4238 = vmatpush3.msra.mxu0 %v5133_v13  ;;  %4245 = vmatprep.mubr.msk.f32.mxu0 %vm4998_vm0, %v4997_v0 }
 0x318   :  { %442 = vst.msk [vmem:[#allocation2] sm:$0x3] %vm441_vm2, %v439_v10  ;;  %4213 = vmatmul.mubr.msk.f32.vlgmr.msra.gmra.mxu1 %vm143_vm1, %v439_v10  ;;  %4239 = vmatprep.subr.mxu0 %v4997_v0 }
 0x319   :  { %4227 = vmatpush3.msra.mxu1 %v5118_v7  ;;  %4240 = vmatpush3.msra.mxu0 %v5139_v14 }
 0x31a   :  { %4228 = vmatprep.subr.mxu1 %v4997_v0  ;;  %4241 = vmatprep.subr.mxu0 %v4997_v0 }
 0x31b   :  { %4229 = vmatpush3.msra.mxu1 %v5120_v8  ;;  %4242 = vmatpush3.msra.mxu0 %v5147_v17 }
 0x31c   :  { %4230 = vmatprep.subr.mxu1 %v4997_v0  ;;  %4243 = vmatprep.subr.mxu0 %v4997_v0 }
 0x31d   :  { %4244 = vmatpush3.msra.mxu0 %v5153_v18  ;;  %4231 = vmatpush3.msra.mxu1 %v5130_v11 }
 0x31e   :  { %4232 = vmatprep.subr.mxu1 %v4997_v0  ;;  %4234 = vmatprep.mubr.msk.f32.mxu1 %vm4998_vm0, %v4997_v0 }
 0x31f   :  { %4233 = vmatpush3.msra.mxu1 %v5141_v15  ;;  %4259 = vmatprep.subr.mxu0 %v4997_v0 }
 0x320   :  { %4248 = vmatprep.subr.mxu1 %v4997_v0 }
 0x3d6   :  { %v598_v12 = vpop.f32.mrf.mxu0 }
 0x3d7   :  { %v603_v16 = vrot.slane %v598_v12, 4 }
 0x3d8   :  { %v518_v22 = vpop.f32.mrf.mxu1  ;;  %v4225_v24 = vpop.f32.mrf.mxu0 }
 0x3d9   :  { %v605_v25 = vadd.f32 %v603_v16, %v526_v19  ;;  %v523_v26 = vrot.slane %v518_v22, 6 }
 0x3da   :  { %v4214_v28 = vpop.f32.mrf.mxu1 }
 0x3db   :  { %4585 = vtanh.f32 %v605_v25  ;;  %v525_v29 = vadd.f32 %v523_v26, %v449_v27  ;;  %v3954_v32 = vmul.f32 -1.442695, %v605_v25 }
 0x3dd   :  { %4587 = vtanh.f32 %v525_v29  ;;  %v3953_v33 = vmul.f32 -1.442695, %v525_v29 }
 0x3de   :  { %4589 = vpow2.f32 %v3954_v32 }
 0x3df   :  { %4591 = vpow2.f32 %v3953_v33 }
 0x3e8   :  { %v4586_v30 = vpop.eup %4585 }
 0x3e9   :  { %645 = vrot.lane.b32.xlu0 %v4586_v30, %s4999_s2 }
 0x3ea   :  { %v4588_v31 = vpop.eup %4587 }
 0x3eb   :  { %618 = vrot.lane.b32.xlu1 %v4588_v31, %s4999_s2  ;;  %v4590_v34 = vpop.eup %4589 }
 0x3ec   :  { %v4592_v35 = vpop.eup %4591  ;;  %v636_v36 = vadd.f32 1.0, %v4590_v34 }
 0x3ed   :  { %v609_v37 = vadd.f32 1.0, %v4592_v35 }
 0x3ee   :  { %4593 = vrcp.f32 %v636_v36 }
 0x3ef   :  { %4595 = vrcp.f32 %v609_v37 }
 0x3fb   :  { %v4594_v38 = vpop.eup %4593 }
 0x3fc   :  { %v4596_v41 = vpop.eup %4595  ;;  %v643_v45 = vmul.f32 %v4594_v38, %v641_v44 }
 0x3fd   :  { %v616_v49 = vmul.f32 %v4596_v41, %v614_v46 }
 0x45b   :  { %v646_v39 = vpop.permute.xlu0 %645 }
 0x45c   :  { %v648_v40 = vmul.f32 %v4594_v38, %v646_v39 }
 0x45d   :  { %v619_v42 = vpop.permute.xlu1 %618 }
 0x45e   :  { %650 = vrot.lane.b32.xlu0 %v648_v40, %s4999_s2  ;;  %v621_v43 = vmul.f32 %v4596_v41, %v619_v42 }
 0x460   :  { %623 = vrot.lane.b32.xlu1 %v621_v43, %s4999_s2 }
 0x4d0   :  { %v651_v47 = vpop.permute.xlu0 %650 }
 0x4d1   :  { %v5241_v48 = vadd.f32 %v651_v47, %v643_v45 }
 0x4d2   :  { %v624_v50 = vpop.permute.xlu1 %623 }
 0x4d3   :  { %4597 = vtanh.f32 %v5241_v48  ;;  %v5244_v51 = vadd.f32 %v624_v50, %v616_v49  ;;  %v867_v35 = vrot.slane %v5241_v48, 2 }
 0x4d5   :  { %4599 = vtanh.f32 %v5244_v51  ;;  %v840_v37 = vrot.slane %v5244_v51, 6 }
 0x4e0   :  { %v4598_v52 = vpop.eup %4597 }
 0x4e1   :  { %656 = vrot.lane.b32.xlu0 %v4598_v52, %s4999_s2 }
 0x4e2   :  { %v4600_v53 = vpop.eup %4599 }
 0x4e3   :  { %629 = vrot.lane.b32.xlu1 %v4600_v53, %s4999_s2  ;;  %v978_v53 = vld [vmem:[#allocation3 + $0x8] sm:$0x3] }
 0x553   :  { %v657_v54 = vpop.permute.xlu0 %656 }
 0x554   :  { %v5249_v55 = vmul.f32 %v4594_v38, %v657_v54 }
 0x555   :  { %v630_v57 = vpop.permute.xlu1 %629 }
 0x556   :  { %v753_v56 = vrot.slane %v5249_v55, 4  ;;  %v5252_v58 = vmul.f32 %v4596_v41, %v630_v57 }
 0x558   :  { %754 = vrot.lane.b32.xlu0 %v753_v56, %s5000_s24  ;;  %v673_v59 = vrot.slane %v5252_v58, 2 }
 0x55a   :  { %674 = vrot.lane.b32.xlu1 %v673_v59, %s5000_s24 }
 0x5ca   :  { %v755_v60 = vpop.permute.xlu0 %754 }
 0x5cb   :  { %4246 = vmatmul.mubr.msk.f32.vlgmr.msra.gmra.mxu0 %vm143_vm1, %v755_v60 }
 0x5cc   :  { %4260 = vmatpush3.msra.mxu0 %v5133_v13  ;;  %4267 = vmatprep.mubr.msk.f32.mxu0 %vm4998_vm0, %v4997_v0  ;;  %v675_v61 = vpop.permute.xlu1 %674 }
 0x5cd   :  { %4261 = vmatprep.subr.mxu0 %v4997_v0  ;;  %4235 = vmatmul.mubr.msk.f32.vlgmr.msra.gmra.mxu1 %vm143_vm1, %v675_v61  ;;  %v898_v61 = vld [vmem:[#allocation3 + $0x10] sm:$0xc0] }
 0x5ce   :  { %4262 = vmatpush3.msra.mxu0 %v5139_v14  ;;  %4249 = vmatpush3.msra.mxu1 %v5118_v7 }
 0x5cf   :  { %4263 = vmatprep.subr.mxu0 %v4997_v0  ;;  %4250 = vmatprep.subr.mxu1 %v4997_v0 }
 0x5d0   :  { %4264 = vmatpush3.msra.mxu0 %v5147_v17  ;;  %4251 = vmatpush3.msra.mxu1 %v5120_v8 }
 0x5d1   :  { %4265 = vmatprep.subr.mxu0 %v4997_v0  ;;  %4252 = vmatprep.subr.mxu1 %v4997_v0 }
 0x5d2   :  { %4266 = vmatpush3.msra.mxu0 %v5153_v18  ;;  %4253 = vmatpush3.msra.mxu1 %v5130_v11 }
 0x5d3   :  { %4256 = vmatprep.mubr.msk.f32.mxu1 %vm4998_vm0, %v4997_v0  ;;  %4254 = vmatprep.subr.mxu1 %v4997_v0 }
 0x5d4   :  { %4281 = vmatprep.subr.mxu0 %v4997_v0  ;;  %4255 = vmatpush3.msra.mxu1 %v5141_v15 }
 0x5d5   :  { %4270 = vmatprep.subr.mxu1 %v4997_v0 }
 0x68b   :  { %v824_v62 = vpop.f32.mrf.mxu0 }
 0x68c   :  { %v829_v63 = vrot.slane %v824_v62, 6 }
 0x68d   :  { %v4247_v2 = vpop.f32.mrf.mxu0  ;;  %v744_v5 = vpop.f32.mrf.mxu1 }
 0x68e   :  { %v831_v4 = vadd.f32 %v829_v63, %v752_v1  ;;  %v749_v6 = vrot.slane %v744_v5, 4 }
 0x68f   :  { %v4236_v10 = vpop.f32.mrf.mxu1 }
 0x690   :  { %4601 = vtanh.f32 %v831_v4  ;;  %v751_v12 = vadd.f32 %v749_v6, %v672_v9  ;;  %v3958_v22 = vmul.f32 -1.442695, %v831_v4 }
 0x692   :  { %4603 = vtanh.f32 %v751_v12  ;;  %v3957_v24 = vmul.f32 -1.442695, %v751_v12 }
 0x693   :  { %4605 = vpow2.f32 %v3958_v22 }
 0x694   :  { %4607 = vpow2.f32 %v3957_v24 }
 0x69d   :  { %v4602_v16 = vpop.eup %4601 }
 0x69e   :  { %871 = vrot.lane.b32.xlu0 %v4602_v16, %s4999_s2 }
 0x69f   :  { %v4604_v19 = vpop.eup %4603 }
 0x6a0   :  { %844 = vrot.lane.b32.xlu1 %v4604_v19, %s4999_s2  ;;  %v4606_v25 = vpop.eup %4605 }
 0x6a1   :  { %v4608_v26 = vpop.eup %4607  ;;  %v862_v27 = vadd.f32 1.0, %v4606_v25 }
 0x6a2   :  { %v835_v28 = vadd.f32 1.0, %v4608_v26 }
 0x6a3   :  { %4609 = vrcp.f32 %v862_v27 }
 0x6a4   :  { %4611 = vrcp.f32 %v835_v28 }
 0x6b0   :  { %v4610_v29 = vpop.eup %4609 }
 0x6b1   :  { %v4612_v32 = vpop.eup %4611  ;;  %v869_v36 = vmul.f32 %v4610_v29, %v867_v35 }
 0x6b2   :  { %v842_v40 = vmul.f32 %v4612_v32, %v840_v37 }
 0x710   :  { %v872_v30 = vpop.permute.xlu0 %871 }
 0x711   :  { %v874_v31 = vmul.f32 %v4610_v29, %v872_v30 }
 0x712   :  { %v845_v33 = vpop.permute.xlu1 %844 }
 0x713   :  { %876 = vrot.lane.b32.xlu0 %v874_v31, %s4999_s2  ;;  %v847_v34 = vmul.f32 %v4612_v32, %v845_v33 }
 0x715   :  { %849 = vrot.lane.b32.xlu1 %v847_v34, %s4999_s2 }
 0x785   :  { %v877_v38 = vpop.permute.xlu0 %876 }
 0x786   :  { %v5285_v39 = vadd.f32 %v877_v38, %v869_v36 }
 0x787   :  { %v850_v41 = vpop.permute.xlu1 %849 }
 0x788   :  { %4613 = vtanh.f32 %v5285_v39  ;;  %v5288_v42 = vadd.f32 %v850_v41, %v842_v40  ;;  %v1090_v27 = vrot.slane %v5285_v39, 2 }
 0x78a   :  { %4615 = vtanh.f32 %v5288_v42  ;;  %v1063_v31 = vrot.slane %v5288_v42, 6 }
 0x795   :  { %v4614_v43 = vpop.eup %4613 }
 0x796   :  { %882 = vrot.lane.b32.xlu0 %v4614_v43, %s4999_s2 }
 0x797   :  { %v4616_v44 = vpop.eup %4615 }
 0x798   :  { %855 = vrot.lane.b32.xlu1 %v4616_v44, %s4999_s2 }
 0x808   :  { %v883_v45 = vpop.permute.xlu0 %882 }
 0x809   :  { %v5293_v46 = vmul.f32 %v4610_v29, %v883_v45 }
 0x80a   :  { %v856_v48 = vpop.permute.xlu1 %855 }
 0x80b   :  { %v979_v47 = vrot.slane %v5293_v46, 2  ;;  %v5296_v49 = vmul.f32 %v4612_v32, %v856_v48 }
 0x80d   :  { %980 = vrot.lane.b32.xlu0 %v979_v47, %s5000_s24  ;;  %v899_v50 = vrot.slane %v5296_v49, 4  ;;  %v1198_v47 = vld [vmem:[#allocation3] sm:$0xc0] }
 0x80f   :  { %900 = vrot.lane.b32.xlu1 %v899_v50, %s5000_s24 }
 0x87f   :  { %v981_v51 = vpop.permute.xlu0 %980 }
 0x880   :  { %4268 = vmatmul.mubr.msk.f32.vlgmr.msra.gmra.mxu0 %vm143_vm1, %v981_v51  ;;  %v1121_v51 = vld [vmem:[#allocation3 + $0x18] sm:$0x3] }
 0x881   :  { %4282 = vmatpush3.msra.mxu0 %v5133_v13  ;;  %4289 = vmatprep.mubr.msk.f32.mxu0 %vm4998_vm0, %v4997_v0  ;;  %v901_v52 = vpop.permute.xlu1 %900 }
 0x882   :  { %4283 = vmatprep.subr.mxu0 %v4997_v0  ;;  %4257 = vmatmul.mubr.msk.f32.vlgmr.msra.gmra.mxu1 %vm143_vm1, %v901_v52 }
 0x883   :  { %4284 = vmatpush3.msra.mxu0 %v5139_v14  ;;  %4271 = vmatpush3.msra.mxu1 %v5118_v7 }
 0x884   :  { %4285 = vmatprep.subr.mxu0 %v4997_v0  ;;  %4272 = vmatprep.subr.mxu1 %v4997_v0 }
 0x885   :  { %4286 = vmatpush3.msra.mxu0 %v5147_v17  ;;  %4273 = vmatpush3.msra.mxu1 %v5120_v8 }
 0x886   :  { %4287 = vmatprep.subr.mxu0 %v4997_v0  ;;  %4274 = vmatprep.subr.mxu1 %v4997_v0 }
 0x887   :  { %4288 = vmatpush3.msra.mxu0 %v5153_v18  ;;  %4275 = vmatpush3.msra.mxu1 %v5130_v11 }
 0x888   :  { %4278 = vmatprep.mubr.msk.f32.mxu1 %vm4998_vm0, %v4997_v0  ;;  %4276 = vmatprep.subr.mxu1 %v4997_v0 }
 0x889   :  { %4303 = vmatprep.subr.mxu0 %v4997_v0  ;;  %4277 = vmatpush3.msra.mxu1 %v5141_v15 }
 0x88a   :  { %4292 = vmatprep.subr.mxu1 %v4997_v0 }
 0x940   :  { %v1050_v54 = vpop.f32.mrf.mxu0 }
 0x941   :  { %v1054_v56 = vadd.f32 %v1050_v54, %v978_v53 }
 0x942   :  { %v4269_v57 = vpop.f32.mrf.mxu0  ;;  %v970_v59 = vpop.f32.mrf.mxu1 }
 0x943   :  { %4617 = vtanh.f32 %v1054_v56  ;;  %v975_v60 = vrot.slane %v970_v59, 2  ;;  %v3962_v4 = vmul.f32 -1.442695, %v1054_v56 }
 0x944   :  { %v4258_v62 = vpop.f32.mrf.mxu1 }
 0x945   :  { %v977_v63 = vadd.f32 %v975_v60, %v898_v61 }
 0x947   :  { %4619 = vtanh.f32 %v977_v63  ;;  %v3961_v5 = vmul.f32 -1.442695, %v977_v63 }
 0x948   :  { %4621 = vpow2.f32 %v3962_v4 }
 0x949   :  { %4623 = vpow2.f32 %v3961_v5 }
 0x950   :  { %v4618_v1 = vpop.eup %4617 }
 0x951   :  { %1094 = vrot.lane.b32.xlu0 %v4618_v1, %s4999_s2 }
 0x954   :  { %v4620_v2 = vpop.eup %4619 }
 0x955   :  { %1067 = vrot.lane.b32.xlu1 %v4620_v2, %s4999_s2  ;;  %v4622_v6 = vpop.eup %4621 }
 0x956   :  { %v1085_v9 = vadd.f32 1.0, %v4622_v6  ;;  %v4624_v10 = vpop.eup %4623 }
 0x957   :  { %v1058_v12 = vadd.f32 1.0, %v4624_v10 }
 0x958   :  { %4625 = vrcp.f32 %v1085_v9 }
 0x959   :  { %4627 = vrcp.f32 %v1058_v12 }
 0x965   :  { %v4626_v16 = vpop.eup %4625 }
 0x966   :  { %v4628_v24 = vpop.eup %4627  ;;  %v1092_v28 = vmul.f32 %v4626_v16, %v1090_v27 }
 0x967   :  { %v1065_v32 = vmul.f32 %v4628_v24, %v1063_v31 }
 0x9c3   :  { %v1095_v19 = vpop.permute.xlu0 %1094 }
 0x9c4   :  { %v1097_v22 = vmul.f32 %v4626_v16, %v1095_v19 }
 0x9c6   :  { %1099 = vrot.lane.b32.xlu0 %v1097_v22, %s4999_s2 }
 0x9c7   :  { %v1068_v25 = vpop.permute.xlu1 %1067 }
 0x9c8   :  { %v1070_v26 = vmul.f32 %v4628_v24, %v1068_v25 }
 0x9ca   :  { %1072 = vrot.lane.b32.xlu1 %v1070_v26, %s4999_s2 }
 0xa38   :  { %v1100_v29 = vpop.permute.xlu0 %1099 }
 0xa39   :  { %v5328_v30 = vadd.f32 %v1100_v29, %v1092_v28 }
 0xa3b   :  { %4629 = vtanh.f32 %v5328_v30  ;;  %v1312_v12 = vrot.slane %v5328_v30, 2 }
 0xa3c   :  { %v1073_v33 = vpop.permute.xlu1 %1072 }
 0xa3d   :  { %v5332_v34 = vadd.f32 %v1073_v33, %v1065_v32 }
 0xa3f   :  { %4631 = vtanh.f32 %v5332_v34 }
 0xa48   :  { %v4630_v35 = vpop.eup %4629 }
 0xa49   :  { %1105 = vrot.lane.b32.xlu0 %v4630_v35, %s4999_s2 }
 0xa4c   :  { %v4632_v36 = vpop.eup %4631 }
 0xa4d   :  { %1078 = vrot.lane.b32.xlu1 %v4632_v36, %s4999_s2 }
 0xabb   :  { %v1106_v37 = vpop.permute.xlu0 %1105 }
 0xabc   :  { %v5337_v38 = vmul.f32 %v4626_v16, %v1106_v37  ;;  %v1418_v37 = vld [vmem:[#allocation3] sm:$0x30] }
 0xabe   :  { %1199 = vrot.lane.b32.xlu0 %v5337_v38, %s5000_s24 }
 0xabf   :  { %v1079_v39 = vpop.permute.xlu1 %1078 }
 0xac0   :  { %v5341_v40 = vmul.f32 %v4628_v24, %v1079_v39  ;;  %v1285_v24 = vrot.slane %v5332_v34, 6 }
 0xac2   :  { %v1122_v41 = vrot.slane %v5341_v40, 6 }
 0xac4   :  { %1123 = vrot.lane.b32.xlu1 %v1122_v41, %s5000_s24 }
 0xb30   :  { %v1200_v42 = vpop.permute.xlu0 %1199 }
 0xb31   :  { %4290 = vmatmul.mubr.msk.f32.vlgmr.msra.gmra.mxu0 %vm143_vm1, %v1200_v42 }
 0xb32   :  { %4304 = vmatpush3.msra.mxu0 %v5133_v13  ;;  %4311 = vmatprep.mubr.msk.f32.mxu0 %vm4998_vm0, %v4997_v0 }
 0xb33   :  { %4305 = vmatprep.subr.mxu0 %v4997_v0 }
 0xb34   :  { %4306 = vmatpush3.msra.mxu0 %v5139_v14 }
 0xb35   :  { %4307 = vmatprep.subr.mxu0 %v4997_v0 }
 0xb36   :  { %4308 = vmatpush3.msra.mxu0 %v5147_v17  ;;  %v1124_v43 = vpop.permute.xlu1 %1123 }
 0xb37   :  { %4309 = vmatprep.subr.mxu0 %v4997_v0  ;;  %4279 = vmatmul.mubr.msk.f32.vlgmr.msra.gmra.mxu1 %vm143_vm1, %v1124_v43 }
 0xb38   :  { %4310 = vmatpush3.msra.mxu0 %v5153_v18  ;;  %4293 = vmatpush3.msra.mxu1 %v5118_v7 }
 0xb39   :  { %4300 = vmatprep.mubr.msk.f32.mxu1 %vm4998_vm0, %v4997_v0  ;;  %4294 = vmatprep.subr.mxu1 %v4997_v0 }
 0xb3a   :  { %4325 = vmatprep.subr.mxu0 %v4997_v0  ;;  %4295 = vmatpush3.msra.mxu1 %v5120_v8 }
 0xb3b   :  { %4296 = vmatprep.subr.mxu1 %v4997_v0 }
 0xb3c   :  { %4297 = vmatpush3.msra.mxu1 %v5130_v11 }
 0xb3d   :  { %4298 = vmatprep.subr.mxu1 %v4997_v0 }
 0xb3e   :  { %4299 = vmatpush3.msra.mxu1 %v5141_v15 }
 0xb3f   :  { %4314 = vmatprep.subr.mxu1 %v4997_v0 }
 0xbf1   :  { %v1269_v44 = vpop.f32.mrf.mxu0 }
 0xbf2   :  { %v1274_v45 = vrot.slane %v1269_v44, 2 }
 0xbf3   :  { %v4291_v48 = vpop.f32.mrf.mxu0 }
 0xbf4   :  { %v1276_v50 = vadd.f32 %v1274_v45, %v1198_v47 }
 0xbf6   :  { %4633 = vtanh.f32 %v1276_v50  ;;  %v3966_v59 = vmul.f32 -1.442695, %v1276_v50 }
 0xbf7   :  { %v1193_v52 = vpop.f32.mrf.mxu1 }
 0xbf8   :  { %v1197_v53 = vadd.f32 %v1193_v52, %v1121_v51 }
 0xbf9   :  { %v4280_v54 = vpop.f32.mrf.mxu1 }
 0xbfa   :  { %4635 = vtanh.f32 %v1197_v53  ;;  %v3965_v60 = vmul.f32 -1.442695, %v1197_v53 }
 0xbfb   :  { %4637 = vpow2.f32 %v3966_v59 }
 0xbfc   :  { %4639 = vpow2.f32 %v3965_v60 }
 0xc03   :  { %v4634_v56 = vpop.eup %4633 }
 0xc04   :  { %1316 = vrot.lane.b32.xlu0 %v4634_v56, %s4999_s2 }
 0xc07   :  { %v4636_v57 = vpop.eup %4635 }
 0xc08   :  { %1289 = vrot.lane.b32.xlu1 %v4636_v57, %s4999_s2  ;;  %v4638_v61 = vpop.eup %4637 }
 0xc09   :  { %v1307_v62 = vadd.f32 1.0, %v4638_v61  ;;  %v4640_v63 = vpop.eup %4639 }
 0xc0a   :  { %v1280_v1 = vadd.f32 1.0, %v4640_v63 }
 0xc0b   :  { %4641 = vrcp.f32 %v1307_v62 }
 0xc0c   :  { %4643 = vrcp.f32 %v1280_v1 }
 0xc18   :  { %v4642_v2 = vpop.eup %4641 }
 0xc19   :  { %v4644_v6 = vpop.eup %4643  ;;  %v1314_v16 = vmul.f32 %v4642_v2, %v1312_v12 }
 0xc1a   :  { %v1287_v25 = vmul.f32 %v4644_v6, %v1285_v24 }
 0xc76   :  { %v1317_v4 = vpop.permute.xlu0 %1316 }
 0xc77   :  { %v1319_v5 = vmul.f32 %v4642_v2, %v1317_v4 }
 0xc79   :  { %1321 = vrot.lane.b32.xlu0 %v1319_v5, %s4999_s2 }
 0xc7a   :  { %v1290_v9 = vpop.permute.xlu1 %1289 }
 0xc7b   :  { %v1292_v10 = vmul.f32 %v4644_v6, %v1290_v9 }
 0xc7d   :  { %1294 = vrot.lane.b32.xlu1 %v1292_v10, %s4999_s2 }
 0xceb   :  { %v1322_v19 = vpop.permute.xlu0 %1321 }
 0xcec   :  { %v5372_v22 = vadd.f32 %v1322_v19, %v1314_v16 }
 0xcee   :  { %4645 = vtanh.f32 %v5372_v22  ;;  %v1533_v63 = vrot.slane %v5372_v22, 2 }
 0xcef   :  { %v1295_v26 = vpop.permute.xlu1 %1294 }
 0xcf0   :  { %v5376_v27 = vadd.f32 %v1295_v26, %v1287_v25 }
 0xcf2   :  { %4647 = vtanh.f32 %v5376_v27 }
 0xcfb   :  { %v4646_v28 = vpop.eup %4645 }
 0xcfc   :  { %1327 = vrot.lane.b32.xlu0 %v4646_v28, %s4999_s2 }
 0xcff   :  { %v4648_v29 = vpop.eup %4647 }
 0xd00   :  { %1300 = vrot.lane.b32.xlu1 %v4648_v29, %s4999_s2 }
 0xd6e   :  { %v1328_v30 = vpop.permute.xlu0 %1327 }
 0xd6f   :  { %v5381_v31 = vmul.f32 %v4642_v2, %v1328_v30  ;;  %v1506_v2 = vrot.slane %v5376_v27, 6  ;;  %v4825_v30 = vld [vmem:[#allocation7 + $0x18] sm:$0xff] }
 0xd71   :  { %v1419_v32 = vrot.slane %v5381_v31, 6 }
 0xd72   :  { %v1301_v33 = vpop.permute.xlu1 %1300 }
 0xd73   :  { %1420 = vrot.lane.b32.xlu0 %v1419_v32, %s5000_s24  ;;  %v1303_v34 = vmul.f32 %v4644_v6, %v1301_v33  ;;  %v4826_v32 = vld [vmem:[#allocation7 + $0x10] sm:$0xff] }
 0xd75   :  { %1332 = vrot.lane.b32.xlu1 %v1303_v34, %s5000_s24  ;;  %v1642_v34 = vld [vmem:[#allocation3] sm:$0xc] }
 0xde5   :  { %v1421_v35 = vpop.permute.xlu0 %1420 }
 0xde6   :  { %4312 = vmatmul.mubr.msk.f32.vlgmr.msra.gmra.mxu0 %vm143_vm1, %v1421_v35 }
 0xde7   :  { %4326 = vmatpush3.msra.mxu0 %v5133_v13  ;;  %4333 = vmatprep.mubr.msk.f32.mxu0 %vm4998_vm0, %v4997_v0  ;;  %v5390_v36 = vpop.permute.xlu1 %1332 }
 0xde8   :  { %4327 = vmatprep.subr.mxu0 %v4997_v0  ;;  %4301 = vmatmul.mubr.msk.f32.vlgmr.msra.gmra.mxu1 %vm143_vm1, %v5390_v36 }
 0xde9   :  { %4328 = vmatpush3.msra.mxu0 %v5139_v14  ;;  %4315 = vmatpush3.msra.mxu1 %v5118_v7 }
 0xdea   :  { %4329 = vmatprep.subr.mxu0 %v4997_v0  ;;  %4316 = vmatprep.subr.mxu1 %v4997_v0 }
 0xdeb   :  { %4330 = vmatpush3.msra.mxu0 %v5147_v17  ;;  %4317 = vmatpush3.msra.mxu1 %v5120_v8 }
 0xdec   :  { %4331 = vmatprep.subr.mxu0 %v4997_v0  ;;  %4318 = vmatprep.subr.mxu1 %v4997_v0 }
 0xded   :  { %4332 = vmatpush3.msra.mxu0 %v5153_v18  ;;  %4319 = vmatpush3.msra.mxu1 %v5130_v11  ;;  %v1341_v11 = vld [vmem:[#allocation3 + $0x18] sm:$0xc] }
 0xdee   :  { %4322 = vmatprep.mubr.msk.f32.mxu1 %vm4998_vm0, %v4997_v0  ;;  %4320 = vmatprep.subr.mxu1 %v4997_v0 }
 0xdef   :  { %4347 = vmatprep.subr.mxu0 %v4997_v0  ;;  %4321 = vmatpush3.msra.mxu1 %v5141_v15 }
 0xdf0   :  { %4336 = vmatprep.subr.mxu1 %v4997_v0 }
 0xea6   :  { %v1490_v7 = vpop.f32.mrf.mxu0 }
 0xea7   :  { %v1495_v8 = vrot.slane %v1490_v7, 4 }
 0xea8   :  { %v4313_v39 = vpop.f32.mrf.mxu0  ;;  %v1410_v42 = vpop.f32.mrf.mxu1 }
 0xea9   :  { %v1497_v41 = vadd.f32 %v1495_v8, %v1418_v37  ;;  %v1415_v43 = vrot.slane %v1410_v42, 6 }
 0xeaa   :  { %v4302_v44 = vpop.f32.mrf.mxu1 }
 0xeab   :  { %4649 = vtanh.f32 %v1497_v41  ;;  %v1417_v45 = vadd.f32 %v1415_v43, %v1341_v11  ;;  %v3970_v15 = vmul.f32 -1.442695, %v1497_v41 }
 0xead   :  { %4651 = vtanh.f32 %v1417_v45  ;;  %v3969_v50 = vmul.f32 -1.442695, %v1417_v45 }
 0xeae   :  { %4653 = vpow2.f32 %v3970_v15 }
 0xeaf   :  { %4655 = vpow2.f32 %v3969_v50 }
 0xeb8   :  { %v4650_v47 = vpop.eup %4649 }
 0xeb9   :  { %1537 = vrot.lane.b32.xlu0 %v4650_v47, %s4999_s2 }
 0xeba   :  { %v4652_v48 = vpop.eup %4651 }
 0xebb   :  { %1510 = vrot.lane.b32.xlu1 %v4652_v48, %s4999_s2  ;;  %v4654_v51 = vpop.eup %4653 }
 0xebc   :  { %v4656_v52 = vpop.eup %4655  ;;  %v1528_v53 = vadd.f32 1.0, %v4654_v51 }
 0xebd   :  { %v1501_v54 = vadd.f32 1.0, %v4656_v52 }
 0xebe   :  { %4657 = vrcp.f32 %v1528_v53 }
 0xebf   :  { %4659 = vrcp.f32 %v1501_v54 }
 0xecb   :  { %v4658_v56 = vpop.eup %4657 }
 0xecc   :  { %v4660_v60 = vpop.eup %4659  ;;  %v1535_v1 = vmul.f32 %v4658_v56, %v1533_v63 }
 0xecd   :  { %v1508_v6 = vmul.f32 %v4660_v60, %v1506_v2 }
 0xf2b   :  { %v1538_v57 = vpop.permute.xlu0 %1537 }
 0xf2c   :  { %v1540_v59 = vmul.f32 %v4658_v56, %v1538_v57 }
 0xf2d   :  { %v1511_v61 = vpop.permute.xlu1 %1510 }
 0xf2e   :  { %1542 = vrot.lane.b32.xlu0 %v1540_v59, %s4999_s2  ;;  %v1513_v62 = vmul.f32 %v4660_v60, %v1511_v61 }
 0xf30   :  { %1515 = vrot.lane.b32.xlu1 %v1513_v62, %s4999_s2 }
 0xfa0   :  { %v1543_v4 = vpop.permute.xlu0 %1542 }
 0xfa1   :  { %v5417_v5 = vadd.f32 %v1543_v4, %v1535_v1 }
 0xfa2   :  { %v1516_v9 = vpop.permute.xlu1 %1515 }
 0xfa3   :  { %4661 = vtanh.f32 %v5417_v5  ;;  %v5420_v10 = vadd.f32 %v1516_v9, %v1508_v6  ;;  %v1757_v57 = vrot.slane %v5417_v5, 2 }
 0xfa5   :  { %4663 = vtanh.f32 %v5420_v10 }
 0xfb0   :  { %v4662_v12 = vpop.eup %4661 }
 0xfb1   :  { %1548 = vrot.lane.b32.xlu0 %v4662_v12, %s4999_s2 }
 0xfb2   :  { %v4664_v16 = vpop.eup %4663 }
 0xfb3   :  { %1521 = vrot.lane.b32.xlu1 %v4664_v16, %s4999_s2 }
0x1023   :  { %v1549_v19 = vpop.permute.xlu0 %1548 }
0x1024   :  { %v5425_v22 = vmul.f32 %v4658_v56, %v1549_v19 }
0x1025   :  { %v1522_v25 = vpop.permute.xlu1 %1521 }
0x1026   :  { %v1643_v24 = vrot.slane %v5425_v22, 4  ;;  %v5428_v26 = vmul.f32 %v4660_v60, %v1522_v25  ;;  %v1730_v60 = vrot.slane %v5420_v10, 6 }
0x1028   :  { %1644 = vrot.lane.b32.xlu0 %v1643_v24, %s5000_s24  ;;  %v1563_v27 = vrot.slane %v5428_v26, 2 }
0x102a   :  { %1564 = vrot.lane.b32.xlu1 %v1563_v27, %s5000_s24  ;;  %v1866_v27 = vld [vmem:[#allocation3] sm:$0x3] }
0x109a   :  { %v1645_v28 = vpop.permute.xlu0 %1644 }
0x109b   :  { %4334 = vmatmul.mubr.msk.f32.vlgmr.msra.gmra.mxu0 %vm143_vm1, %v1645_v28 }
0x109c   :  { %4348 = vmatpush3.msra.mxu0 %v5133_v13  ;;  %4355 = vmatprep.mubr.msk.f32.mxu0 %vm4998_vm0, %v4997_v0  ;;  %v1565_v29 = vpop.permute.xlu1 %1564  ;;  %v4827_v13 = vld [vmem:[#allocation7 + $0x8] sm:$0xff] }
0x109d   :  { %4349 = vmatprep.subr.mxu0 %v4997_v0  ;;  %4323 = vmatmul.mubr.msk.f32.vlgmr.msra.gmra.mxu1 %vm143_vm1, %v1565_v29 }
0x109e   :  { %4350 = vmatpush3.msra.mxu0 %v5139_v14  ;;  %4337 = vmatpush3.msra.mxu1 %v4825_v30  ;;  %v4828_v14 = vld [vmem:[#allocation7] sm:$0xff] }
0x109f   :  { %4351 = vmatprep.subr.mxu0 %v4997_v0  ;;  %4338 = vmatprep.subr.mxu1 %v4997_v0 }
0x10a0   :  { %4352 = vmatpush3.msra.mxu0 %v5147_v17  ;;  %4339 = vmatpush3.msra.mxu1 %v4826_v32 }
0x10a1   :  { %4353 = vmatprep.subr.mxu0 %v4997_v0  ;;  %4340 = vmatprep.subr.mxu1 %v4997_v0 }
0x10a2   :  { %4354 = vmatpush3.msra.mxu0 %v5153_v18  ;;  %4341 = vmatpush3.msra.mxu1 %v4827_v13  ;;  %v1562_v18 = vld [vmem:[#allocation3 + $0x18] sm:$0x30] }
0x10a3   :  { %4344 = vmatprep.mubr.msk.f32.mxu1 %vm4998_vm0, %v4997_v0  ;;  %4342 = vmatprep.subr.mxu1 %v4997_v0 }
0x10a4   :  { %4358 = vmatprep.subr.mxu0 %v4997_v0  ;;  %4343 = vmatpush3.msra.mxu1 %v4828_v14  ;;  %v1786_v14 = vld [vmem:[#allocation3 + $0x18] sm:$0xc0] }
0x115b   :  { %v1714_v17 = vpop.f32.mrf.mxu0 }
0x115c   :  { %v1719_v33 = vrot.slane %v1714_v17, 6 }
0x115d   :  { %v4335_v35 = vpop.f32.mrf.mxu0  ;;  %v1634_v8 = vpop.f32.mrf.mxu1 }
0x115e   :  { %v1721_v7 = vadd.f32 %v1719_v33, %v1642_v34  ;;  %v1639_v37 = vrot.slane %v1634_v8, 4 }
0x115f   :  { %v4324_v39 = vpop.f32.mrf.mxu1 }
0x1160   :  { %4665 = vtanh.f32 %v1721_v7  ;;  %v1641_v41 = vadd.f32 %v1639_v37, %v1562_v18  ;;  %v3974_v11 = vmul.f32 -1.442695, %v1721_v7 }
0x1162   :  { %4667 = vtanh.f32 %v1641_v41  ;;  %v3973_v44 = vmul.f32 -1.442695, %v1641_v41 }
0x1163   :  { %4669 = vpow2.f32 %v3974_v11 }
0x1164   :  { %4671 = vpow2.f32 %v3973_v44 }
0x116d   :  { %v4666_v42 = vpop.eup %4665 }
0x116e   :  { %1761 = vrot.lane.b32.xlu0 %v4666_v42, %s4999_s2 }
0x116f   :  { %v4668_v43 = vpop.eup %4667 }
0x1170   :  { %1734 = vrot.lane.b32.xlu1 %v4668_v43, %s4999_s2  ;;  %v4670_v45 = vpop.eup %4669 }
0x1171   :  { %v4672_v47 = vpop.eup %4671  ;;  %v1752_v48 = vadd.f32 1.0, %v4670_v45 }
0x1172   :  { %v1725_v15 = vadd.f32 1.0, %v4672_v47 }
0x1173   :  { %4673 = vrcp.f32 %v1752_v48 }
0x1174   :  { %4675 = vrcp.f32 %v1725_v15 }
0x1180   :  { %v4674_v50 = vpop.eup %4673 }
0x1181   :  { %v4676_v53 = vpop.eup %4675  ;;  %v1759_v59 = vmul.f32 %v4674_v50, %v1757_v57 }
0x1182   :  { %v1732_v63 = vmul.f32 %v4676_v53, %v1730_v60  ;;  %v2024_v60 = vld [vmem:[#allocation10 + $0x78] sm:$0xff] }
0x1183   :  { %2060 = vmatprep.subr.mxu1 %v2024_v60 }
0x11e0   :  { %v1762_v51 = vpop.permute.xlu0 %1761 }
0x11e1   :  { %v1764_v52 = vmul.f32 %v4674_v50, %v1762_v51 }
0x11e2   :  { %v1735_v54 = vpop.permute.xlu1 %1734 }
0x11e3   :  { %1766 = vrot.lane.b32.xlu0 %v1764_v52, %s4999_s2  ;;  %v1737_v56 = vmul.f32 %v4676_v53, %v1735_v54 }
0x11e5   :  { %1739 = vrot.lane.b32.xlu1 %v1737_v56, %s4999_s2 }
0x1255   :  { %v1767_v61 = vpop.permute.xlu0 %1766 }
0x1256   :  { %v1769_v62 = vadd.f32 %v1767_v61, %v1759_v59  ;;  %v2022_v61 = vld [vmem:[#allocation10 + $0x68] sm:$0xff] }
0x1257   :  { %v1740_v1 = vpop.permute.xlu1 %1739 }
0x1258   :  { %4677 = vtanh.f32 %v1769_v62  ;;  %v1742_v2 = vadd.f32 %v1740_v1, %v1732_v63  ;;  %v1978_v48 = vrot.slane %v1769_v62, 2  ;;  %v2019_v62 = vld [vmem:[#allocation10 + $0x50] sm:$0xff]  ;;  %v2014_v1 = vld [vmem:[#allocation10 + $0x28] sm:$0xff] }
0x1259   :  { %v2015_v63 = vld [vmem:[#allocation10 + $0x30] sm:$0xff] }
0x125a   :  { %4679 = vtanh.f32 %v1742_v2  ;;  %v1951_v52 = vrot.slane %v1742_v2, 6  ;;  %v2011_v2 = vld [vmem:[#allocation10 + $0x10] sm:$0xff] }
0x1265   :  { %v4678_v4 = vpop.eup %4677 }
0x1266   :  { %1772 = vrot.lane.b32.xlu0 %v4678_v4, %s4999_s2  ;;  %v5507_v4 = vld [vmem:[#allocation12 + $0x18] sm:$0xff] }
0x1267   :  { %v4680_v6 = vpop.eup %4679 }
0x1268   :  { %1745 = vrot.lane.b32.xlu1 %v4680_v6, %s4999_s2  ;;  %v2010_v6 = vld [vmem:[#allocation10 + $0x8] sm:$0xff] }
0x12d8   :  { %v1773_v9 = vpop.permute.xlu0 %1772 }
0x12d9   :  { %v5458_v12 = vmul.f32 %v4674_v50, %v1773_v9  ;;  %v5514_v9 = vld [vmem:[#allocation12 + $0x8] sm:$0xff] }
0x12da   :  { %v1746_v16 = vpop.permute.xlu1 %1745 }
0x12db   :  { %v1867_v5 = vrot.slane %v5458_v12, 2  ;;  %v5461_v10 = vmul.f32 %v4676_v53, %v1746_v16 }
0x12dd   :  { %1868 = vrot.lane.b32.xlu0 %v1867_v5, %s5000_s24  ;;  %v1787_v19 = vrot.slane %v5461_v10, 4 }
0x12df   :  { %1788 = vrot.lane.b32.xlu1 %v1787_v19, %s5000_s24  ;;  %v5526_v19 = vld [vmem:[#allocation13 + $0x18] sm:$0xff] }
0x134f   :  { %v1869_v24 = vpop.permute.xlu0 %1868 }
0x1350   :  { %4356 = vmatmul.mubr.msk.f32.vlgmr.msra.gmra.mxu0 %vm143_vm1, %v1869_v24 }
0x1351   :  { %4366 = vmatprep.mubr.msk.f32.mxu0 %vm4998_vm0, %v4997_v0  ;;  %v1789_v25 = vpop.permute.xlu1 %1788  ;;  %4359 = vmatpush3.msra.mxu0 %v5507_v4 }
0x1352   :  { %4345 = vmatmul.mubr.msk.f32.vlgmr.msra.gmra.mxu1 %vm143_vm1, %v1789_v25  ;;  %4360 = vmatprep.subr.mxu0 %v4997_v0  ;;  %v5529_v25 = vld [vmem:[#allocation13 + $0x10] sm:$0xff] }
0x1353   :  { %2108 = vmatprep.mubr.f32.mxu1 %v4997_v0 }
0x1410   :  { %v1938_v28 = vpop.f32.mrf.mxu0 }
0x1411   :  { %v1942_v29 = vadd.f32 %v1938_v28, %v1866_v27 }
0x1412   :  { %v4357_v30 = vpop.f32.mrf.mxu0  ;;  %v1858_v32 = vpop.f32.mrf.mxu1 }
0x1413   :  { %4681 = vtanh.f32 %v1942_v29  ;;  %v1863_v13 = vrot.slane %v1858_v32, 2  ;;  %v3978_v7 = vmul.f32 -1.442695, %v1942_v29  ;;  %v5537_v29 = vld [vmem:[#allocation13 + $0x8] sm:$0xff]  ;;  %v5544_v32 = vld [vmem:[#allocation13] sm:$0xff] }
0x1414   :  { %v4346_v17 = vpop.f32.mrf.mxu1 }
0x1415   :  { %v1865_v33 = vadd.f32 %v1863_v13, %v1786_v14 }
0x1417   :  { %4683 = vtanh.f32 %v1865_v33  ;;  %v3977_v8 = vmul.f32 -1.442695, %v1865_v33 }
0x1418   :  { %4685 = vpow2.f32 %v3978_v7 }
0x1419   :  { %4687 = vpow2.f32 %v3977_v8 }
0x1420   :  { %v4682_v34 = vpop.eup %4681 }
0x1421   :  { %1982 = vrot.lane.b32.xlu0 %v4682_v34, %s4999_s2 }
0x1424   :  { %v4684_v35 = vpop.eup %4683 }
0x1425   :  { %1955 = vrot.lane.b32.xlu1 %v4684_v35, %s4999_s2  ;;  %v4686_v37 = vpop.eup %4685 }
0x1426   :  { %v1973_v18 = vadd.f32 1.0, %v4686_v37  ;;  %v4688_v39 = vpop.eup %4687 }
0x1427   :  { %v1946_v41 = vadd.f32 1.0, %v4688_v39 }
0x1428   :  { %4689 = vrcp.f32 %v1973_v18 }
0x1429   :  { %4691 = vrcp.f32 %v1946_v41 }
0x1435   :  { %v5473_v42 = vpop.eup %4689 }
0x1436   :  { %v5477_v44 = vpop.eup %4691  ;;  %v1980_v15 = vmul.f32 %v5473_v42, %v1978_v48 }
0x1437   :  { %v1953_v53 = vmul.f32 %v5477_v44, %v1951_v52 }
0x1493   :  { %v1983_v43 = vpop.permute.xlu0 %1982 }
0x1494   :  { %v1985_v11 = vmul.f32 %v5473_v42, %v1983_v43 }
0x1496   :  { %1987 = vrot.lane.b32.xlu0 %v1985_v11, %s4999_s2 }
0x1497   :  { %v1956_v45 = vpop.permute.xlu1 %1955 }
0x1498   :  { %v1958_v47 = vmul.f32 %v5477_v44, %v1956_v45  ;;  %v2025_v45 = vld [vmem:[%s5878_s6] sm:$0x3] }
0x1499   :  { %v2034_v48 = vrot.slane %v2025_v45, %v139_v23 }
0x149a   :  { %1960 = vrot.lane.b32.xlu1 %v1958_v47, %s4999_s2  ;;  %v2030_v47 = vrot.slane %v2025_v45, %v135_v21 }
0x1508   :  { %v1988_v50 = vpop.permute.xlu0 %1987 }
0x1509   :  { %v1990_v51 = vadd.f32 %v1988_v50, %v1980_v15 }
0x150b   :  { %4693 = vtanh.f32 %v1990_v51 }
0x150c   :  { %v1961_v54 = vpop.permute.xlu1 %1960 }
0x150d   :  { %v1963_v56 = vadd.f32 %v1961_v54, %v1953_v53 }
0x150f   :  { %4695 = vtanh.f32 %v1963_v56 }
0x1518   :  { %v4694_v57 = vpop.eup %4693 }
0x1519   :  { %1993 = vrot.lane.b32.xlu0 %v4694_v57, %s4999_s2 }
0x151c   :  { %v4696_v59 = vpop.eup %4695 }
0x151d   :  { %661 = vrot.lane.b32.xlu0 %v5252_v58, %s5000_s24  ;;  %1966 = vrot.lane.b32.xlu1 %v4696_v59, %s4999_s2  ;;  %v2023_v58 = vld [vmem:[#allocation10 + $0x70] sm:$0xff] }
0x151e   :  { %2061 = vmatpush1.msra.mxu1 %v2023_v58 }
0x151f   :  { %2062 = vmatprep.subr.mxu1 %v2022_v61 }
0x1521   :  { %1110 = vrot.lane.b32.xlu0 %v5341_v40, %s5000_s24  ;;  %887 = vrot.lane.b32.xlu1 %v5296_v49, %s5000_s24  ;;  %v2021_v40 = vld [vmem:[#allocation10 + $0x60] sm:$0xff]  ;;  %v2020_v49 = vld [vmem:[#allocation10 + $0x58] sm:$0xff] }
0x1522   :  { %2063 = vmatpush1.msra.mxu1 %v2021_v40 }
0x1523   :  { %2064 = vmatprep.subr.mxu1 %v2020_v49 }
0x1524   :  { %2065 = vmatpush1.msra.mxu1 %v2019_v62 }
0x1525   :  { %1558 = vrot.lane.b32.xlu0 %v5425_v22, %s5001_s25  ;;  %1337 = vrot.lane.b32.xlu1 %v5381_v31, %s5001_s25  ;;  %v2018_v31 = vld [vmem:[#allocation10 + $0x48] sm:$0xff]  ;;  %v2016_v22 = vld [vmem:[#allocation10 + $0x38] sm:$0xff] }
0x1526   :  { %2066 = vmatprep.subr.mxu1 %v2018_v31 }
0x1529   :  { %667 = vrot.lane.b32.xlu0 %v5249_v55, %s5001_s25  ;;  %1782 = vrot.lane.b32.xlu1 %v5458_v12, %s5001_s25  ;;  %v2017_v55 = vld [vmem:[#allocation10 + $0x40] sm:$0xff] }
0x152a   :  { %2067 = vmatpush1.msra.mxu1 %v2017_v55  ;;  %v5517_v12 = vld [vmem:[#allocation12] sm:$0xff] }
0x152b   :  { %2068 = vmatprep.subr.mxu1 %v2016_v22 }
0x152c   :  { %2069 = vmatpush1.msra.mxu1 %v2015_v63 }
0x152d   :  { %1116 = vrot.lane.b32.xlu0 %v5337_v38, %s5001_s25  ;;  %444 = vrot.lane.b32.xlu1 %v5207_v3, %s5001_s25  ;;  %v2013_v38 = vld [vmem:[#allocation10 + $0x20] sm:$0xff]  ;;  %v2012_v3 = vld [vmem:[#allocation10 + $0x18] sm:$0xff] }
0x152e   :  { %2070 = vmatprep.subr.mxu1 %v2014_v1 }
0x152f   :  { %2071 = vmatpush1.msra.mxu1 %v2013_v38 }
0x1530   :  { %2072 = vmatprep.subr.mxu1 %v2012_v3 }
0x1531   :  { %893 = vrot.lane.b32.xlu1 %v5293_v46, %s5001_s25  ;;  %2073 = vmatpush1.msra.mxu1 %v2011_v2  ;;  %v2009_v46 = vld [vmem:[#allocation10] sm:$0xff] }
0x1532   :  { %2074 = vmatprep.subr.mxu1 %v2010_v6 }
0x1533   :  { %2075 = vmatpush1.msra.mxu1 %v2009_v46 }
0x1534   :  { %4380 = vmatprep.subr.mxu1 %v4997_v0 }
0x1535   :  { %1553 = vrot.lane.b32.xlu1 %v5428_v26, %s5000_s24  ;;  %v5510_v26 = vld [vmem:[#allocation12 + $0x10] sm:$0xff] }
0x1536   :  { %4361 = vmatpush3.msra.mxu0 %v5510_v26 }
0x1537   :  { %4362 = vmatprep.subr.mxu0 %v4997_v0 }
0x1538   :  { %4363 = vmatpush3.msra.mxu0 %v5514_v9 }
0x1539   :  { %4364 = vmatprep.subr.mxu0 %v4997_v0 }
0x153a   :  { %4365 = vmatpush3.msra.mxu0 %v5517_v12 }
0x153b   :  { %4369 = vmatprep.subr.mxu0 %v4997_v0  ;;  %4367 = vmatmul.mubr.f32.vlgmr.msra.gmra.mxu0 %v4997_v0 }
0x153c   :  { %4370 = vmatpush3.msra.mxu0 %v5526_v19  ;;  %4377 = vmatprep.mubr.msk.f32.mxu0 %vm4998_vm0, %v4997_v0 }
0x153d   :  { %4371 = vmatprep.subr.mxu0 %v4997_v0 }
0x153e   :  { %4372 = vmatpush3.msra.mxu0 %v5529_v25 }
0x153f   :  { %4373 = vmatprep.subr.mxu0 %v4997_v0 }
0x1540   :  { %4374 = vmatpush3.msra.mxu0 %v5537_v29 }
0x1541   :  { %4375 = vmatprep.subr.mxu0 %v4997_v0 }
0x1542   :  { %4376 = vmatpush3.msra.mxu0 %v5544_v32 }
0x1543   :  { %4378 = vmatmul.mubr.f32.vlgmr.msra.gmra.mxu0 %v4997_v0  ;;  %4391 = vmatprep.subr.mxu0 %v4997_v0 }
0x1544   :  { %4392 = vmatpush3.msra.mxu0 %v5526_v19  ;;  %4399 = vmatprep.mubr.msk.f32.mxu0 %vm4998_vm0, %v4997_v0 }
0x1545   :  { %4393 = vmatprep.subr.mxu0 %v4997_v0 }
0x1546   :  { %4394 = vmatpush3.msra.mxu0 %v5529_v25 }
0x1547   :  { %4395 = vmatprep.subr.mxu0 %v4997_v0 }
0x1548   :  { %4396 = vmatpush3.msra.mxu0 %v5537_v29 }
0x1549   :  { %4397 = vmatprep.subr.mxu0 %v4997_v0 }
0x154a   :  { %4398 = vmatpush3.msra.mxu0 %v5544_v32 }
0x154b   :  { %4413 = vmatprep.subr.mxu0 %v4997_v0 }
0x158b   :  { %v1994_v5 = vpop.permute.xlu0 %1993 }
0x158c   :  { %v1996_v16 = vmul.f32 %v5473_v42, %v1994_v5 }
0x158e   :  { %2003 = vrot.lane.b32.xlu0 %v1996_v16, %s5001_s25 }
0x158f   :  { %v662_v24 = vpop.permute.xlu0 %661  ;;  %v1967_v27 = vpop.permute.xlu1 %1966 }
0x1590   :  { %665 = vst.msk [vmem:[#allocation2] sm:$0xc] %vm664_vm3, %v662_v24  ;;  %v1969_v28 = vmul.f32 %v5477_v44, %v1967_v27 }
0x1592   :  { %1777 = vrot.lane.b32.xlu0 %v5461_v10, %s5000_s24  ;;  %1998 = vrot.lane.b32.xlu1 %v1969_v28, %s5000_s24 }
0x1593   :  { %v1111_v30 = vpop.permute.xlu0 %1110  ;;  %v888_v13 = vpop.permute.xlu1 %887 }
0x1594   :  { %1114 = vst.msk [vmem:[#allocation2] sm:$0xc0] %vm1113_vm4, %v1111_v30 }
0x1595   :  { %891 = vst.msk [vmem:[#allocation2] sm:$0x30] %vm890_vm5, %v888_v13 }
0x1597   :  { %v1559_v10 = vpop.permute.xlu0 %1558  ;;  %v1338_v14 = vpop.permute.xlu1 %1337 }
0x1598   :  { %1561 = vst.msk [vmem:[#allocation2] sm:$0x30] %vm670_vm6, %v1559_v10 }
0x1599   :  { %1340 = vst.msk [vmem:[#allocation2] sm:$0xc0] %vm447_vm7, %v1338_v14 }
0x159b   :  { %v668_v17 = vpop.permute.xlu0 %667  ;;  %v1783_v33 = vpop.permute.xlu1 %1782 }
0x159c   :  { %671 = vst.msk [vmem:[#allocation2 + $0x8] sm:$0x30] %vm670_vm6, %v668_v17 }
0x159d   :  { %1785 = vst.msk [vmem:[#allocation2] sm:$0xc] %vm896_vm8, %v1783_v33 }
0x159f   :  { %v1117_v34 = vpop.permute.xlu0 %1116  ;;  %v445_v35 = vpop.permute.xlu1 %444 }
0x15a0   :  { %1120 = vst.msk [vmem:[#allocation2 + $0x8] sm:$0x3] %vm1119_vm9, %v1117_v34 }
0x15a1   :  { %1335 = vst.msk [vmem:[#allocation2 + $0x8] sm:$0x3] %vm441_vm2, %v5390_v36 }
0x15a2   :  { %448 = vst.msk [vmem:[#allocation2 + $0x8] sm:$0xc0] %vm447_vm7, %v445_v35 }
0x15a3   :  { %v894_v7 = vpop.permute.xlu1 %893 }
0x15a4   :  { %897 = vst.msk [vmem:[#allocation2 + $0x8] sm:$0xc] %vm896_vm8, %v894_v7 }
0x15a7   :  { %v1554_v8 = vpop.permute.xlu1 %1553 }
0x15a8   :  { %1556 = vst.msk [vmem:[#allocation2 + $0x8] sm:$0xc] %vm664_vm3, %v1554_v8 }
0x15fb   :  { %v2200_v42 = vpop.f32.mrf.mxu0 }
0x15fd   :  { %v4368_v43 = vpop.f32.mrf.mxu0 }
0x1600   :  { %v2004_v37 = vpop.permute.xlu0 %2003 }
0x1601   :  { %2006 = vst.msk [vmem:[#allocation2] sm:$0x3] %vm1119_vm9, %v2004_v37 }
0x1603   :  { %v2272_v11 = vpop.f32.mrf.mxu0 }
0x1604   :  { %v1778_v18 = vpop.permute.xlu0 %1777  ;;  %v1999_v39 = vpop.permute.xlu1 %1998  ;;  %v2277_v58 = vrot.slane %v2272_v11, 2 }
0x1605   :  { %1780 = vst.msk [vmem:[#allocation2 + $0x8] sm:$0x30] %vm890_vm5, %v1778_v18  ;;  %v4379_v44 = vpop.f32.mrf.mxu0 }
0x1606   :  { %2001 = vst.msk [vmem:[#allocation2 + $0x8] sm:$0xc0] %vm1113_vm4, %v1999_v39 }
0x1608   :  { %v2007_v41 = vld [vmem:[#allocation2] sm:$0xff] }
0x1609   :  { %3979 = vmatmul.mubr.msk.f32.vlgmr.msra.gmra.mxu1 %vm2037_vm10, %v2007_v41 }
0x160a   :  { %2114 = vmatprep.mubr.f32.mxu1 %v4997_v0  ;;  %4381 = vmatpush3.msra.mxu1 %v5507_v4 }
0x160b   :  { %4382 = vmatprep.subr.mxu1 %v4997_v0 }
0x160c   :  { %4383 = vmatpush3.msra.mxu1 %v5510_v26 }
0x160d   :  { %v2008_v36 = vld [vmem:[#allocation2 + $0x8] sm:$0xff]  ;;  %4384 = vmatprep.subr.mxu1 %v4997_v0 }
0x160e   :  { %3980 = vmatmul.mubr.msk.f32.gmra.mxu1 %vm2037_vm10, %v2008_v36 }
0x160f   :  { %4385 = vmatpush3.msra.mxu1 %v5514_v9  ;;  %4388 = vmatprep.mubr.msk.f32.mxu1 %vm4998_vm0, %v4997_v0 }
0x1610   :  { %4386 = vmatprep.subr.mxu1 %v4997_v0 }
0x1611   :  { %4387 = vmatpush3.msra.mxu1 %v5517_v12 }
0x1612   :  { %4402 = vmatprep.subr.mxu1 %v4997_v0 }
0x16c9   :  { %v2110_v15 = vpop.f32.mrf.mxu1 }
0x16ca   :  { %v2111_v50 = vadd.f32 %v2110_v15, %v2030_v47 }
0x16cb   :  { %v2112_v51 = vpop.f32.mrf.mxu1 }
0x16cc   :  { %2121 = vst [vmem:[#allocation3 + $0x10] sm:$0xff] %v2111_v50  ;;  %v2113_v52 = vadd.f32 %v2112_v51, %v2034_v48 }
0x16ce   :  { %2122 = vst [vmem:[#allocation3] sm:$0xff] %v2113_v52  ;;  %v2116_v53 = vpop.f32.mrf.mxu1 }
0x16cf   :  { %v2117_v54 = vadd.f32 %v2116_v53, %v2030_v47 }
0x16d0   :  { %v2118_v56 = vpop.f32.mrf.mxu1 }
0x16d1   :  { %2123 = vst [vmem:[#allocation3 + $0x18] sm:$0xff] %v2117_v54  ;;  %v2119_v57 = vadd.f32 %v2118_v56, %v2034_v48 }
0x16d3   :  { %v2133_v59 = vld [vmem:[#allocation3 + $0x10] sm:$0x3]  ;;  %2124 = vst [vmem:[#allocation3 + $0x8] sm:$0xff] %v2119_v57  ;;  %v2328_v18 = vld [vmem:[#allocation3 + $0x10] sm:$0xc] }
0x16d4   :  { %v2204_v60 = vadd.f32 %v2200_v42, %v2133_v59 }
0x16d6   :  { %4697 = vtanh.f32 %v2204_v60  ;;  %v3981_v40 = vmul.f32 -1.442695, %v2204_v60 }
0x16da   :  { %v2205_v21 = vld [vmem:[#allocation3 + $0x8] sm:$0xc0]  ;;  %v2408_v43 = vld [vmem:[#allocation3 + $0x8] sm:$0x30] }
0x16db   :  { %v2279_v61 = vadd.f32 %v2277_v58, %v2205_v21 }
0x16dd   :  { %4699 = vtanh.f32 %v2279_v61  ;;  %v3982_v49 = vmul.f32 -1.442695, %v2279_v61 }
0x16de   :  { %4701 = vpow2.f32 %v3981_v40 }
0x16df   :  { %4703 = vpow2.f32 %v3982_v49 }
0x16e3   :  { %v4698_v20 = vpop.eup %4697 }
0x16e4   :  { %2289 = vrot.lane.b32.xlu1 %v4698_v20, %s4999_s2 }
0x16ea   :  { %v4700_v23 = vpop.eup %4699 }
0x16eb   :  { %2313 = vrot.lane.b32.xlu0 %v4700_v23, %s4999_s2  ;;  %v4702_v62 = vpop.eup %4701 }
0x16ec   :  { %v2283_v31 = vadd.f32 1.0, %v4702_v62  ;;  %v4704_v55 = vpop.eup %4703 }
0x16ed   :  { %v2307_v22 = vadd.f32 1.0, %v4704_v55 }
0x16ee   :  { %4705 = vrcp.f32 %v2283_v31 }
0x16ef   :  { %4707 = vrcp.f32 %v2307_v22 }
0x16fb   :  { %v4706_v63 = vpop.eup %4705 }
0x16fc   :  { %v4708_v3 = vpop.eup %4707  ;;  %v2287_v46 = vmul.f32 0.0, %v4706_v63 }
0x16fd   :  { %v2311_v24 = vmul.f32 0.0, %v4708_v3 }
0x1756   :  { %v2290_v1 = vpop.permute.xlu1 %2289 }
0x1757   :  { %v2292_v38 = vmul.f32 %v4706_v63, %v2290_v1 }
0x1759   :  { %2294 = vrot.lane.b32.xlu1 %v2292_v38, %s4999_s2 }
0x175d   :  { %v2314_v2 = vpop.permute.xlu0 %2313 }
0x175e   :  { %v2316_v6 = vmul.f32 %v4708_v3, %v2314_v2 }
0x1760   :  { %2318 = vrot.lane.b32.xlu0 %v2316_v6, %s4999_s2 }
0x17cb   :  { %v2295_v5 = vpop.permute.xlu1 %2294 }
0x17cc   :  { %v5598_v16 = vadd.f32 %v2295_v5, %v2287_v46 }
0x17ce   :  { %4709 = vtanh.f32 %v5598_v16  ;;  %v2497_v21 = vrot.slane %v5598_v16, 6 }
0x17d2   :  { %v2319_v27 = vpop.permute.xlu0 %2318 }
0x17d3   :  { %v5601_v28 = vadd.f32 %v2319_v27, %v2311_v24  ;;  %v2543_v27 = vld [vmem:[#allocation3 + $0x10] sm:$0x30] }
0x17d5   :  { %4711 = vtanh.f32 %v5601_v28  ;;  %v2524_v40 = vrot.slane %v5601_v28, 2 }
0x17db   :  { %v4710_v30 = vpop.eup %4709 }
0x17dc   :  { %2300 = vrot.lane.b32.xlu1 %v4710_v30, %s4999_s2 }
0x17e2   :  { %v4712_v13 = vpop.eup %4711 }
0x17e3   :  { %2324 = vrot.lane.b32.xlu0 %v4712_v13, %s4999_s2 }
0x184e   :  { %v2301_v10 = vpop.permute.xlu1 %2300 }
0x184f   :  { %v2303_v14 = vmul.f32 %v4706_v63, %v2301_v10 }
0x1851   :  { %2330 = vrot.lane.b32.xlu0 %v2303_v14, %s5000_s24  ;;  %v2624_v14 = vld [vmem:[#allocation3 + $0x8] sm:$0xc] }
0x1855   :  { %v2325_v17 = vpop.permute.xlu0 %2324 }
0x1856   :  { %v2327_v33 = vmul.f32 %v4708_v3, %v2325_v17 }
0x1858   :  { %v2410_v34 = vrot.slane %v2327_v33, 6 }
0x185a   :  { %2411 = vrot.lane.b32.xlu1 %v2410_v34, %s5000_s24 }
0x18c3   :  { %v2331_v35 = vpop.permute.xlu0 %2330 }
0x18c4   :  { %4389 = vmatmul.mubr.msk.f32.vlgmr.msra.gmra.mxu1 %vm143_vm1, %v2331_v35 }
0x18c5   :  { %4403 = vmatpush3.msra.mxu1 %v5507_v4  ;;  %4410 = vmatprep.mubr.msk.f32.mxu1 %vm4998_vm0, %v4997_v0 }
0x18c6   :  { %4404 = vmatprep.subr.mxu1 %v4997_v0 }
0x18c7   :  { %4405 = vmatpush3.msra.mxu1 %v5510_v26 }
0x18c8   :  { %4406 = vmatprep.subr.mxu1 %v4997_v0 }
0x18c9   :  { %4407 = vmatpush3.msra.mxu1 %v5514_v9 }
0x18ca   :  { %4408 = vmatprep.subr.mxu1 %v4997_v0 }
0x18cb   :  { %4409 = vmatpush3.msra.mxu1 %v5517_v12 }
0x18cc   :  { %v2412_v7 = vpop.permute.xlu1 %2411  ;;  %4424 = vmatprep.subr.mxu1 %v4997_v0 }
0x18cd   :  { %4400 = vmatmul.mubr.msk.f32.vlgmr.msra.gmra.mxu0 %vm143_vm1, %v2412_v7 }
0x18ce   :  { %4414 = vmatpush3.msra.mxu0 %v5526_v19  ;;  %4421 = vmatprep.mubr.msk.f32.mxu0 %vm4998_vm0, %v4997_v0 }
0x18cf   :  { %4415 = vmatprep.subr.mxu0 %v4997_v0 }
0x18d0   :  { %4416 = vmatpush3.msra.mxu0 %v5529_v25 }
0x18d1   :  { %4417 = vmatprep.subr.mxu0 %v4997_v0 }
0x18d2   :  { %4418 = vmatpush3.msra.mxu0 %v5537_v29 }
0x18d3   :  { %4419 = vmatprep.subr.mxu0 %v4997_v0 }
0x18d4   :  { %4420 = vmatpush3.msra.mxu0 %v5544_v32 }
0x18d5   :  { %4435 = vmatprep.subr.mxu0 %v4997_v0 }
0x1984   :  { %v2400_v8 = vpop.f32.mrf.mxu1 }
0x1985   :  { %v2405_v37 = vrot.slane %v2400_v8, 6 }
0x1986   :  { %v4390_v39 = vpop.f32.mrf.mxu1 }
0x1987   :  { %v2407_v41 = vadd.f32 %v2405_v37, %v2328_v18 }
0x1989   :  { %4713 = vtanh.f32 %v2407_v41  ;;  %v3985_v48 = vmul.f32 -1.442695, %v2407_v41 }
0x198d   :  { %v2481_v36 = vpop.f32.mrf.mxu0 }
0x198e   :  { %v2486_v42 = vrot.slane %v2481_v36, 4 }
0x198f   :  { %v4401_v11 = vpop.f32.mrf.mxu0 }
0x1990   :  { %v2488_v44 = vadd.f32 %v2486_v42, %v2408_v43 }
0x1992   :  { %4715 = vtanh.f32 %v2488_v44  ;;  %v3986_v15 = vmul.f32 -1.442695, %v2488_v44 }
0x1993   :  { %4717 = vpow2.f32 %v3985_v48 }
0x1994   :  { %4719 = vpow2.f32 %v3986_v15 }
0x1996   :  { %v4714_v45 = vpop.eup %4713 }
0x1997   :  { %2501 = vrot.lane.b32.xlu0 %v4714_v45, %s4999_s2 }
0x199f   :  { %v4716_v47 = vpop.eup %4715 }
0x19a0   :  { %2528 = vrot.lane.b32.xlu1 %v4716_v47, %s4999_s2  ;;  %v4718_v50 = vpop.eup %4717 }
0x19a1   :  { %v2492_v51 = vadd.f32 1.0, %v4718_v50  ;;  %v4720_v52 = vpop.eup %4719 }
0x19a2   :  { %v2519_v53 = vadd.f32 1.0, %v4720_v52 }
0x19a3   :  { %4721 = vrcp.f32 %v2492_v51 }
0x19a4   :  { %4723 = vrcp.f32 %v2519_v53 }
0x19b0   :  { %v4722_v54 = vpop.eup %4721 }
0x19b1   :  { %v4724_v59 = vpop.eup %4723  ;;  %v2499_v61 = vmul.f32 %v4722_v54, %v2497_v21 }
0x19b2   :  { %v2526_v49 = vmul.f32 %v4724_v59, %v2524_v40 }
0x1a09   :  { %v2502_v56 = vpop.permute.xlu0 %2501 }
0x1a0a   :  { %v2504_v57 = vmul.f32 %v4722_v54, %v2502_v56 }
0x1a0c   :  { %2506 = vrot.lane.b32.xlu0 %v2504_v57, %s4999_s2 }
0x1a12   :  { %v2529_v60 = vpop.permute.xlu1 %2528 }
0x1a13   :  { %v2531_v58 = vmul.f32 %v4724_v59, %v2529_v60 }
0x1a15   :  { %2533 = vrot.lane.b32.xlu1 %v2531_v58, %s4999_s2 }
0x1a7e   :  { %v2507_v20 = vpop.permute.xlu0 %2506 }
0x1a7f   :  { %v5635_v23 = vadd.f32 %v2507_v20, %v2499_v61 }
0x1a81   :  { %4725 = vtanh.f32 %v5635_v23  ;;  %v2713_v47 = vrot.slane %v5635_v23, 6 }
0x1a87   :  { %v2534_v62 = vpop.permute.xlu1 %2533 }
0x1a88   :  { %v5639_v31 = vadd.f32 %v2534_v62, %v2526_v49 }
0x1a8a   :  { %4727 = vtanh.f32 %v5639_v31  ;;  %v2740_v51 = vrot.slane %v5639_v31, 2  ;;  %v2759_v31 = vld [vmem:[#allocation3 + $0x10] sm:$0xc0] }
0x1a8e   :  { %v4726_v55 = vpop.eup %4725 }
0x1a8f   :  { %2512 = vrot.lane.b32.xlu0 %v4726_v55, %s4999_s2 }
0x1a97   :  { %v4728_v22 = vpop.eup %4727 }
0x1a98   :  { %2539 = vrot.lane.b32.xlu1 %v4728_v22, %s4999_s2 }
0x1b01   :  { %v2513_v63 = vpop.permute.xlu0 %2512 }
0x1b02   :  { %v2515_v1 = vmul.f32 %v4722_v54, %v2513_v63  ;;  %v2840_v63 = vld [vmem:[#allocation3 + $0x8] sm:$0x3] }
0x1b04   :  { %v2545_v38 = vrot.slane %v2515_v1, 2 }
0x1b06   :  { %2546 = vrot.lane.b32.xlu0 %v2545_v38, %s5000_s24 }
0x1b0a   :  { %v2540_v3 = vpop.permute.xlu1 %2539 }
0x1b0b   :  { %v2542_v2 = vmul.f32 %v4724_v59, %v2540_v3 }
0x1b0d   :  { %v2626_v6 = vrot.slane %v2542_v2, 4 }
0x1b0f   :  { %2627 = vrot.lane.b32.xlu1 %v2626_v6, %s5000_s24 }
0x1b78   :  { %v2547_v46 = vpop.permute.xlu0 %2546 }
0x1b79   :  { %4411 = vmatmul.mubr.msk.f32.vlgmr.msra.gmra.mxu1 %vm143_vm1, %v2547_v46 }
0x1b7a   :  { %4425 = vmatpush3.msra.mxu1 %v5507_v4  ;;  %4432 = vmatprep.mubr.msk.f32.mxu1 %vm4998_vm0, %v4997_v0 }
0x1b7b   :  { %4426 = vmatprep.subr.mxu1 %v4997_v0 }
0x1b7c   :  { %4427 = vmatpush3.msra.mxu1 %v5510_v26 }
0x1b7d   :  { %4428 = vmatprep.subr.mxu1 %v4997_v0 }
0x1b7e   :  { %4429 = vmatpush3.msra.mxu1 %v5514_v9 }
0x1b7f   :  { %4430 = vmatprep.subr.mxu1 %v4997_v0 }
0x1b80   :  { %4431 = vmatpush3.msra.mxu1 %v5517_v12 }
0x1b81   :  { %v2628_v5 = vpop.permute.xlu1 %2627  ;;  %4446 = vmatprep.subr.mxu1 %v4997_v0 }
0x1b82   :  { %4422 = vmatmul.mubr.msk.f32.vlgmr.msra.gmra.mxu0 %vm143_vm1, %v2628_v5 }
0x1b83   :  { %4436 = vmatpush3.msra.mxu0 %v5526_v19  ;;  %4443 = vmatprep.mubr.msk.f32.mxu0 %vm4998_vm0, %v4997_v0 }
0x1b84   :  { %4437 = vmatprep.subr.mxu0 %v4997_v0 }
0x1b85   :  { %4438 = vmatpush3.msra.mxu0 %v5529_v25 }
0x1b86   :  { %4439 = vmatprep.subr.mxu0 %v4997_v0 }
0x1b87   :  { %4440 = vmatpush3.msra.mxu0 %v5537_v29 }
0x1b88   :  { %4441 = vmatprep.subr.mxu0 %v4997_v0 }
0x1b89   :  { %4442 = vmatpush3.msra.mxu0 %v5544_v32 }
0x1b8a   :  { %4457 = vmatprep.subr.mxu0 %v4997_v0 }
0x1c39   :  { %v2616_v16 = vpop.f32.mrf.mxu1 }
0x1c3a   :  { %v2621_v24 = vrot.slane %v2616_v16, 4 }
0x1c3b   :  { %v4412_v28 = vpop.f32.mrf.mxu1 }
0x1c3c   :  { %v2623_v30 = vadd.f32 %v2621_v24, %v2543_v27 }
0x1c3e   :  { %4729 = vtanh.f32 %v2623_v30  ;;  %v3989_v7 = vmul.f32 -1.442695, %v2623_v30 }
0x1c42   :  { %v2697_v13 = vpop.f32.mrf.mxu0 }
0x1c43   :  { %v2702_v10 = vrot.slane %v2697_v13, 6 }
0x1c44   :  { %v4423_v17 = vpop.f32.mrf.mxu0 }
0x1c45   :  { %v2704_v33 = vadd.f32 %v2702_v10, %v2624_v14 }
0x1c47   :  { %4731 = vtanh.f32 %v2704_v33  ;;  %v3990_v8 = vmul.f32 -1.442695, %v2704_v33 }
0x1c48   :  { %4733 = vpow2.f32 %v3989_v7 }
0x1c49   :  { %4735 = vpow2.f32 %v3990_v8 }
0x1c4b   :  { %v4730_v34 = vpop.eup %4729 }
0x1c4c   :  { %2717 = vrot.lane.b32.xlu0 %v4730_v34, %s4999_s2 }
0x1c54   :  { %v4732_v35 = vpop.eup %4731 }
0x1c55   :  { %2744 = vrot.lane.b32.xlu1 %v4732_v35, %s4999_s2  ;;  %v4734_v37 = vpop.eup %4733 }
0x1c56   :  { %v2708_v18 = vadd.f32 1.0, %v4734_v37  ;;  %v4736_v39 = vpop.eup %4735 }
0x1c57   :  { %v2735_v41 = vadd.f32 1.0, %v4736_v39 }
0x1c58   :  { %4737 = vrcp.f32 %v2708_v18 }
0x1c59   :  { %4739 = vrcp.f32 %v2735_v41 }
0x1c65   :  { %v4738_v36 = vpop.eup %4737 }
0x1c66   :  { %v4740_v11 = vpop.eup %4739  ;;  %v2715_v48 = vmul.f32 %v4738_v36, %v2713_v47 }
0x1c67   :  { %v2742_v52 = vmul.f32 %v4740_v11, %v2740_v51 }
0x1cbe   :  { %v2718_v42 = vpop.permute.xlu0 %2717 }
0x1cbf   :  { %v2720_v43 = vmul.f32 %v4738_v36, %v2718_v42 }
0x1cc1   :  { %2722 = vrot.lane.b32.xlu0 %v2720_v43, %s4999_s2 }
0x1cc7   :  { %v2745_v44 = vpop.permute.xlu1 %2744 }
0x1cc8   :  { %v2747_v45 = vmul.f32 %v4740_v11, %v2745_v44 }
0x1cca   :  { %2749 = vrot.lane.b32.xlu1 %v2747_v45, %s4999_s2 }
0x1d33   :  { %v2723_v15 = vpop.permute.xlu0 %2722 }
0x1d34   :  { %v5673_v50 = vadd.f32 %v2723_v15, %v2715_v48 }
0x1d36   :  { %4741 = vtanh.f32 %v5673_v50  ;;  %v2926_v34 = vrot.slane %v5673_v50, 6  ;;  %v2972_v50 = vld [vmem:[#allocation3 + $0x18] sm:$0x3] }
0x1d3c   :  { %v2750_v53 = vpop.permute.xlu1 %2749 }
0x1d3d   :  { %v5677_v54 = vadd.f32 %v2750_v53, %v2742_v52 }
0x1d3f   :  { %4743 = vtanh.f32 %v5677_v54  ;;  %v2953_v37 = vrot.slane %v5677_v54, 2 }
0x1d43   :  { %v4742_v56 = vpop.eup %4741 }
0x1d44   :  { %2728 = vrot.lane.b32.xlu0 %v4742_v56, %s4999_s2 }
0x1d4c   :  { %v4744_v57 = vpop.eup %4743 }
0x1d4d   :  { %2755 = vrot.lane.b32.xlu1 %v4744_v57, %s4999_s2  ;;  %v3050_v57 = vld [vmem:[#allocation3] sm:$0xc0] }
0x1db6   :  { %v2729_v59 = vpop.permute.xlu0 %2728 }
0x1db7   :  { %v2731_v60 = vmul.f32 %v4738_v36, %v2729_v59 }
0x1db9   :  { %v2761_v58 = vrot.slane %v2731_v60, 4 }
0x1dbb   :  { %2762 = vrot.lane.b32.xlu0 %v2761_v58, %s5000_s24 }
0x1dbf   :  { %v2756_v21 = vpop.permute.xlu1 %2755 }
0x1dc0   :  { %v2758_v61 = vmul.f32 %v4740_v11, %v2756_v21 }
0x1dc2   :  { %v2842_v20 = vrot.slane %v2758_v61, 2 }
0x1dc4   :  { %2843 = vrot.lane.b32.xlu1 %v2842_v20, %s5000_s24 }
0x1e2d   :  { %v2763_v23 = vpop.permute.xlu0 %2762 }
0x1e2e   :  { %4433 = vmatmul.mubr.msk.f32.vlgmr.msra.gmra.mxu1 %vm143_vm1, %v2763_v23 }
0x1e2f   :  { %4447 = vmatpush3.msra.mxu1 %v5507_v4  ;;  %4454 = vmatprep.mubr.msk.f32.mxu1 %vm4998_vm0, %v4997_v0 }
0x1e30   :  { %4448 = vmatprep.subr.mxu1 %v4997_v0 }
0x1e31   :  { %4449 = vmatpush3.msra.mxu1 %v5510_v26 }
0x1e32   :  { %4450 = vmatprep.subr.mxu1 %v4997_v0 }
0x1e33   :  { %4451 = vmatpush3.msra.mxu1 %v5514_v9 }
0x1e34   :  { %4452 = vmatprep.subr.mxu1 %v4997_v0 }
0x1e35   :  { %4453 = vmatpush3.msra.mxu1 %v5517_v12 }
0x1e36   :  { %v2844_v40 = vpop.permute.xlu1 %2843  ;;  %4468 = vmatprep.subr.mxu1 %v4997_v0 }
0x1e37   :  { %4444 = vmatmul.mubr.msk.f32.vlgmr.msra.gmra.mxu0 %vm143_vm1, %v2844_v40 }
0x1e38   :  { %4458 = vmatpush3.msra.mxu0 %v5526_v19  ;;  %4465 = vmatprep.mubr.msk.f32.mxu0 %vm4998_vm0, %v4997_v0 }
0x1e39   :  { %4459 = vmatprep.subr.mxu0 %v4997_v0 }
0x1e3a   :  { %4460 = vmatpush3.msra.mxu0 %v5529_v25 }
0x1e3b   :  { %4461 = vmatprep.subr.mxu0 %v4997_v0 }
0x1e3c   :  { %4462 = vmatpush3.msra.mxu0 %v5537_v29 }
0x1e3d   :  { %4463 = vmatprep.subr.mxu0 %v4997_v0 }
0x1e3e   :  { %4464 = vmatpush3.msra.mxu0 %v5544_v32 }
0x1e3f   :  { %4479 = vmatprep.subr.mxu0 %v4997_v0 }
0x1eee   :  { %v2832_v49 = vpop.f32.mrf.mxu1 }
0x1eef   :  { %v2837_v62 = vrot.slane %v2832_v49, 2 }
0x1ef0   :  { %v4434_v55 = vpop.f32.mrf.mxu1 }
0x1ef1   :  { %v2839_v22 = vadd.f32 %v2837_v62, %v2759_v31 }
0x1ef3   :  { %4745 = vtanh.f32 %v2839_v22  ;;  %v3993_v46 = vmul.f32 -1.442695, %v2839_v22 }
0x1ef7   :  { %v2913_v1 = vpop.f32.mrf.mxu0 }
0x1ef8   :  { %v2917_v38 = vadd.f32 %v2913_v1, %v2840_v63 }
0x1ef9   :  { %v4445_v3 = vpop.f32.mrf.mxu0 }
0x1efa   :  { %4747 = vtanh.f32 %v2917_v38  ;;  %v3994_v5 = vmul.f32 -1.442695, %v2917_v38 }
0x1efb   :  { %4749 = vpow2.f32 %v3993_v46 }
0x1efc   :  { %4751 = vpow2.f32 %v3994_v5 }
0x1f00   :  { %v4746_v2 = vpop.eup %4745 }
0x1f01   :  { %2930 = vrot.lane.b32.xlu1 %v4746_v2, %s4999_s2 }
0x1f07   :  { %v4748_v6 = vpop.eup %4747 }
0x1f08   :  { %2957 = vrot.lane.b32.xlu0 %v4748_v6, %s4999_s2  ;;  %v4750_v16 = vpop.eup %4749 }
0x1f09   :  { %v2921_v24 = vadd.f32 1.0, %v4750_v16  ;;  %v4752_v27 = vpop.eup %4751 }
0x1f0a   :  { %v2948_v28 = vadd.f32 1.0, %v4752_v27 }
0x1f0b   :  { %4753 = vrcp.f32 %v2921_v24 }
0x1f0c   :  { %4755 = vrcp.f32 %v2948_v28 }
0x1f18   :  { %v4754_v30 = vpop.eup %4753 }
0x1f19   :  { %v4756_v14 = vpop.eup %4755  ;;  %v2928_v35 = vmul.f32 %v4754_v30, %v2926_v34 }
0x1f1a   :  { %v2955_v18 = vmul.f32 %v4756_v14, %v2953_v37  ;;  %v3264_v37 = vld [vmem:[#allocation3] sm:$0x30] }
0x1f73   :  { %v2931_v13 = vpop.permute.xlu1 %2930 }
0x1f74   :  { %v2933_v10 = vmul.f32 %v4754_v30, %v2931_v13 }
0x1f76   :  { %2935 = vrot.lane.b32.xlu1 %v2933_v10, %s4999_s2 }
0x1f7a   :  { %v2958_v17 = vpop.permute.xlu0 %2957 }
0x1f7b   :  { %v2960_v33 = vmul.f32 %v4756_v14, %v2958_v17 }
0x1f7d   :  { %2962 = vrot.lane.b32.xlu0 %v2960_v33, %s4999_s2 }
0x1fe8   :  { %v2936_v7 = vpop.permute.xlu1 %2935 }
0x1fe9   :  { %v5711_v8 = vadd.f32 %v2936_v7, %v2928_v35 }
0x1feb   :  { %4757 = vtanh.f32 %v5711_v8  ;;  %v3138_v3 = vrot.slane %v5711_v8, 6 }
0x1fef   :  { %v2963_v39 = vpop.permute.xlu0 %2962 }
0x1ff0   :  { %v5715_v41 = vadd.f32 %v2963_v39, %v2955_v18 }
0x1ff2   :  { %4759 = vtanh.f32 %v5715_v41  ;;  %v3165_v5 = vrot.slane %v5715_v41, 2 }
0x1ff8   :  { %v4758_v36 = vpop.eup %4757 }
0x1ff9   :  { %2941 = vrot.lane.b32.xlu1 %v4758_v36, %s4999_s2 }
0x1fff   :  { %v4760_v42 = vpop.eup %4759 }
0x2000   :  { %2968 = vrot.lane.b32.xlu0 %v4760_v42, %s4999_s2 }
0x206b   :  { %v2942_v43 = vpop.permute.xlu1 %2941 }
0x206c   :  { %v2944_v11 = vmul.f32 %v4754_v30, %v2942_v43 }
0x206e   :  { %v2974_v44 = vrot.slane %v2944_v11, 6 }
0x2070   :  { %2975 = vrot.lane.b32.xlu1 %v2974_v44, %s5000_s24 }
0x2072   :  { %v2969_v45 = vpop.permute.xlu0 %2968 }
0x2073   :  { %v2971_v47 = vmul.f32 %v4756_v14, %v2969_v45 }
0x2075   :  { %3052 = vrot.lane.b32.xlu0 %v2971_v47, %s5000_s24 }
0x20e2   :  { %v2976_v48 = vpop.permute.xlu1 %2975 }
0x20e3   :  { %4455 = vmatmul.mubr.msk.f32.vlgmr.msra.gmra.mxu1 %vm143_vm1, %v2976_v48 }
0x20e4   :  { %4469 = vmatpush3.msra.mxu1 %v5507_v4  ;;  %4476 = vmatprep.mubr.msk.f32.mxu1 %vm4998_vm0, %v4997_v0 }
0x20e5   :  { %4470 = vmatprep.subr.mxu1 %v4997_v0 }
0x20e6   :  { %4471 = vmatpush3.msra.mxu1 %v5510_v26 }
0x20e7   :  { %v3053_v15 = vpop.permute.xlu0 %3052  ;;  %4472 = vmatprep.subr.mxu1 %v4997_v0 }
0x20e8   :  { %4466 = vmatmul.mubr.msk.f32.vlgmr.msra.gmra.mxu0 %vm143_vm1, %v3053_v15  ;;  %4473 = vmatpush3.msra.mxu1 %v5514_v9 }
0x20e9   :  { %4474 = vmatprep.subr.mxu1 %v4997_v0  ;;  %4480 = vmatpush3.msra.mxu0 %v5526_v19 }
0x20ea   :  { %4475 = vmatpush3.msra.mxu1 %v5517_v12  ;;  %4481 = vmatprep.subr.mxu0 %v4997_v0 }
0x20eb   :  { %4482 = vmatpush3.msra.mxu0 %v5529_v25  ;;  %4487 = vmatprep.mubr.msk.f32.mxu0 %vm4998_vm0, %v4997_v0 }
0x20ec   :  { %4483 = vmatprep.subr.mxu0 %v4997_v0  ;;  %4490 = vmatprep.subr.mxu1 %v4997_v0 }
0x20ed   :  { %4484 = vmatpush3.msra.mxu0 %v5537_v29 }
0x20ee   :  { %4485 = vmatprep.subr.mxu0 %v4997_v0 }
0x20ef   :  { %4486 = vmatpush3.msra.mxu0 %v5544_v32 }
0x20f0   :  { %4501 = vmatprep.subr.mxu0 %v4997_v0 }
0x21a3   :  { %v3045_v51 = vpop.f32.mrf.mxu1 }
0x21a4   :  { %v3049_v52 = vadd.f32 %v3045_v51, %v2972_v50 }
0x21a5   :  { %v4456_v53 = vpop.f32.mrf.mxu1 }
0x21a6   :  { %4761 = vtanh.f32 %v3049_v52  ;;  %v3997_v61 = vmul.f32 -1.442695, %v3049_v52 }
0x21a8   :  { %v3122_v54 = vpop.f32.mrf.mxu0 }
0x21a9   :  { %v3127_v56 = vrot.slane %v3122_v54, 2 }
0x21aa   :  { %v4467_v59 = vpop.f32.mrf.mxu0 }
0x21ab   :  { %v3129_v60 = vadd.f32 %v3127_v56, %v3050_v57 }
0x21ad   :  { %4763 = vtanh.f32 %v3129_v60  ;;  %v3998_v20 = vmul.f32 -1.442695, %v3129_v60 }
0x21ae   :  { %4765 = vpow2.f32 %v3997_v61 }
0x21af   :  { %4767 = vpow2.f32 %v3998_v20 }
0x21b3   :  { %v4762_v58 = vpop.eup %4761 }
0x21b4   :  { %3142 = vrot.lane.b32.xlu1 %v4762_v58, %s4999_s2 }
0x21ba   :  { %v4764_v21 = vpop.eup %4763 }
0x21bb   :  { %3169 = vrot.lane.b32.xlu0 %v4764_v21, %s4999_s2  ;;  %v4766_v23 = vpop.eup %4765 }
0x21bc   :  { %v3133_v40 = vadd.f32 1.0, %v4766_v23  ;;  %v4768_v49 = vpop.eup %4767 }
0x21bd   :  { %v3160_v62 = vadd.f32 1.0, %v4768_v49 }
0x21be   :  { %4769 = vrcp.f32 %v3133_v40 }
0x21bf   :  { %4771 = vrcp.f32 %v3160_v62 }
0x21cb   :  { %v4770_v31 = vpop.eup %4769 }
0x21cc   :  { %v4772_v63 = vpop.eup %4771  ;;  %v3140_v2 = vmul.f32 %v4770_v31, %v3138_v3  ;;  %v4833_v3 = vld [vmem:[#allocation13 + $0x18] sm:$0xff] }
0x21cd   :  { %v3167_v16 = vmul.f32 %v4772_v63, %v3165_v5 }
0x2226   :  { %v3143_v55 = vpop.permute.xlu1 %3142 }
0x2227   :  { %v3145_v22 = vmul.f32 %v4770_v31, %v3143_v55  ;;  %v4829_v55 = vld [vmem:[#allocation12 + $0x18] sm:$0xff] }
0x2229   :  { %3147 = vrot.lane.b32.xlu1 %v3145_v22, %s4999_s2  ;;  %v4830_v22 = vld [vmem:[#allocation12 + $0x10] sm:$0xff] }
0x222d   :  { %v3170_v1 = vpop.permute.xlu0 %3169 }
0x222e   :  { %v3172_v38 = vmul.f32 %v4772_v63, %v3170_v1  ;;  %v4832_v1 = vld [vmem:[#allocation12] sm:$0xff] }
0x2230   :  { %3174 = vrot.lane.b32.xlu0 %v3172_v38, %s4999_s2 }
0x229b   :  { %v3148_v6 = vpop.permute.xlu1 %3147 }
0x229c   :  { %v5749_v46 = vadd.f32 %v3148_v6, %v3140_v2  ;;  %v4834_v2 = vld [vmem:[#allocation13 + $0x10] sm:$0xff]  ;;  %v4835_v6 = vld [vmem:[#allocation13 + $0x8] sm:$0xff] }
0x229e   :  { %4773 = vtanh.f32 %v5749_v46  ;;  %v3353_v51 = vrot.slane %v5749_v46, 6  ;;  %v4836_v46 = vld [vmem:[#allocation13] sm:$0xff] }
0x22a2   :  { %v3175_v24 = vpop.permute.xlu0 %3174 }
0x22a3   :  { %v5753_v27 = vadd.f32 %v3175_v24, %v3167_v16  ;;  %v3399_v24 = vld [vmem:[#allocation3 + $0x18] sm:$0x30] }
0x22a5   :  { %4775 = vtanh.f32 %v5753_v27  ;;  %v3380_v56 = vrot.slane %v5753_v27, 2 }
0x22ab   :  { %v4774_v28 = vpop.eup %4773 }
0x22ac   :  { %3153 = vrot.lane.b32.xlu1 %v4774_v28, %s4999_s2 }
0x22b2   :  { %v4776_v30 = vpop.eup %4775 }
0x22b3   :  { %3180 = vrot.lane.b32.xlu0 %v4776_v30, %s4999_s2 }
0x231e   :  { %v3154_v13 = vpop.permute.xlu1 %3153 }
0x231f   :  { %v3156_v10 = vmul.f32 %v4770_v31, %v3154_v13 }
0x2321   :  { %3186 = vrot.lane.b32.xlu0 %v3156_v10, %s5000_s24  ;;  %v3480_v10 = vld [vmem:[#allocation3] sm:$0xc] }
0x2325   :  { %v3181_v14 = vpop.permute.xlu0 %3180 }
0x2326   :  { %v3183_v17 = vmul.f32 %v4772_v63, %v3181_v14  ;;  %v4831_v63 = vld [vmem:[#allocation12 + $0x8] sm:$0xff] }
0x2328   :  { %v3266_v33 = vrot.slane %v3183_v17, 6 }
0x232a   :  { %3267 = vrot.lane.b32.xlu1 %v3266_v33, %s5000_s24 }
0x2393   :  { %v3187_v34 = vpop.permute.xlu0 %3186 }
0x2394   :  { %4477 = vmatmul.mubr.msk.f32.vlgmr.msra.gmra.mxu1 %vm143_vm1, %v3187_v34 }
0x2395   :  { %4491 = vmatpush3.msra.mxu1 %v5507_v4  ;;  %4498 = vmatprep.mubr.msk.f32.mxu1 %vm4998_vm0, %v4997_v0 }
0x2396   :  { %4492 = vmatprep.subr.mxu1 %v4997_v0 }
0x2397   :  { %4493 = vmatpush3.msra.mxu1 %v5510_v26 }
0x2398   :  { %4494 = vmatprep.subr.mxu1 %v4997_v0 }
0x2399   :  { %4495 = vmatpush3.msra.mxu1 %v5514_v9  ;;  %v3184_v9 = vld [vmem:[#allocation3 + $0x18] sm:$0xc] }
0x239a   :  { %4496 = vmatprep.subr.mxu1 %v4997_v0 }
0x239b   :  { %4497 = vmatpush3.msra.mxu1 %v5517_v12 }
0x239c   :  { %v3268_v35 = vpop.permute.xlu1 %3267  ;;  %4512 = vmatprep.subr.mxu1 %v4997_v0 }
0x239d   :  { %4488 = vmatmul.mubr.msk.f32.vlgmr.msra.gmra.mxu0 %vm143_vm1, %v3268_v35 }
0x239e   :  { %4502 = vmatpush3.msra.mxu0 %v5526_v19  ;;  %4509 = vmatprep.mubr.msk.f32.mxu0 %vm4998_vm0, %v4997_v0 }
0x239f   :  { %4503 = vmatprep.subr.mxu0 %v4997_v0 }
0x23a0   :  { %4504 = vmatpush3.msra.mxu0 %v5529_v25 }
0x23a1   :  { %4505 = vmatprep.subr.mxu0 %v4997_v0 }
0x23a2   :  { %4506 = vmatpush3.msra.mxu0 %v5537_v29 }
0x23a3   :  { %4507 = vmatprep.subr.mxu0 %v4997_v0 }
0x23a4   :  { %4508 = vmatpush3.msra.mxu0 %v5544_v32 }
0x23a5   :  { %4523 = vmatprep.subr.mxu0 %v4997_v0 }
0x2454   :  { %v3256_v4 = vpop.f32.mrf.mxu1 }
0x2455   :  { %v3261_v26 = vrot.slane %v3256_v4, 6 }
0x2456   :  { %v4478_v12 = vpop.f32.mrf.mxu1 }
0x2457   :  { %v3263_v19 = vadd.f32 %v3261_v26, %v3184_v9 }
0x2459   :  { %4777 = vtanh.f32 %v3263_v19  ;;  %v4001_v32 = vmul.f32 -1.442695, %v3263_v19 }
0x245d   :  { %v3337_v7 = vpop.f32.mrf.mxu0 }
0x245e   :  { %v3342_v8 = vrot.slane %v3337_v7, 4 }
0x245f   :  { %v4489_v25 = vpop.f32.mrf.mxu0 }
0x2460   :  { %v3344_v18 = vadd.f32 %v3342_v8, %v3264_v37 }
0x2462   :  { %4779 = vtanh.f32 %v3344_v18  ;;  %v4002_v41 = vmul.f32 -1.442695, %v3344_v18 }
0x2463   :  { %4781 = vpow2.f32 %v4001_v32 }
0x2464   :  { %4783 = vpow2.f32 %v4002_v41 }
0x2466   :  { %v4778_v39 = vpop.eup %4777 }
0x2467   :  { %3357 = vrot.lane.b32.xlu0 %v4778_v39, %s4999_s2 }
0x246f   :  { %v4780_v29 = vpop.eup %4779 }
0x2470   :  { %3384 = vrot.lane.b32.xlu1 %v4780_v29, %s4999_s2  ;;  %v4782_v36 = vpop.eup %4781 }
0x2471   :  { %v3348_v42 = vadd.f32 1.0, %v4782_v36  ;;  %v4784_v43 = vpop.eup %4783 }
0x2472   :  { %v3375_v11 = vadd.f32 1.0, %v4784_v43 }
0x2473   :  { %4785 = vrcp.f32 %v3348_v42 }
0x2474   :  { %4787 = vrcp.f32 %v3375_v11 }
0x2480   :  { %v4786_v44 = vpop.eup %4785 }
0x2481   :  { %v4788_v48 = vpop.eup %4787  ;;  %v3355_v52 = vmul.f32 %v4786_v44, %v3353_v51 }
0x2482   :  { %v3382_v57 = vmul.f32 %v4788_v48, %v3380_v56 }
0x24d9   :  { %v3358_v45 = vpop.permute.xlu0 %3357 }
0x24da   :  { %v3360_v47 = vmul.f32 %v4786_v44, %v3358_v45 }
0x24dc   :  { %3362 = vrot.lane.b32.xlu0 %v3360_v47, %s4999_s2 }
0x24e2   :  { %v3385_v15 = vpop.permute.xlu1 %3384 }
0x24e3   :  { %v3387_v50 = vmul.f32 %v4788_v48, %v3385_v15 }
0x24e5   :  { %3389 = vrot.lane.b32.xlu1 %v3387_v50, %s4999_s2 }
0x254e   :  { %v3363_v53 = vpop.permute.xlu0 %3362 }
0x254f   :  { %v5787_v54 = vadd.f32 %v3363_v53, %v3355_v52 }
0x2551   :  { %4789 = vtanh.f32 %v5787_v54  ;;  %v3569_v29 = vrot.slane %v5787_v54, 6 }
0x2557   :  { %v3390_v59 = vpop.permute.xlu1 %3389 }
0x2558   :  { %v5791_v60 = vadd.f32 %v3390_v59, %v3382_v57 }
0x255a   :  { %4791 = vtanh.f32 %v5791_v60  ;;  %v3596_v42 = vrot.slane %v5791_v60, 2  ;;  %v3615_v60 = vld [vmem:[#allocation3 + $0x18] sm:$0xc0] }
0x255e   :  { %v4790_v58 = vpop.eup %4789 }
0x255f   :  { %3368 = vrot.lane.b32.xlu0 %v4790_v58, %s4999_s2 }
0x2567   :  { %v4792_v21 = vpop.eup %4791 }
0x2568   :  { %3395 = vrot.lane.b32.xlu1 %v4792_v21, %s4999_s2 }
0x25d1   :  { %v3369_v61 = vpop.permute.xlu0 %3368 }
0x25d2   :  { %v3371_v20 = vmul.f32 %v4786_v44, %v3369_v61  ;;  %v3696_v61 = vld [vmem:[#allocation3] sm:$0x3] }
0x25d4   :  { %v3401_v23 = vrot.slane %v3371_v20, 2 }
0x25d6   :  { %3402 = vrot.lane.b32.xlu0 %v3401_v23, %s5000_s24 }
0x25da   :  { %v3396_v40 = vpop.permute.xlu1 %3395 }
0x25db   :  { %v3398_v49 = vmul.f32 %v4788_v48, %v3396_v40 }
0x25dd   :  { %v3482_v62 = vrot.slane %v3398_v49, 4 }
0x25df   :  { %3483 = vrot.lane.b32.xlu1 %v3482_v62, %s5000_s24 }
0x2648   :  { %v3403_v31 = vpop.permute.xlu0 %3402 }
0x2649   :  { %4499 = vmatmul.mubr.msk.f32.vlgmr.msra.gmra.mxu1 %vm143_vm1, %v3403_v31 }
0x264a   :  { %4513 = vmatpush3.msra.mxu1 %v4829_v55  ;;  %4520 = vmatprep.mubr.msk.f32.mxu1 %vm4998_vm0, %v4997_v0 }
0x264b   :  { %4514 = vmatprep.subr.mxu1 %v4997_v0 }
0x264c   :  { %4515 = vmatpush3.msra.mxu1 %v4830_v22 }
0x264d   :  { %4516 = vmatprep.subr.mxu1 %v4997_v0 }
0x264e   :  { %4517 = vmatpush3.msra.mxu1 %v4831_v63 }
0x264f   :  { %4518 = vmatprep.subr.mxu1 %v4997_v0 }
0x2650   :  { %4519 = vmatpush3.msra.mxu1 %v4832_v1 }
0x2651   :  { %v3484_v38 = vpop.permute.xlu1 %3483  ;;  %4534 = vmatprep.subr.mxu1 %v4997_v0 }
0x2652   :  { %4510 = vmatmul.mubr.msk.f32.vlgmr.msra.gmra.mxu0 %vm143_vm1, %v3484_v38 }
0x2653   :  { %4524 = vmatpush3.msra.mxu0 %v4833_v3  ;;  %4531 = vmatprep.mubr.msk.f32.mxu0 %vm4998_vm0, %v4997_v0 }
0x2654   :  { %4525 = vmatprep.subr.mxu0 %v4997_v0 }
0x2655   :  { %4526 = vmatpush3.msra.mxu0 %v4834_v2 }
0x2656   :  { %4527 = vmatprep.subr.mxu0 %v4997_v0 }
0x2657   :  { %4528 = vmatpush3.msra.mxu0 %v4835_v6 }
0x2658   :  { %4529 = vmatprep.subr.mxu0 %v4997_v0 }
0x2659   :  { %4530 = vmatpush3.msra.mxu0 %v4836_v46 }
0x2709   :  { %v3472_v5 = vpop.f32.mrf.mxu1 }
0x270a   :  { %v3477_v16 = vrot.slane %v3472_v5, 4 }
0x270b   :  { %v4500_v27 = vpop.f32.mrf.mxu1 }
0x270c   :  { %v3479_v28 = vadd.f32 %v3477_v16, %v3399_v24 }
0x270e   :  { %4793 = vtanh.f32 %v3479_v28  ;;  %v4005_v35 = vmul.f32 -1.442695, %v3479_v28 }
0x2712   :  { %v3553_v30 = vpop.f32.mrf.mxu0 }
0x2713   :  { %v3558_v13 = vrot.slane %v3553_v30, 6 }
0x2714   :  { %v4511_v14 = vpop.f32.mrf.mxu0 }
0x2715   :  { %v3560_v17 = vadd.f32 %v3558_v13, %v3480_v10 }
0x2717   :  { %4795 = vtanh.f32 %v3560_v17  ;;  %v4006_v4 = vmul.f32 -1.442695, %v3560_v17 }
0x2718   :  { %4797 = vpow2.f32 %v4005_v35 }
0x2719   :  { %4799 = vpow2.f32 %v4006_v4 }
0x271b   :  { %v4794_v33 = vpop.eup %4793 }
0x271c   :  { %3573 = vrot.lane.b32.xlu0 %v4794_v33, %s4999_s2  ;;  %v3845_v33 = vld [vmem:[%s5881_s9 + $0x38] sm:$0xff] }
0x2724   :  { %v4796_v34 = vpop.eup %4795 }
0x2725   :  { %3600 = vrot.lane.b32.xlu1 %v4796_v34, %s4999_s2  ;;  %v4798_v26 = vpop.eup %4797  ;;  %v3844_v34 = vld [vmem:[%s5881_s9 + $0x30] sm:$0xff] }
0x2726   :  { %v3564_v9 = vadd.f32 1.0, %v4798_v26  ;;  %v4800_v12 = vpop.eup %4799  ;;  %v3843_v26 = vld [vmem:[%s5881_s9 + $0x28] sm:$0xff] }
0x2727   :  { %v3591_v19 = vadd.f32 1.0, %v4800_v12  ;;  %v3841_v12 = vld [vmem:[%s5881_s9 + $0x18] sm:$0xff] }
0x2728   :  { %4801 = vrcp.f32 %v3564_v9  ;;  %v3842_v9 = vld [vmem:[%s5881_s9 + $0x20] sm:$0xff] }
0x2729   :  { %4803 = vrcp.f32 %v3591_v19  ;;  %v3840_v19 = vld [vmem:[%s5881_s9 + $0x10] sm:$0xff] }
0x2735   :  { %v4802_v7 = vpop.eup %4801 }
0x2736   :  { %v4804_v25 = vpop.eup %4803  ;;  %v3571_v32 = vmul.f32 %v4802_v7, %v3569_v29 }
0x2737   :  { %v3598_v43 = vmul.f32 %v4804_v25, %v3596_v42 }
0x278e   :  { %v3574_v8 = vpop.permute.xlu0 %3573 }
0x278f   :  { %v3576_v37 = vmul.f32 %v4802_v7, %v3574_v8 }
0x2791   :  { %3578 = vrot.lane.b32.xlu0 %v3576_v37, %s4999_s2  ;;  %v3838_v37 = vld [vmem:[%s5881_s9] sm:$0xff] }
0x2797   :  { %v3601_v18 = vpop.permute.xlu1 %3600 }
0x2798   :  { %v3603_v39 = vmul.f32 %v4804_v25, %v3601_v18 }
0x279a   :  { %3605 = vrot.lane.b32.xlu1 %v3603_v39, %s4999_s2 }
0x2803   :  { %v3579_v41 = vpop.permute.xlu0 %3578 }
0x2804   :  { %v3581_v36 = vadd.f32 %v3579_v41, %v3571_v32 }
0x2806   :  { %4805 = vtanh.f32 %v3581_v36  ;;  %v3782_v24 = vrot.slane %v3581_v36, 6 }
0x280c   :  { %v3606_v11 = vpop.permute.xlu1 %3605 }
0x280d   :  { %v3608_v44 = vadd.f32 %v3606_v11, %v3598_v43  ;;  %v4011_v43 = vld [vmem:[%s5882_s10] ss:$0 sm:$0xff] }
0x280f   :  { %4807 = vtanh.f32 %v3608_v44  ;;  %v3809_v13 = vrot.slane %v3608_v44, 2 }
0x2813   :  { %v4806_v45 = vpop.eup %4805 }
0x2814   :  { %3584 = vrot.lane.b32.xlu0 %v4806_v45, %s4999_s2 }
0x281c   :  { %v4808_v47 = vpop.eup %4807 }
0x281d   :  { %3611 = vrot.lane.b32.xlu1 %v4808_v47, %s4999_s2 }
0x2886   :  { %v3585_v48 = vpop.permute.xlu0 %3584 }
0x2887   :  { %v3587_v15 = vmul.f32 %v4802_v7, %v3585_v48  ;;  %v3839_v7 = vld [vmem:[%s5881_s9 + $0x8] sm:$0xff] }
0x2889   :  { %v3617_v50 = vrot.slane %v3587_v15, 4 }
0x288b   :  { %3618 = vrot.lane.b32.xlu0 %v3617_v50, %s5000_s24 }
0x288f   :  { %v3612_v51 = vpop.permute.xlu1 %3611 }
0x2890   :  { %v3614_v52 = vmul.f32 %v4804_v25, %v3612_v51 }
0x2892   :  { %v3698_v53 = vrot.slane %v3614_v52, 2 }
0x2894   :  { %3699 = vrot.lane.b32.xlu1 %v3698_v53, %s5000_s24 }
0x28fd   :  { %v3619_v54 = vpop.permute.xlu0 %3618 }
0x28fe   :  { %4521 = vmatmul.mubr.msk.f32.vlgmr.msra.gmra.mxu1 %vm143_vm1, %v3619_v54 }
0x28ff   :  { %4550 = vmatprep.mubr.msk.f32.mxu1 %vm4998_vm0, %v4997_v0  ;;  %4535 = vmatpush3.msra.mxu1 %v3845_v33 }
0x2900   :  { %4536 = vmatprep.subr.mxu1 %v4997_v0 }
0x2901   :  { %4537 = vmatpush3.msra.mxu1 %v3844_v34 }
0x2902   :  { %4538 = vmatprep.subr.mxu1 %v4997_v0 }
0x2903   :  { %4539 = vmatpush3.msra.mxu1 %v3843_v26 }
0x2904   :  { %4540 = vmatprep.subr.mxu1 %v4997_v0 }
0x2905   :  { %4541 = vmatpush3.msra.mxu1 %v3842_v9 }
0x2906   :  { %v3700_v56 = vpop.permute.xlu1 %3699  ;;  %4542 = vmatprep.subr.mxu1 %v4997_v0 }
0x2907   :  { %4532 = vmatmul.mubr.msk.f32.vlgmr.msra.gmra.mxu0 %vm143_vm1, %v3700_v56  ;;  %4543 = vmatpush3.msra.mxu1 %v3841_v12 }
0x2908   :  { %4544 = vmatprep.subr.mxu1 %v4997_v0 }
0x2909   :  { %4545 = vmatpush3.msra.mxu1 %v3840_v19 }
0x290a   :  { %4546 = vmatprep.subr.mxu1 %v4997_v0 }
0x290b   :  { %4547 = vmatpush3.msra.mxu1 %v3839_v7 }
0x290c   :  { %4548 = vmatprep.subr.mxu1 %v4997_v0 }
0x290d   :  { %4549 = vmatpush3.msra.mxu1 %v3838_v37 }
0x29be   :  { %v3688_v57 = vpop.f32.mrf.mxu1 }
0x29bf   :  { %v3693_v59 = vrot.slane %v3688_v57, 2 }
0x29c0   :  { %v4522_v58 = vpop.f32.mrf.mxu1 }
0x29c1   :  { %v3695_v21 = vadd.f32 %v3693_v59, %v3615_v60 }
0x29c3   :  { %4809 = vtanh.f32 %v3695_v21  ;;  %v4009_v31 = vmul.f32 -1.442695, %v3695_v21 }
0x29c7   :  { %v3769_v20 = vpop.f32.mrf.mxu0 }
0x29c8   :  { %v3773_v23 = vadd.f32 %v3769_v20, %v3696_v61 }
0x29c9   :  { %v4533_v40 = vpop.f32.mrf.mxu0 }
0x29ca   :  { %4811 = vtanh.f32 %v3773_v23  ;;  %v4010_v55 = vmul.f32 -1.442695, %v3773_v23 }
0x29cb   :  { %4813 = vpow2.f32 %v4009_v31 }
0x29cc   :  { %4815 = vpow2.f32 %v4010_v55 }
0x29d0   :  { %v4810_v49 = vpop.eup %4809 }
0x29d1   :  { %3786 = vrot.lane.b32.xlu1 %v4810_v49, %s4999_s2 }
0x29d7   :  { %v4812_v62 = vpop.eup %4811 }
0x29d8   :  { %3813 = vrot.lane.b32.xlu0 %v4812_v62, %s4999_s2  ;;  %v4814_v22 = vpop.eup %4813 }
0x29d9   :  { %v3777_v63 = vadd.f32 1.0, %v4814_v22  ;;  %v4816_v1 = vpop.eup %4815 }
0x29da   :  { %v3804_v38 = vadd.f32 1.0, %v4816_v1 }
0x29db   :  { %4817 = vrcp.f32 %v3777_v63 }
0x29dc   :  { %4819 = vrcp.f32 %v3804_v38 }
0x29e8   :  { %v4818_v3 = vpop.eup %4817 }
0x29e9   :  { %v4820_v46 = vpop.eup %4819  ;;  %v3784_v27 = vmul.f32 %v4818_v3, %v3782_v24 }
0x29ea   :  { %v3811_v10 = vmul.f32 %v4820_v46, %v3809_v13 }
0x2a43   :  { %v3787_v2 = vpop.permute.xlu1 %3786 }
0x2a44   :  { %v3789_v6 = vmul.f32 %v4818_v3, %v3787_v2 }
0x2a46   :  { %3791 = vrot.lane.b32.xlu1 %v3789_v6, %s4999_s2 }
0x2a4a   :  { %v3814_v5 = vpop.permute.xlu0 %3813 }
0x2a4b   :  { %v3816_v16 = vmul.f32 %v4820_v46, %v3814_v5 }
0x2a4d   :  { %3818 = vrot.lane.b32.xlu0 %v3816_v16, %s4999_s2 }
0x2ab8   :  { %v3792_v28 = vpop.permute.xlu1 %3791 }
0x2ab9   :  { %v3794_v30 = vadd.f32 %v3792_v28, %v3784_v27 }
0x2abb   :  { %4821 = vtanh.f32 %v3794_v30 }
0x2abf   :  { %v3819_v14 = vpop.permute.xlu0 %3818 }
0x2ac0   :  { %v3821_v17 = vadd.f32 %v3819_v14, %v3811_v10 }
0x2ac2   :  { %4823 = vtanh.f32 %v3821_v17 }
0x2ac8   :  { %v4822_v35 = vpop.eup %4821 }
0x2ac9   :  { %3797 = vrot.lane.b32.xlu1 %v4822_v35, %s4999_s2 }
0x2acf   :  { %v4824_v4 = vpop.eup %4823 }
0x2ad0   :  { %3824 = vrot.lane.b32.xlu0 %v4824_v4, %s4999_s2 }
0x2b3b   :  { %v3798_v8 = vpop.permute.xlu1 %3797 }
0x2b3c   :  { %v3800_v25 = vmul.f32 %v4818_v3, %v3798_v8 }
0x2b3e   :  { %3829 = vrot.lane.b32.xlu0 %v3800_v25, %s5000_s24 }
0x2b42   :  { %v3825_v18 = vpop.permute.xlu0 %3824 }
0x2b43   :  { %v3827_v39 = vmul.f32 %v4820_v46, %v3825_v18 }
0x2b45   :  { %v3833_v29 = vrot.slane %v3827_v39, 2 }
0x2b47   :  { %3834 = vrot.lane.b32.xlu1 %v3833_v29, %s5001_s25 }
0x2bb0   :  { %v3830_v32 = vpop.permute.xlu0 %3829 }
0x2bb9   :  { %v3835_v41 = vpop.permute.xlu1 %3834 }
0x2bba   :  { %v3837_v36 = vsel %vm143_vm1, %v3830_v32, %v3835_v41 }
0x2bbb   :  { %v3854_v42 = vrot.slane %v3837_v36, 6 }
0x2bbd   :  { %4551 = vmatmul.mubr.msk.f32.vlgmr.msra.gmra.mxu1 %vm2037_vm10, %v3854_v42 }
0x2c7d   :  { %v3923_v0 = vpop.f32.mrf.mxu1 }
0x2c7e   :  { %v3924_v11 = vadd.f32 %v4011_v43, %v3923_v0 }
0x2c7f   :  { %v4552_v44 = vpop.f32.mrf.mxu1 }
0x2c80   :  { %3928 = vst.msk [vmem:[#allocation15] sm:$0x3] %vm3927_vm11, %v3924_v11 }
0x2c81   :  { %4968 = shalt.err (!%p4965_p6)
}
0x2c82   :  { %3938 = dma.vmem_to_hbm [thread:$0]  %s3936_s18, 32, %s5883_s11, [#allocation6]  }
0x2c83   :  { %4985 = dma.done.wait [#allocation6], 32  }
0x2c84   :  { %4986 = vsyncadd [#allocation6], 4294967264 }
0x2c85   :  { %3942 = vsyncpa [#allocation5], 1 }
0x2c86   :  { %3943 = vsyncpa [#allocation8], 1 }
0x2c87   :  { %3944 = vsyncpa [#allocation11], 1 }
0x2c88   :  { %3945 = vsyncpa [#allocation14], 1 }
0x2c89   :  { %3946 = vsyncpa [#allocation6], 1 }

</bundles_post_ra>
